<compile_context>
chip_gen: v6e
topology: v6e:2x2x1
jax: 0.10.0
libtpu: 0.0.40
codegen_flags: <defaults>
</compile_context>

<pallas_src>
import functools
import math

import jax
import jax.numpy as jnp
from jax.experimental import pallas as pl
from jax.experimental.pallas import tpu as pltpu


_SQRT_2_OVER_PI = math.sqrt(2.0 / math.pi)
_INV_SQRT_2 = 1.0 / math.sqrt(2.0)


def _round_up(n, m):
    return ((n + m - 1) // m) * m


def _gelu(x, *, exact=False):
    """GELU in f32.

    Default is the tanh approximation: jnp.tanh lowers to the EUP (its own VLIW
    slot), leaving only ~8 VALU ops per element vs. ~20 for the erf polynomial.
    `exact=True` uses the erf formulation (PyTorch nn.GELU() default numerics).
    """
    if exact:
        return 0.5 * x * (1.0 + jax.lax.erf(x * _INV_SQRT_2))
    inner = _SQRT_2_OVER_PI * (x + 0.044715 * (x * x * x))
    return 0.5 * x * (1.0 + jnp.tanh(inner))


def mlp_kernel(x_ref, w1_ref, b1_ref, w2_ref, b2_ref, w3_ref, b3_ref, o_ref,
               *, exact_gelu):
    # In-kernel bf16 cast of the f32 input tile (cheap VPU op; avoids a separate
    # wrapper-side astype pass over HBM).
    x = x_ref[...].astype(jnp.bfloat16)
    # Layer 1: [TB, D_in](bf16) @ [D_in, 1024](bf16) -> f32 acc, +bias, GELU (f32)
    h = jnp.dot(x, w1_ref[...], preferred_element_type=jnp.float32)
    h = _gelu(h + b1_ref[...], exact=exact_gelu)
    # Layer 2: cast activations to bf16 for the MXU, accumulate in f32.
    h = jnp.dot(h.astype(jnp.bfloat16), w2_ref[...],
                preferred_element_type=jnp.float32)
    h = _gelu(h + b2_ref[...], exact=exact_gelu)
    # Layer 3 (N padded to a lane-dense 128 multiple in prepare_params).
    out = jnp.dot(h.astype(jnp.bfloat16), w3_ref[...],
                  preferred_element_type=jnp.float32)
    o_ref[...] = (out + b3_ref[...]).astype(o_ref.dtype)


def _pick_tb(batch, tb_max=512):
    """Batch-tile heuristic.

    - Small batches: one tile just covering the batch (rounded to sublanes).
    - Medium batches: exactly two tiles, so the 'parallel' grid axis can be
      sharded across both v7x TensorCores.
    - Large batches: tb_max-row tiles (fills the 256-wide MXU, amortizes the
      ~0.35 us per-grid-step pipeline overhead).
    """
    if batch <= 128:
        return max(8, _round_up(batch, 8))
    if batch <= 2 * tb_max:
        return _round_up(pl.cdiv(batch, 2), 8)
    return tb_max


def prepare_params(params):
    """One-time (outside the per-call path) parameter prep.

    bf16 weights [in, out], f32 biases [1, out]; layer-3 output dim padded to a
    multiple of 128 lanes (zero columns).  Returns a tuple ending with the true
    out_dim used to slice the padded output back.
    """
    w1, b1, w2, b2, w3, b3 = params
    out_dim = w3.shape[1]
    n_pad = _round_up(out_dim, 128)
    if n_pad != out_dim:
        w3 = jnp.pad(w3, ((0, 0), (0, n_pad - out_dim)))
        b3 = jnp.pad(b3, ((0, 0), (0, n_pad - out_dim)))
    return (w1.astype(jnp.bfloat16), b1.astype(jnp.float32),
            w2.astype(jnp.bfloat16), b2.astype(jnp.float32),
            w3.astype(jnp.bfloat16), b3.astype(jnp.float32), out_dim)


def mlpnet_forward(x, params, *, prepared=False, tb=None, exact_gelu=False):
    """x: [B, C, H, W] (NCHW, matching the PyTorch module). Returns [B, out_dim]."""
    if not prepared:
        params = prepare_params(params)   # convenience path; prefer preparing once
    w1, b1, w2, b2, w3, b3, out_dim = params

    B = x.shape[0]
    x2 = x.reshape(B, -1).astype(jnp.float32)   # nn.Flatten(); bf16 cast is in-kernel
    d_in = x2.shape[1]
    n_pad = w3.shape[1]

    if tb is None:
        tb = _pick_tb(B)
    n_tiles = pl.cdiv(B, tb)   # last tile may be ragged; OOB rows never written back

    # Resident operands: constant block index across the (parallel) batch grid axis.
    def resident(shape):
        return pl.BlockSpec(shape, lambda i: tuple(0 for _ in shape))

    kernel = functools.partial(mlp_kernel, exact_gelu=exact_gelu)

    out = pl.pallas_call(
        kernel,
        out_shape=jax.ShapeDtypeStruct((B, n_pad), jnp.float32),
        grid=(n_tiles,),
        in_specs=[
            pl.BlockSpec((tb, d_in), lambda i: (i, 0)),     # x: tiled over batch
            resident(w1.shape),
            resident(b1.shape),
            resident(w2.shape),
            resident(b2.shape),
            resident(w3.shape),
            resident(b3.shape),
        ],
        out_specs=pl.BlockSpec((tb, n_pad), lambda i: (i, 0)),
        compiler_params=pltpu.CompilerParams(
            dimension_semantics=("parallel",),              # v7x: both TCs take tiles
            vmem_limit_bytes=32 * 1024 * 1024,              # safe on v5e/v6e/v7x
        ),
    )(x2, w1, b1, w2, b2, w3, b3)

    return out[:, :out_dim]


def init_params(key, input_dim, out_dim, dtype=jnp.float32):
    """Deterministic init mirroring nn.Linear's default (uniform +/- 1/sqrt(fan_in))."""
    dims = [(input_dim, 1024), (1024, 512), (512, out_dim)]
    params = []
    for (fan_in, fan_out) in dims:
        key, kw, kb = jax.random.split(key, 3)
        bound = 1.0 / math.sqrt(fan_in)
        w = jax.random.uniform(kw, (fan_in, fan_out), dtype, -bound, bound)
        b = jax.random.uniform(kb, (1, fan_out), dtype, -bound, bound)
        params += [w, b]
    return tuple(params)


def mlpnet_reference_f32(x, params):
    """Pure f32, exact-erf GELU reference (PyTorch-equivalent numerics)."""
    w1, b1, w2, b2, w3, b3 = params
    h = x.reshape(x.shape[0], -1)
    h = _gelu(h @ w1 + b1, exact=True)
    h = _gelu(h @ w2 + b2, exact=True)
    return h @ w3 + b3


def mlpnet_reference_matched(x, params):
    """Reference matching the kernel's precision (bf16 matmul inputs, f32 acc,
    tanh-approx GELU in f32)."""
    w1, b1, w2, b2, w3, b3 = params
    h = x.reshape(x.shape[0], -1).astype(jnp.bfloat16)
    h = jnp.dot(h, w1.astype(jnp.bfloat16), preferred_element_type=jnp.float32)
    h = _gelu(h + b1)
    h = jnp.dot(h.astype(jnp.bfloat16), w2.astype(jnp.bfloat16),
                preferred_element_type=jnp.float32)
    h = _gelu(h + b2)
    return jnp.dot(h.astype(jnp.bfloat16), w3.astype(jnp.bfloat16),
                   preferred_element_type=jnp.float32) + b3


if __name__ == "__main__":
    # Small shapes consistent with the module: NCHW input flattened to input_dim.
    B, C, H, W = 2, 4, 16, 16
    input_dim = C * H * W  # 1024
    out_dim = 10

    key = jax.random.PRNGKey(0)
    kx, kp = jax.random.split(key)
    x = jax.random.normal(kx, (B, C, H, W), jnp.float32)
    params = init_params(kp, input_dim, out_dim)

    # One-time parameter prep (bf16 weights, lane-padded final layer).
    prepared = prepare_params(params)

    out = mlpnet_forward(x, prepared, prepared=True)
    out = jax.block_until_ready(out)
    assert out.shape == (B, out_dim)

    # Tight check against a precision-matched (bf16 MXU inputs, f32 acc, tanh-GELU)
    # reference.
    ref_matched = mlpnet_reference_matched(x, params)
    assert jnp.allclose(out, ref_matched, atol=1e-2, rtol=1e-2), \
        "Pallas output mismatch vs precision-matched reference"

    # Sanity check against the full-f32 exact-erf (PyTorch-equivalent) reference.
    ref_f32 = mlpnet_reference_f32(x, params)
    assert jnp.allclose(out, ref_f32, atol=5e-2, rtol=5e-2), \
        "Pallas output drifted too far from f32 reference"

    # Exercise the multi-tile + ragged-last-tile path (no batch padding).
    B2 = 20
    x2 = jax.random.normal(jax.random.PRNGKey(1), (B2, C, H, W), jnp.float32)
    out2 = jax.block_until_ready(mlpnet_forward(x2, prepared, prepared=True, tb=8))
    ref2 = mlpnet_reference_f32(x2, params)
    assert out2.shape == (B2, out_dim)
    assert jnp.allclose(out2, ref2, atol=5e-2, rtol=5e-2), \
        "Pallas ragged-tile output mismatch vs f32 reference"

    print("KERNEL_OK")
</pallas_src>

<mosaic_0001>
module attributes {stable_mosaic.version = 11 : i64} {
  func.func @mlp_kernel(%arg0: i32, %arg1: memref<8x1024xf32, #tpu.memory_space<vmem>>, %arg2: memref<1024x1024xbf16, #tpu.memory_space<vmem>>, %arg3: memref<1x1024xf32, #tpu.memory_space<vmem>>, %arg4: memref<1024x512xbf16, #tpu.memory_space<vmem>>, %arg5: memref<1x512xf32, #tpu.memory_space<vmem>>, %arg6: memref<512x128xbf16, #tpu.memory_space<vmem>>, %arg7: memref<1x128xf32, #tpu.memory_space<vmem>>, %arg8: memref<8x128xf32, #tpu.memory_space<vmem>>) attributes {dimension_semantics = [#tpu.dimension_semantics<parallel>], iteration_bounds = array<i64: 1>, scalar_prefetch = 0 : i64, scratch_operands = 0 : i64, tpu.core_type = #tpu.core_type<tc>, window_params = [{transform_indices = @transform_0, window_bounds = array<i64: 8, 1024>}, {pipeline_mode = #tpu.pipeline_mode<synchronous>, transform_indices = @transform_1, window_bounds = array<i64: 1024, 1024>}, {pipeline_mode = #tpu.pipeline_mode<synchronous>, transform_indices = @transform_2, window_bounds = array<i64: 1, 1024>}, {pipeline_mode = #tpu.pipeline_mode<synchronous>, transform_indices = @transform_3, window_bounds = array<i64: 1024, 512>}, {pipeline_mode = #tpu.pipeline_mode<synchronous>, transform_indices = @transform_4, window_bounds = array<i64: 1, 512>}, {pipeline_mode = #tpu.pipeline_mode<synchronous>, transform_indices = @transform_5, window_bounds = array<i64: 512, 128>}, {pipeline_mode = #tpu.pipeline_mode<synchronous>, transform_indices = @transform_6, window_bounds = array<i64: 1, 128>}, {transform_indices = @transform_7, window_bounds = array<i64: 8, 128>}]} {
    %c0 = arith.constant 0 : index
    %c0_0 = arith.constant 0 : index
    %0 = vector.load %arg1[%c0, %c0_0] : memref<8x1024xf32, #tpu.memory_space<vmem>>, vector<8x1024xf32>
    %1 = arith.truncf %0 : vector<8x1024xf32> to vector<8x1024xbf16>
    %c0_1 = arith.constant 0 : index
    %c0_2 = arith.constant 0 : index
    %2 = vector.load %arg2[%c0_1, %c0_2] : memref<1024x1024xbf16, #tpu.memory_space<vmem>>, vector<1024x1024xbf16>
    %cst = arith.constant dense<0.000000e+00> : vector<8x1024xf32>
    %3 = tpu.matmul %1, %2, %cst {dimension_numbers = #tpu.dot_dimension_numbers<[1], [0], [0], [1], [0, 0, 1, 1], [], []>} : vector<8x1024xbf16>, vector<1024x1024xbf16>, vector<8x1024xf32> -> vector<8x1024xf32>
    %c0_3 = arith.constant 0 : index
    %c0_4 = arith.constant 0 : index
    %4 = vector.load %arg3[%c0_3, %c0_4] : memref<1x1024xf32, #tpu.memory_space<vmem>>, vector<1x1024xf32>
    %5 = vector.broadcast %4 : vector<1x1024xf32> to vector<8x1024xf32>
    %6 = arith.addf %3, %5 : vector<8x1024xf32>
    %7 = arith.mulf %6, %6 : vector<8x1024xf32>
    %8 = arith.mulf %7, %6 : vector<8x1024xf32>
    %cst_5 = arith.constant 4.471500e-02 : f32
    %9 = vector.broadcast %cst_5 : f32 to vector<8x1024xf32>
    %10 = arith.mulf %9, %8 : vector<8x1024xf32>
    %11 = arith.addf %6, %10 : vector<8x1024xf32>
    %cst_6 = arith.constant 0.797884583 : f32
    %12 = vector.broadcast %cst_6 : f32 to vector<8x1024xf32>
    %13 = arith.mulf %12, %11 : vector<8x1024xf32>
    %cst_7 = arith.constant 5.000000e-01 : f32
    %14 = vector.broadcast %cst_7 : f32 to vector<8x1024xf32>
    %15 = arith.mulf %14, %6 : vector<8x1024xf32>
    %16 = math.tanh %13 : vector<8x1024xf32>
    %cst_8 = arith.constant 1.000000e+00 : f32
    %17 = vector.broadcast %cst_8 : f32 to vector<8x1024xf32>
    %18 = arith.addf %17, %16 : vector<8x1024xf32>
    %19 = arith.mulf %15, %18 : vector<8x1024xf32>
    %20 = arith.truncf %19 : vector<8x1024xf32> to vector<8x1024xbf16>
    %c0_9 = arith.constant 0 : index
    %c0_10 = arith.constant 0 : index
    %21 = vector.load %arg4[%c0_9, %c0_10] : memref<1024x512xbf16, #tpu.memory_space<vmem>>, vector<1024x512xbf16>
    %cst_11 = arith.constant dense<0.000000e+00> : vector<8x512xf32>
    %22 = tpu.matmul %20, %21, %cst_11 {dimension_numbers = #tpu.dot_dimension_numbers<[1], [0], [0], [1], [0, 0, 1, 1], [], []>} : vector<8x1024xbf16>, vector<1024x512xbf16>, vector<8x512xf32> -> vector<8x512xf32>
    %c0_12 = arith.constant 0 : index
    %c0_13 = arith.constant 0 : index
    %23 = vector.load %arg5[%c0_12, %c0_13] : memref<1x512xf32, #tpu.memory_space<vmem>>, vector<1x512xf32>
    %24 = vector.broadcast %23 : vector<1x512xf32> to vector<8x512xf32>
    %25 = arith.addf %22, %24 : vector<8x512xf32>
    %26 = arith.mulf %25, %25 : vector<8x512xf32>
    %27 = arith.mulf %26, %25 : vector<8x512xf32>
    %cst_14 = arith.constant 4.471500e-02 : f32
    %28 = vector.broadcast %cst_14 : f32 to vector<8x512xf32>
    %29 = arith.mulf %28, %27 : vector<8x512xf32>
    %30 = arith.addf %25, %29 : vector<8x512xf32>
    %cst_15 = arith.constant 0.797884583 : f32
    %31 = vector.broadcast %cst_15 : f32 to vector<8x512xf32>
    %32 = arith.mulf %31, %30 : vector<8x512xf32>
    %cst_16 = arith.constant 5.000000e-01 : f32
    %33 = vector.broadcast %cst_16 : f32 to vector<8x512xf32>
    %34 = arith.mulf %33, %25 : vector<8x512xf32>
    %35 = math.tanh %32 : vector<8x512xf32>
    %cst_17 = arith.constant 1.000000e+00 : f32
    %36 = vector.broadcast %cst_17 : f32 to vector<8x512xf32>
    %37 = arith.addf %36, %35 : vector<8x512xf32>
    %38 = arith.mulf %34, %37 : vector<8x512xf32>
    %39 = arith.truncf %38 : vector<8x512xf32> to vector<8x512xbf16>
    %c0_18 = arith.constant 0 : index
    %c0_19 = arith.constant 0 : index
    %40 = vector.load %arg6[%c0_18, %c0_19] : memref<512x128xbf16, #tpu.memory_space<vmem>>, vector<512x128xbf16>
    %cst_20 = arith.constant dense<0.000000e+00> : vector<8x128xf32>
    %41 = tpu.matmul %39, %40, %cst_20 {dimension_numbers = #tpu.dot_dimension_numbers<[1], [0], [0], [1], [0, 0, 1, 1], [], []>} : vector<8x512xbf16>, vector<512x128xbf16>, vector<8x128xf32> -> vector<8x128xf32>
    %c0_21 = arith.constant 0 : index
    %c0_22 = arith.constant 0 : index
    %42 = vector.load %arg7[%c0_21, %c0_22] : memref<1x128xf32, #tpu.memory_space<vmem>>, vector<1x128xf32>
    %43 = vector.broadcast %42 : vector<1x128xf32> to vector<8x128xf32>
    %44 = arith.addf %41, %43 : vector<8x128xf32>
    %c0_23 = arith.constant 0 : index
    %c0_24 = arith.constant 0 : index
    %45 = vector.load %arg8[%c0_23, %c0_24] : memref<8x128xf32, #tpu.memory_space<vmem>>, vector<8x128xf32>
    tpu.vector_store %arg8[%c0_23, %c0_24], %44 {strides = array<i32>} : memref<8x128xf32, #tpu.memory_space<vmem>>, vector<8x128xf32>,
    return
  }
  func.func @transform_0(%arg0: i32) -> (i32, i32) {
    %c0_i32 = arith.constant 0 : i32
    %c0_i32_0 = arith.constant 0 : i32
    return %arg0, %c0_i32 : i32, i32
  }
  func.func @transform_1(%arg0: i32) -> (i32, i32) {
    %c0_i32 = arith.constant 0 : i32
    %c0_i32_0 = arith.constant 0 : i32
    %c0_i32_1 = arith.constant 0 : i32
    return %c0_i32, %c0_i32_0 : i32, i32
  }
  func.func @transform_2(%arg0: i32) -> (i32, i32) {
    %c0_i32 = arith.constant 0 : i32
    %c0_i32_0 = arith.constant 0 : i32
    %c0_i32_1 = arith.constant 0 : i32
    return %c0_i32, %c0_i32_0 : i32, i32
  }
  func.func @transform_3(%arg0: i32) -> (i32, i32) {
    %c0_i32 = arith.constant 0 : i32
    %c0_i32_0 = arith.constant 0 : i32
    %c0_i32_1 = arith.constant 0 : i32
    return %c0_i32, %c0_i32_0 : i32, i32
  }
  func.func @transform_4(%arg0: i32) -> (i32, i32) {
    %c0_i32 = arith.constant 0 : i32
    %c0_i32_0 = arith.constant 0 : i32
    %c0_i32_1 = arith.constant 0 : i32
    return %c0_i32, %c0_i32_0 : i32, i32
  }
  func.func @transform_5(%arg0: i32) -> (i32, i32) {
    %c0_i32 = arith.constant 0 : i32
    %c0_i32_0 = arith.constant 0 : i32
    %c0_i32_1 = arith.constant 0 : i32
    return %c0_i32, %c0_i32_0 : i32, i32
  }
  func.func @transform_6(%arg0: i32) -> (i32, i32) {
    %c0_i32 = arith.constant 0 : i32
    %c0_i32_0 = arith.constant 0 : i32
    %c0_i32_1 = arith.constant 0 : i32
    return %c0_i32, %c0_i32_0 : i32, i32
  }
  func.func @transform_7(%arg0: i32) -> (i32, i32) {
    %c0_i32 = arith.constant 0 : i32
    %c0_i32_0 = arith.constant 0 : i32
    return %arg0, %c0_i32 : i32, i32
  }
}

</mosaic_0001>

<bundles_post_ra>
// kernel: tpu_custom_call.1
= control target key start
LH: loop header
LB: loop body
LE: loop exit
PB: predicated region body
PF: predicated region fallthrough
CT: control target
= control target key end

     0   :  { %12 = vsyncpa [#allocation3], 0  ;;  %s8188_s0 = inlined_call_operand.hbm [shape: f32[2,1024], index: 0, kind: input, shape index: {}]   ;;  %s8189_s1 = inlined_call_operand.hbm [shape: bf16[1024,1024], index: 1, kind: input, shape index: {}]   ;;  %s8190_s2 = inlined_call_operand.hbm [shape: f32[1,1024], index: 2, kind: input, shape index: {}]   ;;  %s8191_s3 = inlined_call_operand.hbm [shape: bf16[1024,512], index: 3, kind: input, shape index: {}]   ;;  %s8192_s4 = inlined_call_operand.hbm [shape: f32[1,512], index: 4, kind: input, shape index: {}]   ;;  %s8193_s5 = inlined_call_operand.hbm [shape: bf16[512,128], index: 5, kind: input, shape index: {}]   ;;  %s8194_s6 = inlined_call_operand.hbm [shape: f32[1,128], index: 6, kind: input, shape index: {}]   ;;  %s8195_s7 = inlined_call_operand.hbm [shape: f32[2,128], index: 7, kind: output, shape index: {}]  }
   0x1   :  { %13 = vsyncpa [#allocation6], 0 }
   0x2   :  { %14 = vsyncpa [#allocation9], 0 }
   0x3   :  { %15 = vsyncpa [#allocation12], 0 }
   0x4   :  { %16 = vsyncpa [#allocation4], 0 }
   0x5   :  { %21 = vsyncadd [#allocation3], 768  ;;  %s7845_s24 = smov [#allocation5]  }
   0x6   :  { %s34_s25 = sshll.u32 %s7845_s24, 4  ;;  %s35_s25 = int_to_ptr.vmem [resolvable:$true] %s34_s25 }
   0x7   :  { %s7683_s26 = scalar_lea.vmem %s35_s25, 65536  ;;  %p7688_p1 = scmp.lt.s32.totalorder %s35_s25, %s35_s25 }
   0x8   :  { %p7684_p0 = scmp.ne.s32.totalorder %s35_s25, %s7683_s26  ;;  %p7689_p2 = scmp.lt.s32.totalorder %s7683_s26, %s7683_s26 }
   0xa   :  { %p7690_p3 = por %p7689_p2, %p7688_p1 }
   0xc   :  { %p7691_p4 = pnand %p7690_p3, %p7684_p0 }
   0xe   :  { %7694 = shalt.err (!%p7691_p4)
}
   0xf   :  { %s7846_s27 = smov 512   ;;  %s7847_s28 = smov 32  }
  0x10   :  { %40 = dma.hbm_to_vmem [thread:$0]  %s8189_s1, 65536, %s35_s25, [#allocation6], %s7846_s27, %s7846_s27, %s7847_s28  }
  0x11   :  { %s7848_s8 = smov [#allocation8]   ;;  %s7849_s10 = smov [#allocation11]  }
  0x12   :  { %s56_s9 = sshll.u32 %s7848_s8, 4  ;;  %s78_s11 = sshll.u32 %s7849_s10, 4  ;;  %s57_s9 = int_to_ptr.vmem [resolvable:$true] %s56_s9  ;;  %s79_s11 = int_to_ptr.vmem [resolvable:$true] %s78_s11 }
  0x13   :  { %s7703_s12 = scalar_lea.vmem %s57_s9, 32768  ;;  %p7708_p6 = scmp.lt.s32.totalorder %s57_s9, %s57_s9 }
  0x14   :  { %p7704_p5 = scmp.ne.s32.totalorder %s57_s9, %s7703_s12  ;;  %p7709_p7 = scmp.lt.s32.totalorder %s7703_s12, %s7703_s12 }
  0x16   :  { %p7710_p8 = por %p7709_p7, %p7708_p6 }
  0x18   :  { %p7711_p9 = pnand %p7710_p8, %p7704_p5 }
  0x1a   :  { %7714 = shalt.err (!%p7711_p9)
}
  0x1b   :  { %s7850_s13 = smov 256   ;;  %s7851_s14 = smov 16  }
  0x1c   :  { %62 = dma.hbm_to_vmem [thread:$0]  %s8191_s3, 32768, %s57_s9, [#allocation9], %s7850_s13, %s7850_s13, %s7851_s14  }
  0x1d   :  { %s7723_s1 = scalar_lea.vmem %s79_s11, 4096  ;;  %p7728_p11 = scmp.lt.s32.totalorder %s79_s11, %s79_s11 }
  0x1e   :  { %p7724_p10 = scmp.ne.s32.totalorder %s79_s11, %s7723_s1  ;;  %p7729_p12 = scmp.lt.s32.totalorder %s7723_s1, %s7723_s1 }
  0x20   :  { %p7730_p13 = por %p7729_p12, %p7728_p11 }
  0x22   :  { %p7731_p0 = pnand %p7730_p13, %p7724_p10 }
  0x24   :  { %7734 = shalt.err (!%p7731_p0)
}
  0x25   :  { %s7852_s17 = smov 64   ;;  %s7853_s18 = smov 4  }
  0x26   :  { %84 = dma.hbm_to_vmem [thread:$0]  %s8193_s5, 4096, %s79_s11, [#allocation12], %s7852_s17, %s7852_s17, %s7853_s18  }
  0x27   :  { %s7854_s21 = smov [#allocation2]   ;;  %s7855_s23 = smov [#allocation7]  }
  0x28   :  { %s22_s22 = sshll.u32 %s7854_s21, 4  ;;  %s47_s24 = sshll.u32 %s7855_s23, 4  ;;  %s23_s22 = int_to_ptr.vmem [resolvable:$true] %s22_s22  ;;  %s48_s24 = int_to_ptr.vmem [resolvable:$true] %s47_s24 }
  0x29   :  { %s7743_s3 = scalar_lea.vmem %s23_s22, 256  ;;  %s7747_s25 = scalar_lea.vmem %s23_s22, 1024 }
  0x2a   :  { %p7744_p1 = scmp.ne.s32.totalorder %s23_s22, %s7743_s3  ;;  %p7748_p2 = scmp.lt.s32.totalorder %s23_s22, %s23_s22 }
  0x2b   :  { %p7749_p3 = scmp.lt.s32.totalorder %s7747_s25, %s7743_s3 }
  0x2d   :  { %p7750_p4 = por %p7749_p3, %p7748_p2 }
  0x2f   :  { %p7751_p5 = pnand %p7750_p4, %p7744_p1 }
  0x31   :  { %7754 = shalt.err (!%p7751_p5)
}
  0x32   :  { %28 = dma.hbm_to_vmem [thread:$0]  %s8188_s0, 256, %s23_s22, [#allocation3], %s7850_s13, %s7850_s13, %s7851_s14  }
  0x33   :  { %s7763_s5 = scalar_lea.vmem %s48_s24, 128  ;;  %p7768_p7 = scmp.lt.s32.totalorder %s48_s24, %s48_s24 }
  0x34   :  { %p7764_p6 = scmp.ne.s32.totalorder %s48_s24, %s7763_s5  ;;  %p7769_p8 = scmp.lt.s32.totalorder %s7763_s5, %s7763_s5 }
  0x36   :  { %p7770_p9 = por %p7769_p8, %p7768_p7 }
  0x38   :  { %p7771_p10 = pnand %p7770_p9, %p7764_p6 }
  0x3a   :  { %7774 = shalt.err (!%p7771_p10)
}
  0x3b   :  { %50 = dma.hbm_to_vmem [thread:$0]  %s8190_s2, 128, %s48_s24, [#allocation6]  }
  0x3c   :  { %s7856_s8 = smov [#allocation10]   ;;  %s7857_s10 = smov [#allocation13]  }
  0x3d   :  { %s69_s9 = sshll.u32 %s7856_s8, 4  ;;  %s91_s11 = sshll.u32 %s7857_s10, 4  ;;  %s70_s9 = int_to_ptr.vmem [resolvable:$true] %s69_s9  ;;  %s92_s11 = int_to_ptr.vmem [resolvable:$true] %s91_s11 }
  0x3e   :  { %s7783_s12 = scalar_lea.vmem %s70_s9, 64  ;;  %p7788_p12 = scmp.lt.s32.totalorder %s70_s9, %s70_s9 }
  0x3f   :  { %p7784_p11 = scmp.ne.s32.totalorder %s70_s9, %s7783_s12  ;;  %p7789_p13 = scmp.lt.s32.totalorder %s7783_s12, %s7783_s12 }
  0x41   :  { %p7790_p0 = por %p7789_p13, %p7788_p12 }
  0x43   :  { %p7791_p1 = pnand %p7790_p0, %p7784_p11 }
  0x45   :  { %7794 = shalt.err (!%p7791_p1)
}
  0x46   :  { %72 = dma.hbm_to_vmem [thread:$0]  %s8192_s4, 64, %s70_s9, [#allocation9]  }
  0x47   :  { %s7803_s14 = scalar_lea.vmem %s92_s11, 16  ;;  %s7807_s2 = scalar_lea.vmem %s92_s11, 32 }
  0x48   :  { %p7804_p2 = scmp.ne.s32.totalorder %s92_s11, %s7803_s14  ;;  %p7808_p3 = scmp.lt.s32.totalorder %s92_s11, %s92_s11 }
  0x49   :  { %p7809_p4 = scmp.lt.s32.totalorder %s7807_s2, %s7803_s14 }
  0x4b   :  { %p7810_p5 = por %p7809_p4, %p7808_p3 }
  0x4d   :  { %p7811_p6 = pnand %p7810_p5, %p7804_p2 }
  0x4f   :  { %7814 = shalt.err (!%p7811_p6)
}
  0x50   :  { %94 = dma.hbm_to_vmem [thread:$0]  %s8194_s6, 16, %s92_s11, [#allocation12]  }
  0x51   :  { %7835 = dma.done.wait [#allocation3], 1024  }
  0x52   :  { %7836 = vsyncadd [#allocation3], 4294966272 }
  0x53   :  { %7837 = dma.done.wait [#allocation6], 65664  }
  0x54   :  { %7838 = vsyncadd [#allocation6], 4294901632 }
  0x55   :  { %7839 = dma.done.wait [#allocation9], 32832  }
  0x56   :  { %7840 = vsyncadd [#allocation9], 4294934464 }
  0x57   :  { %7841 = dma.done.wait [#allocation12], 4112  }
  0x58   :  { %7842 = vsyncadd [#allocation12], 4294963184  ;;  %v277_v0 = vld [vmem:[#allocation5 + $0x1c0] sm:$0xff]  ;;  %v7858_v35 = vmov 1983009808   ;;  %v140_v37 = vlaneseq }
  0x59   :  { %v281_v1 = vld [vmem:[#allocation5 + $0x1e0] sm:$0xff]  ;;  %v138_v36 = vunpack.c.l.s4 %v7858_v35 }
  0x5a   :  { %v405_v2 = vld [vmem:[#allocation5 + $0x5c0] sm:$0xff]  ;;  %v6418_v3 = vcombine.high %v277_v0, %v281_v1  ;;  %v6417_v5 = vcombine.low %v277_v0, %v281_v1  ;;  %v7929_v47 = vshrl.u32 %v140_v37, 7 }
  0x5b   :  { %v409_v4 = vld [vmem:[#allocation5 + $0x5e0] sm:$0xff]  ;;  %v139_v46 = vunpack.c.0.s8 %v138_v36 }
  0x5c   :  { %v269_v6 = vld [vmem:[#allocation5 + $0x180] sm:$0xff]  ;;  %v6546_v8 = vcombine.high %v405_v2, %v409_v4  ;;  %v6545_v9 = vcombine.low %v405_v2, %v409_v4  ;;  %3335 = vmatprep.subr.bf16.mxu0 %v6418_v3 }
  0x5d   :  { %v273_v7 = vld [vmem:[#allocation5 + $0x1a0] sm:$0xff]  ;;  %3336 = vmatpush1.bf16.msra.mxu0 %v6417_v5  ;;  %v7932_v58 = vsub.s32 %v139_v46, %v7929_v47 }
  0x5e   :  { %v6410_v10 = vcombine.high %v269_v6, %v273_v7  ;;  %v397_v11 = vld [vmem:[#allocation5 + $0x580] sm:$0xff]  ;;  %3376 = vmatprep.subr.bf16.mxu1 %v6546_v8  ;;  %v6409_v18 = vcombine.low %v269_v6, %v273_v7 }
  0x5f   :  { %v401_v12 = vld [vmem:[#allocation5 + $0x5a0] sm:$0xff]  ;;  %3377 = vmatpush1.bf16.msra.mxu1 %v6545_v9 }
  0x60   :  { %v261_v13 = vld [vmem:[#allocation5 + $0x140] sm:$0xff]  ;;  %v6538_v14 = vcombine.high %v397_v11, %v401_v12  ;;  %3337 = vmatprep.subr.bf16.mxu0 %v6410_v10  ;;  %v6537_v19 = vcombine.low %v397_v11, %v401_v12 }
  0x61   :  { %v265_v15 = vld [vmem:[#allocation5 + $0x160] sm:$0xff]  ;;  %3338 = vmatpush1.bf16.msra.mxu0 %v6409_v18 }
  0x62   :  { %v389_v16 = vld [vmem:[#allocation5 + $0x540] sm:$0xff]  ;;  %v6402_v20 = vcombine.high %v261_v13, %v265_v15  ;;  %3378 = vmatprep.subr.bf16.mxu1 %v6538_v14  ;;  %v6401_v26 = vcombine.low %v261_v13, %v265_v15 }
  0x63   :  { %v393_v17 = vld [vmem:[#allocation5 + $0x560] sm:$0xff]  ;;  %3379 = vmatpush1.bf16.msra.mxu1 %v6537_v19 }
  0x64   :  { %v6530_v21 = vcombine.high %v389_v16, %v393_v17  ;;  %v253_v22 = vld [vmem:[#allocation5 + $0x100] sm:$0xff]  ;;  %3339 = vmatprep.subr.bf16.mxu0 %v6402_v20  ;;  %v6529_v27 = vcombine.low %v389_v16, %v393_v17 }
  0x65   :  { %v257_v23 = vld [vmem:[#allocation5 + $0x120] sm:$0xff]  ;;  %3340 = vmatpush1.bf16.msra.mxu0 %v6401_v26 }
  0x66   :  { %v381_v24 = vld [vmem:[#allocation5 + $0x500] sm:$0xff]  ;;  %v6394_v28 = vcombine.high %v253_v22, %v257_v23  ;;  %3380 = vmatprep.subr.bf16.mxu1 %v6530_v21  ;;  %v6393_v34 = vcombine.low %v253_v22, %v257_v23 }
  0x67   :  { %v385_v25 = vld [vmem:[#allocation5 + $0x520] sm:$0xff]  ;;  %3381 = vmatpush1.bf16.msra.mxu1 %v6529_v27 }
  0x68   :  { %v6522_v29 = vcombine.high %v381_v24, %v385_v25  ;;  %v245_v30 = vld [vmem:[#allocation5 + $0xc0] sm:$0xff]  ;;  %3341 = vmatprep.subr.bf16.mxu0 %v6394_v28  ;;  %v6521_v38 = vcombine.low %v381_v24, %v385_v25 }
  0x69   :  { %v249_v31 = vld [vmem:[#allocation5 + $0xe0] sm:$0xff]  ;;  %3342 = vmatpush1.bf16.msra.mxu0 %v6393_v34 }
  0x6a   :  { %v373_v32 = vld [vmem:[#allocation5 + $0x4c0] sm:$0xff]  ;;  %v6386_v39 = vcombine.high %v245_v30, %v249_v31  ;;  %3382 = vmatprep.subr.bf16.mxu1 %v6522_v29  ;;  %v6385_v45 = vcombine.low %v245_v30, %v249_v31 }
  0x6b   :  { %v377_v33 = vld [vmem:[#allocation5 + $0x4e0] sm:$0xff]  ;;  %3383 = vmatpush1.bf16.msra.mxu1 %v6521_v38 }
  0x6c   :  { %v6514_v40 = vcombine.high %v373_v32, %v377_v33  ;;  %v237_v41 = vld [vmem:[#allocation5 + $0x80] sm:$0xff]  ;;  %3343 = vmatprep.subr.bf16.mxu0 %v6386_v39  ;;  %v6513_v48 = vcombine.low %v373_v32, %v377_v33 }
  0x6d   :  { %v241_v42 = vld [vmem:[#allocation5 + $0xa0] sm:$0xff]  ;;  %3344 = vmatpush1.bf16.msra.mxu0 %v6385_v45 }
  0x6e   :  { %v365_v43 = vld [vmem:[#allocation5 + $0x480] sm:$0xff]  ;;  %v6378_v49 = vcombine.high %v237_v41, %v241_v42  ;;  %3384 = vmatprep.subr.bf16.mxu1 %v6514_v40  ;;  %v6377_v55 = vcombine.low %v237_v41, %v241_v42 }
  0x6f   :  { %v369_v44 = vld [vmem:[#allocation5 + $0x4a0] sm:$0xff]  ;;  %3385 = vmatpush1.bf16.msra.mxu1 %v6513_v48 }
  0x70   :  { %v6506_v50 = vcombine.high %v365_v43, %v369_v44  ;;  %v229_v51 = vld [vmem:[#allocation5 + $0x40] sm:$0xff]  ;;  %3345 = vmatprep.subr.bf16.mxu0 %v6378_v49  ;;  %v6505_v59 = vcombine.low %v365_v43, %v369_v44 }
  0x71   :  { %v233_v52 = vld [vmem:[#allocation5 + $0x60] sm:$0xff]  ;;  %3346 = vmatpush1.bf16.msra.mxu0 %v6377_v55 }
  0x72   :  { %v357_v53 = vld [vmem:[#allocation5 + $0x440] sm:$0xff]  ;;  %v6370_v60 = vcombine.high %v229_v51, %v233_v52  ;;  %3386 = vmatprep.subr.bf16.mxu1 %v6506_v50  ;;  %v6369_v4 = vcombine.low %v229_v51, %v233_v52 }
  0x73   :  { %v361_v54 = vld [vmem:[#allocation5 + $0x460] sm:$0xff]  ;;  %3387 = vmatpush1.bf16.msra.mxu1 %v6505_v59 }
  0x74   :  { %v221_v56 = vld [vmem:[#allocation5] sm:$0xff]  ;;  %v6498_v63 = vcombine.high %v357_v53, %v361_v54  ;;  %v6497_v5 = vcombine.low %v357_v53, %v361_v54  ;;  %3347 = vmatprep.subr.bf16.mxu0 %v6370_v60 }
  0x75   :  { %v225_v57 = vld [vmem:[#allocation5 + $0x20] sm:$0xff]  ;;  %3348 = vmatpush1.bf16.msra.mxu0 %v6369_v4 }
  0x76   :  { %v349_v61 = vld [vmem:[#allocation5 + $0x400] sm:$0xff]  ;;  %v6362_v6 = vcombine.high %v221_v56, %v225_v57  ;;  %3388 = vmatprep.subr.bf16.mxu1 %v6498_v63  ;;  %v6361_v18 = vcombine.low %v221_v56, %v225_v57 }
  0x77   :  { %v353_v62 = vld [vmem:[#allocation5 + $0x420] sm:$0xff]  ;;  %3389 = vmatpush1.bf16.msra.mxu1 %v6497_v5 }
  0x78   :  { %v7222_v0 = vld [vmem:[#allocation2] ss:$16 sps:$4 sm:$0xff]   ;;  %v7226_v2 = vld [vmem:[#allocation2 + $0x4] ss:$16 sps:$4 sm:$0xff]   ;;  %v6490_v11 = vcombine.high %v349_v61, %v353_v62  ;;  %v6489_v19 = vcombine.low %v349_v61, %v353_v62  ;;  %3349 = vmatprep.subr.bf16.mxu0 %v6362_v6 }
  0x79   :  { %v7224_v1 = vld [vmem:[#allocation2 + $0x20] ss:$16 sps:$4 sm:$0xff]   ;;  %v7227_v3 = vld [vmem:[#allocation2 + $0x24] ss:$16 sps:$4 sm:$0xff]   ;;  %v7935_v7 = vrot.slane %v7222_v0, %v7932_v58  ;;  %v7941_v9 = vrot.slane %v7226_v2, %v7932_v58  ;;  %3350 = vmatpush1.bf16.msra.mxu0 %v6361_v18  ;;  %v7230_v18 = vld [vmem:[#allocation2 + $0x28] ss:$16 sps:$4 sm:$0xff]  }
  0x7a   :  { %v7938_v8 = vrot.slane %v7224_v1, %v7932_v58  ;;  %v7944_v10 = vrot.slane %v7227_v3, %v7932_v58  ;;  %v341_v12 = vld [vmem:[#allocation5 + $0x3c0] sm:$0xff]  ;;  %3390 = vmatprep.subr.bf16.mxu1 %v6490_v11 }
  0x7b   :  { %v345_v13 = vld [vmem:[#allocation5 + $0x3e0] sm:$0xff]  ;;  %3391 = vmatpush1.bf16.msra.mxu1 %v6489_v19 }
  0x7c   :  { %v469_v14 = vld [vmem:[#allocation5 + $0x7c0] sm:$0xff]  ;;  %v166_v16 = vcombine.high %v7935_v7, %v7938_v8  ;;  %v168_v17 = vcombine.high %v7941_v9, %v7944_v10  ;;  %v6482_v20 = vcombine.high %v341_v12, %v345_v13  ;;  %v6481_v28 = vcombine.low %v341_v12, %v345_v13 }
  0x7d   :  { %v473_v15 = vld [vmem:[#allocation5 + $0x7e0] sm:$0xff] }
  0x7e   :  { %v7950_v21 = vpack.c.bf16 %v166_v16, %v166_v16  ;;  %v7952_v22 = vpack.c.bf16 %v168_v17, %v168_v17  ;;  %v6610_v23 = vcombine.high %v469_v14, %v473_v15  ;;  %v333_v24 = vld [vmem:[#allocation5 + $0x380] sm:$0xff]  ;;  %3351 = vmatprep.subr.bf16.mxu0 %v6482_v20  ;;  %v6609_v29 = vcombine.low %v469_v14, %v473_v15  ;;  %v7228_v17 = vld [vmem:[#allocation2 + $0x8] ss:$16 sps:$4 sm:$0xff]   ;;  %v7232_v20 = vld [vmem:[#allocation2 + $0xc] ss:$16 sps:$4 sm:$0xff]  }
  0x7f   :  { %v337_v25 = vld [vmem:[#allocation5 + $0x3a0] sm:$0xff]  ;;  %3352 = vmatpush2.bf16.msra.mxu0 %v6481_v28 }
  0x80   :  { %v461_v26 = vld [vmem:[#allocation5 + $0x780] sm:$0xff]  ;;  %3367 = vmatprep.mubr.bf16.mxu0 %v7950_v21  ;;  %3408 = vmatprep.mubr.bf16.mxu1 %v7952_v22  ;;  %v6474_v30 = vcombine.high %v333_v24, %v337_v25  ;;  %v6473_v36 = vcombine.low %v333_v24, %v337_v25 }
  0x81   :  { %v465_v27 = vld [vmem:[#allocation5 + $0x7a0] sm:$0xff]  ;;  %3392 = vmatprep.subr.bf16.mxu1 %v6610_v23  ;;  %v7233_v23 = vld [vmem:[#allocation2 + $0x2c] ss:$16 sps:$4 sm:$0xff]  }
  0x82   :  { %v6602_v31 = vcombine.high %v461_v26, %v465_v27  ;;  %v325_v32 = vld [vmem:[#allocation5 + $0x340] sm:$0xff]  ;;  %3393 = vmatpush2.bf16.msra.mxu1 %v6609_v29  ;;  %3353 = vmatprep.subr.bf16.mxu0 %v6474_v30  ;;  %v6601_v37 = vcombine.low %v461_v26, %v465_v27  ;;  %v7957_v30 = vrot.slane %v7228_v17, %v7932_v58 }
  0x83   :  { %v329_v33 = vld [vmem:[#allocation5 + $0x360] sm:$0xff]  ;;  %3354 = vmatpush2.bf16.msra.mxu0 %v6473_v36  ;;  %v7968_v36 = vrot.slane %v7233_v23, %v7932_v58 }
  0x84   :  { %v453_v34 = vld [vmem:[#allocation5 + $0x740] sm:$0xff]  ;;  %v6466_v38 = vcombine.high %v325_v32, %v329_v33  ;;  %3394 = vmatprep.subr.bf16.mxu1 %v6602_v31  ;;  %v6465_v44 = vcombine.low %v325_v32, %v329_v33  ;;  %v7960_v31 = vrot.slane %v7230_v18, %v7932_v58  ;;  %v165_v32 = vcombine.low %v7935_v7, %v7938_v8 }
  0x85   :  { %v457_v35 = vld [vmem:[#allocation5 + $0x760] sm:$0xff] }
  0x86   :  { %v6594_v39 = vcombine.high %v453_v34, %v457_v35  ;;  %v317_v40 = vld [vmem:[#allocation5 + $0x300] sm:$0xff]  ;;  %3395 = vmatpush2.bf16.msra.mxu1 %v6601_v37  ;;  %3355 = vmatprep.subr.bf16.mxu0 %v6466_v38  ;;  %v6593_v45 = vcombine.low %v453_v34, %v457_v35  ;;  %v7965_v35 = vrot.slane %v7232_v20, %v7932_v58 }
  0x87   :  { %v321_v41 = vld [vmem:[#allocation5 + $0x320] sm:$0xff]  ;;  %3356 = vmatpush2.bf16.msra.mxu0 %v6465_v44  ;;  %v167_v38 = vcombine.low %v7941_v9, %v7944_v10 }
  0x88   :  { %v445_v42 = vld [vmem:[#allocation5 + $0x700] sm:$0xff]  ;;  %v6458_v46 = vcombine.high %v317_v40, %v321_v41  ;;  %3396 = vmatprep.subr.bf16.mxu1 %v6594_v39  ;;  %v6457_v53 = vcombine.low %v317_v40, %v321_v41 }
  0x89   :  { %v449_v43 = vld [vmem:[#allocation5 + $0x720] sm:$0xff]  ;;  %v7978_v9 = vpack.c.bf16 %v167_v38, %v167_v38 }
  0x8a   :  { %v6586_v48 = vcombine.high %v445_v42, %v449_v43  ;;  %v309_v49 = vld [vmem:[#allocation5 + $0x2c0] sm:$0xff]  ;;  %3397 = vmatpush2.bf16.msra.mxu1 %v6593_v45  ;;  %3357 = vmatprep.subr.bf16.mxu0 %v6458_v46  ;;  %v6585_v54 = vcombine.low %v445_v42, %v449_v43  ;;  %v202_v42 = vcombine.high %v7957_v30, %v7960_v31 }
  0x8b   :  { %v313_v50 = vld [vmem:[#allocation5 + $0x2e0] sm:$0xff]  ;;  %3358 = vmatpush2.bf16.msra.mxu0 %v6457_v53  ;;  %v7974_v43 = vpack.c.bf16 %v165_v32, %v165_v32  ;;  %v204_v45 = vcombine.high %v7965_v35, %v7968_v36 }
  0x8c   :  { %v437_v51 = vld [vmem:[#allocation5 + $0x6c0] sm:$0xff]  ;;  %v6450_v55 = vcombine.high %v309_v49, %v313_v50  ;;  %3398 = vmatprep.subr.bf16.mxu1 %v6586_v48  ;;  %v6449_v62 = vcombine.low %v309_v49, %v313_v50 }
  0x8d   :  { %v441_v52 = vld [vmem:[#allocation5 + $0x6e0] sm:$0xff] }
  0x8e   :  { %v301_v56 = vld [vmem:[#allocation5 + $0x280] sm:$0xff]  ;;  %v6578_v57 = vcombine.high %v437_v51, %v441_v52  ;;  %3399 = vmatpush2.bf16.msra.mxu1 %v6585_v54  ;;  %3359 = vmatprep.subr.bf16.mxu0 %v6450_v55  ;;  %v6577_v63 = vcombine.low %v437_v51, %v441_v52  ;;  %v7980_v52 = vpack.c.bf16 %v202_v42, %v202_v42 }
  0x8f   :  { %v305_v59 = vld [vmem:[#allocation5 + $0x2a0] sm:$0xff]  ;;  %3360 = vmatpush2.bf16.msra.mxu0 %v6449_v62  ;;  %v7983_v55 = vpack.c.bf16 %v204_v45, %v204_v45 }
  0x90   :  { %v429_v60 = vld [vmem:[#allocation5 + $0x680] sm:$0xff]  ;;  %v6442_v0 = vcombine.high %v301_v56, %v305_v59  ;;  %3400 = vmatprep.subr.bf16.mxu1 %v6578_v57  ;;  %v6441_v6 = vcombine.low %v301_v56, %v305_v59 }
  0x91   :  { %v433_v61 = vld [vmem:[#allocation5 + $0x6a0] sm:$0xff] }
  0x92   :  { %v6570_v1 = vcombine.high %v429_v60, %v433_v61  ;;  %v293_v2 = vld [vmem:[#allocation5 + $0x240] sm:$0xff]  ;;  %3401 = vmatpush2.bf16.msra.mxu1 %v6577_v63  ;;  %3361 = vmatprep.subr.bf16.mxu0 %v6442_v0  ;;  %v6569_v11 = vcombine.low %v429_v60, %v433_v61 }
  0x93   :  { %v297_v3 = vld [vmem:[#allocation5 + $0x260] sm:$0xff]  ;;  %3362 = vmatpush2.bf16.msra.mxu0 %v6441_v6 }
  0x94   :  { %v421_v4 = vld [vmem:[#allocation5 + $0x640] sm:$0xff]  ;;  %v6434_v12 = vcombine.high %v293_v2, %v297_v3  ;;  %3402 = vmatprep.subr.bf16.mxu1 %v6570_v1  ;;  %v6433_v24 = vcombine.low %v293_v2, %v297_v3 }
  0x95   :  { %v425_v5 = vld [vmem:[#allocation5 + $0x660] sm:$0xff] }
  0x96   :  { %v285_v13 = vld [vmem:[#allocation5 + $0x200] sm:$0xff]  ;;  %v6562_v15 = vcombine.high %v421_v4, %v425_v5  ;;  %3403 = vmatpush2.bf16.msra.mxu1 %v6569_v11  ;;  %3363 = vmatprep.subr.bf16.mxu0 %v6434_v12  ;;  %v6561_v25 = vcombine.low %v421_v4, %v425_v5 }
  0x97   :  { %v289_v14 = vld [vmem:[#allocation5 + $0x220] sm:$0xff]  ;;  %3364 = vmatpush2.bf16.msra.mxu0 %v6433_v24 }
  0x98   :  { %v413_v16 = vld [vmem:[#allocation5 + $0x600] sm:$0xff]  ;;  %v6426_v26 = vcombine.high %v285_v13, %v289_v14  ;;  %3404 = vmatprep.subr.bf16.mxu1 %v6562_v15  ;;  %v6425_v37 = vcombine.low %v285_v13, %v289_v14 }
  0x99   :  { %v417_v19 = vld [vmem:[#allocation5 + $0x620] sm:$0xff] }
  0x9a   :  { %v6554_v27 = vcombine.high %v413_v16, %v417_v19  ;;  %v533_v28 = vld [vmem:[#allocation5 + $0x9c0] sm:$0xff]  ;;  %3405 = vmatpush2.bf16.msra.mxu1 %v6561_v25  ;;  %3365 = vmatprep.subr.bf16.mxu0 %v6426_v26  ;;  %v6553_v39 = vcombine.low %v413_v16, %v417_v19 }
  0x9b   :  { %v537_v29 = vld [vmem:[#allocation5 + $0x9e0] sm:$0xff]  ;;  %3366 = vmatpush2.bf16.msra.mxu0 %v6425_v37 }
  0x9c   :  { %v661_v33 = vld [vmem:[#allocation5 + $0xdc0] sm:$0xff]  ;;  %v6674_v40 = vcombine.high %v533_v28, %v537_v29  ;;  %3406 = vmatprep.subr.bf16.mxu1 %v6554_v27  ;;  %v6673_v10 = vcombine.low %v533_v28, %v537_v29 }
  0x9d   :  { %v665_v34 = vld [vmem:[#allocation5 + $0xde0] sm:$0xff] }
  0x9e   :  { %v6802_v41 = vcombine.high %v661_v33, %v665_v34  ;;  %v525_v7 = vld [vmem:[#allocation5 + $0x980] sm:$0xff]  ;;  %3407 = vmatpush2.bf16.msra.mxu1 %v6553_v39  ;;  %3417 = vmatprep.subr.bf16.mxu0 %v6674_v40  ;;  %v6801_v46 = vcombine.low %v661_v33, %v665_v34 }
  0x9f   :  { %v529_v8 = vld [vmem:[#allocation5 + $0x9a0] sm:$0xff]  ;;  %3368 = vmatmul.mubr.bf16.vlgmr.msra.gmra.mxu0 %v7974_v43 }
  0xa0   :  { %v653_v58 = vld [vmem:[#allocation5 + $0xd80] sm:$0xff]  ;;  %v6666_v48 = vcombine.high %v525_v7, %v529_v8  ;;  %3458 = vmatprep.subr.bf16.mxu1 %v6802_v41  ;;  %3418 = vmatpush1.bf16.msra.mxu0 %v6673_v10  ;;  %v6665_v56 = vcombine.low %v525_v7, %v529_v8 }
  0xa1   :  { %v657_v44 = vld [vmem:[#allocation5 + $0xda0] sm:$0xff]  ;;  %3409 = vmatmul.mubr.bf16.vlgmr.msra.gmra.mxu1 %v7978_v9  ;;  %3449 = vmatprep.mubr.bf16.mxu0 %v7980_v52 }
  0xa2   :  { %v6794_v49 = vcombine.high %v653_v58, %v657_v44  ;;  %v517_v50 = vld [vmem:[#allocation5 + $0x940] sm:$0xff]  ;;  %3459 = vmatpush1.bf16.msra.mxu1 %v6801_v46  ;;  %3419 = vmatprep.subr.bf16.mxu0 %v6666_v48  ;;  %v6793_v57 = vcombine.low %v653_v58, %v657_v44 }
  0xa3   :  { %v521_v51 = vld [vmem:[#allocation5 + $0x960] sm:$0xff]  ;;  %3490 = vmatprep.mubr.bf16.mxu1 %v7983_v55 }
  0xa4   :  { %v645_v53 = vld [vmem:[#allocation5 + $0xd40] sm:$0xff]  ;;  %v6658_v59 = vcombine.high %v517_v50, %v521_v51  ;;  %3460 = vmatprep.subr.bf16.mxu1 %v6794_v49  ;;  %3420 = vmatpush1.bf16.msra.mxu0 %v6665_v56  ;;  %v6657_v1 = vcombine.low %v517_v50, %v521_v51 }
  0xa5   :  { %v649_v54 = vld [vmem:[#allocation5 + $0xd60] sm:$0xff] }
  0xa6   :  { %v6786_v60 = vcombine.high %v645_v53, %v649_v54  ;;  %v509_v61 = vld [vmem:[#allocation5 + $0x900] sm:$0xff]  ;;  %3461 = vmatpush1.bf16.msra.mxu1 %v6793_v57  ;;  %3421 = vmatprep.subr.bf16.mxu0 %v6658_v59  ;;  %v6785_v2 = vcombine.low %v645_v53, %v649_v54 }
  0xa7   :  { %v513_v62 = vld [vmem:[#allocation5 + $0x920] sm:$0xff] }
  0xa8   :  { %v637_v63 = vld [vmem:[#allocation5 + $0xd00] sm:$0xff]  ;;  %v6650_v3 = vcombine.high %v509_v61, %v513_v62  ;;  %3462 = vmatprep.subr.bf16.mxu1 %v6786_v60  ;;  %3422 = vmatpush1.bf16.msra.mxu0 %v6657_v1  ;;  %v6649_v13 = vcombine.low %v509_v61, %v513_v62 }
  0xa9   :  { %v641_v0 = vld [vmem:[#allocation5 + $0xd20] sm:$0xff] }
  0xaa   :  { %v501_v4 = vld [vmem:[#allocation5 + $0x8c0] sm:$0xff]  ;;  %v6778_v11 = vcombine.high %v637_v63, %v641_v0  ;;  %3463 = vmatpush1.bf16.msra.mxu1 %v6785_v2  ;;  %3423 = vmatprep.subr.bf16.mxu0 %v6650_v3  ;;  %v6777_v14 = vcombine.low %v637_v63, %v641_v0 }
  0xab   :  { %v505_v5 = vld [vmem:[#allocation5 + $0x8e0] sm:$0xff] }
  0xac   :  { %v629_v6 = vld [vmem:[#allocation5 + $0xcc0] sm:$0xff]  ;;  %v6642_v15 = vcombine.high %v501_v4, %v505_v5  ;;  %3464 = vmatprep.subr.bf16.mxu1 %v6778_v11  ;;  %3424 = vmatpush1.bf16.msra.mxu0 %v6649_v13  ;;  %v6641_v23 = vcombine.low %v501_v4, %v505_v5 }
  0xad   :  { %v633_v12 = vld [vmem:[#allocation5 + $0xce0] sm:$0xff] }
  0xae   :  { %v493_v16 = vld [vmem:[#allocation5 + $0x880] sm:$0xff]  ;;  %v6770_v19 = vcombine.high %v629_v6, %v633_v12  ;;  %3465 = vmatpush1.bf16.msra.mxu1 %v6777_v14  ;;  %3425 = vmatprep.subr.bf16.mxu0 %v6642_v15  ;;  %v6769_v24 = vcombine.low %v629_v6, %v633_v12 }
  0xaf   :  { %v497_v17 = vld [vmem:[#allocation5 + $0x8a0] sm:$0xff] }
  0xb0   :  { %v621_v18 = vld [vmem:[#allocation5 + $0xc80] sm:$0xff]  ;;  %v6634_v25 = vcombine.high %v493_v16, %v497_v17  ;;  %3466 = vmatprep.subr.bf16.mxu1 %v6770_v19  ;;  %3426 = vmatpush1.bf16.msra.mxu0 %v6641_v23  ;;  %v6633_v33 = vcombine.low %v493_v16, %v497_v17 }
  0xb1   :  { %v625_v20 = vld [vmem:[#allocation5 + $0xca0] sm:$0xff] }
  0xb2   :  { %v485_v26 = vld [vmem:[#allocation5 + $0x840] sm:$0xff]  ;;  %v6762_v29 = vcombine.high %v621_v18, %v625_v20  ;;  %3467 = vmatpush1.bf16.msra.mxu1 %v6769_v24  ;;  %3427 = vmatprep.subr.bf16.mxu0 %v6634_v25  ;;  %v6761_v34 = vcombine.low %v621_v18, %v625_v20 }
  0xb3   :  { %v489_v27 = vld [vmem:[#allocation5 + $0x860] sm:$0xff] }
  0xb4   :  { %v613_v28 = vld [vmem:[#allocation5 + $0xc40] sm:$0xff]  ;;  %v6626_v37 = vcombine.high %v485_v26, %v489_v27  ;;  %3468 = vmatprep.subr.bf16.mxu1 %v6762_v29  ;;  %3428 = vmatpush1.bf16.msra.mxu0 %v6633_v33  ;;  %v6625_v8 = vcombine.low %v485_v26, %v489_v27 }
  0xb5   :  { %v617_v32 = vld [vmem:[#allocation5 + $0xc60] sm:$0xff] }
  0xb6   :  { %v477_v38 = vld [vmem:[#allocation5 + $0x800] sm:$0xff]  ;;  %v6754_v41 = vcombine.high %v613_v28, %v617_v32  ;;  %3469 = vmatpush1.bf16.msra.mxu1 %v6761_v34  ;;  %3429 = vmatprep.subr.bf16.mxu0 %v6626_v37  ;;  %v6753_v42 = vcombine.low %v613_v28, %v617_v32 }
  0xb7   :  { %v481_v39 = vld [vmem:[#allocation5 + $0x820] sm:$0xff] }
  0xb8   :  { %v605_v40 = vld [vmem:[#allocation5 + $0xc00] sm:$0xff]  ;;  %v6618_v58 = vcombine.high %v477_v38, %v481_v39  ;;  %3470 = vmatprep.subr.bf16.mxu1 %v6754_v41  ;;  %3430 = vmatpush1.bf16.msra.mxu0 %v6625_v8  ;;  %v6617_v49 = vcombine.low %v477_v38, %v481_v39 }
  0xb9   :  { %v609_v7 = vld [vmem:[#allocation5 + $0xc20] sm:$0xff] }
  0xba   :  { %v597_v44 = vld [vmem:[#allocation5 + $0xbc0] sm:$0xff]  ;;  %v6746_v46 = vcombine.high %v605_v40, %v609_v7  ;;  %3471 = vmatpush1.bf16.msra.mxu1 %v6753_v42  ;;  %3431 = vmatprep.subr.bf16.mxu0 %v6618_v58  ;;  %v6745_v50 = vcombine.low %v605_v40, %v609_v7 }
  0xbb   :  { %v601_v45 = vld [vmem:[#allocation5 + $0xbe0] sm:$0xff] }
  0xbc   :  { %v725_v10 = vld [vmem:[#allocation5 + $0xfc0] sm:$0xff]  ;;  %v6738_v51 = vcombine.high %v597_v44, %v601_v45  ;;  %3472 = vmatprep.subr.bf16.mxu1 %v6746_v46  ;;  %3432 = vmatpush1.bf16.msra.mxu0 %v6617_v49  ;;  %v6737_v60 = vcombine.low %v597_v44, %v601_v45 }
  0xbd   :  { %v729_v48 = vld [vmem:[#allocation5 + $0xfe0] sm:$0xff] }
  0xbe   :  { %v589_v53 = vld [vmem:[#allocation5 + $0xb80] sm:$0xff]  ;;  %v6866_v57 = vcombine.high %v725_v10, %v729_v48  ;;  %3473 = vmatpush1.bf16.msra.mxu1 %v6745_v50  ;;  %3433 = vmatprep.subr.bf16.mxu0 %v6738_v51  ;;  %v6865_v61 = vcombine.low %v725_v10, %v729_v48 }
  0xbf   :  { %v593_v54 = vld [vmem:[#allocation5 + $0xba0] sm:$0xff] }
  0xc0   :  { %v717_v56 = vld [vmem:[#allocation5 + $0xf80] sm:$0xff]  ;;  %v6730_v62 = vcombine.high %v589_v53, %v593_v54  ;;  %3474 = vmatprep.subr.bf16.mxu1 %v6866_v57  ;;  %3434 = vmatpush2.bf16.msra.mxu0 %v6737_v60  ;;  %v6729_v4 = vcombine.low %v589_v53, %v593_v54  ;;  %v278_v57 = vld [vmem:[#allocation5 + $0x1c8] sm:$0xff] }
  0xc1   :  { %v721_v59 = vld [vmem:[#allocation5 + $0xfa0] sm:$0xff]  ;;  %v406_v60 = vld [vmem:[#allocation5 + $0x5c8] sm:$0xff] }
  0xc2   :  { %v581_v63 = vld [vmem:[#allocation5 + $0xb40] sm:$0xff]  ;;  %v6858_v2 = vcombine.high %v717_v56, %v721_v59  ;;  %3475 = vmatpush2.bf16.msra.mxu1 %v6865_v61  ;;  %3435 = vmatprep.subr.bf16.mxu0 %v6730_v62  ;;  %v6857_v5 = vcombine.low %v717_v56, %v721_v59  ;;  %v282_v59 = vld [vmem:[#allocation5 + $0x1e8] sm:$0xff] }
  0xc3   :  { %v585_v0 = vld [vmem:[#allocation5 + $0xb60] sm:$0xff]  ;;  %v410_v62 = vld [vmem:[#allocation5 + $0x5e8] sm:$0xff] }
  0xc4   :  { %v709_v1 = vld [vmem:[#allocation5 + $0xf40] sm:$0xff]  ;;  %v6722_v6 = vcombine.high %v581_v63, %v585_v0  ;;  %3476 = vmatprep.subr.bf16.mxu1 %v6858_v2  ;;  %3436 = vmatpush2.bf16.msra.mxu0 %v6729_v4  ;;  %v6721_v16 = vcombine.low %v581_v63, %v585_v0  ;;  %v201_v63 = vcombine.low %v7957_v30, %v7960_v31  ;;  %v270_v4 = vld [vmem:[#allocation5 + $0x188] sm:$0xff] }
  0xc5   :  { %v713_v3 = vld [vmem:[#allocation5 + $0xf60] sm:$0xff]  ;;  %v6419_v30 = vcombine.low %v278_v57, %v282_v59  ;;  %v6547_v31 = vcombine.low %v406_v60, %v410_v62 }
  0xc6   :  { %v573_v11 = vld [vmem:[#allocation5 + $0xb00] sm:$0xff]  ;;  %v6850_v14 = vcombine.high %v709_v1, %v713_v3  ;;  %3477 = vmatpush2.bf16.msra.mxu1 %v6857_v5  ;;  %3437 = vmatprep.subr.bf16.mxu0 %v6722_v6  ;;  %v6849_v17 = vcombine.low %v709_v1, %v713_v3  ;;  %v203_v1 = vcombine.low %v7965_v35, %v7968_v36  ;;  %v274_v5 = vld [vmem:[#allocation5 + $0x1a8] sm:$0xff] }
  0xc7   :  { %v577_v12 = vld [vmem:[#allocation5 + $0xb20] sm:$0xff]  ;;  %v6420_v3 = vcombine.high %v278_v57, %v282_v59  ;;  %v398_v6 = vld [vmem:[#allocation5 + $0x588] sm:$0xff]  ;;  %v6412_v35 = vcombine.high %v270_v4, %v274_v5 }
  0xc8   :  { %v701_v13 = vld [vmem:[#allocation5 + $0xf00] sm:$0xff]  ;;  %v6714_v18 = vcombine.high %v573_v11, %v577_v12  ;;  %3478 = vmatprep.subr.bf16.mxu1 %v6850_v14  ;;  %3438 = vmatpush2.bf16.msra.mxu0 %v6721_v16  ;;  %v6713_v26 = vcombine.low %v573_v11, %v577_v12  ;;  %v6548_v11 = vcombine.high %v406_v60, %v410_v62  ;;  %v402_v12 = vld [vmem:[#allocation5 + $0x5a8] sm:$0xff] }
  0xc9   :  { %v705_v15 = vld [vmem:[#allocation5 + $0xf20] sm:$0xff]  ;;  %v7994_v14 = vpack.c.bf16 %v203_v1, %v203_v1  ;;  %v262_v36 = vld [vmem:[#allocation5 + $0x148] sm:$0xff]  ;;  %v6540_v16 = vcombine.high %v398_v6, %v402_v12 }
  0xca   :  { %v565_v19 = vld [vmem:[#allocation5 + $0xac0] sm:$0xff]  ;;  %v6842_v24 = vcombine.high %v701_v13, %v705_v15  ;;  %3479 = vmatpush2.bf16.msra.mxu1 %v6849_v17  ;;  %3439 = vmatprep.subr.bf16.mxu0 %v6714_v18  ;;  %v6841_v27 = vcombine.low %v701_v13, %v705_v15  ;;  %v7992_v13 = vpack.c.bf16 %v201_v63, %v201_v63  ;;  %v266_v15 = vld [vmem:[#allocation5 + $0x168] sm:$0xff] }
  0xcb   :  { %v569_v20 = vld [vmem:[#allocation5 + $0xae0] sm:$0xff]  ;;  %v390_v17 = vld [vmem:[#allocation5 + $0x548] sm:$0xff] }
  0xcc   :  { %v693_v23 = vld [vmem:[#allocation5 + $0xec0] sm:$0xff]  ;;  %v6706_v28 = vcombine.high %v565_v19, %v569_v20  ;;  %3480 = vmatprep.subr.bf16.mxu1 %v6842_v24  ;;  %3440 = vmatpush2.bf16.msra.mxu0 %v6713_v26  ;;  %v6705_v38 = vcombine.low %v565_v19, %v569_v20  ;;  %v394_v18 = vld [vmem:[#allocation5 + $0x568] sm:$0xff]  ;;  %v6411_v19 = vcombine.low %v270_v4, %v274_v5 }
  0xcd   :  { %v697_v25 = vld [vmem:[#allocation5 + $0xee0] sm:$0xff]  ;;  %v6539_v20 = vcombine.low %v398_v6, %v402_v12  ;;  %v254_v24 = vld [vmem:[#allocation5 + $0x108] sm:$0xff] }
  0xce   :  { %v557_v29 = vld [vmem:[#allocation5 + $0xa80] sm:$0xff]  ;;  %v6834_v34 = vcombine.high %v693_v23, %v697_v25  ;;  %3481 = vmatpush2.bf16.msra.mxu1 %v6841_v27  ;;  %3441 = vmatprep.subr.bf16.mxu0 %v6706_v28  ;;  %v6833_v39 = vcombine.low %v693_v23, %v697_v25  ;;  %v6404_v23 = vcombine.high %v262_v36, %v266_v15  ;;  %v258_v25 = vld [vmem:[#allocation5 + $0x128] sm:$0xff] }
  0xcf   :  { %v561_v32 = vld [vmem:[#allocation5 + $0xaa0] sm:$0xff]  ;;  %v382_v26 = vld [vmem:[#allocation5 + $0x508] sm:$0xff]  ;;  %v6532_v27 = vcombine.high %v390_v17, %v394_v18 }
  0xd0   :  { %v685_v33 = vld [vmem:[#allocation5 + $0xe80] sm:$0xff]  ;;  %v6698_v40 = vcombine.high %v557_v29, %v561_v32  ;;  %3482 = vmatprep.subr.bf16.mxu1 %v6834_v34  ;;  %3442 = vmatpush2.bf16.msra.mxu0 %v6705_v38  ;;  %v6697_v44 = vcombine.low %v557_v29, %v561_v32  ;;  %v386_v28 = vld [vmem:[#allocation5 + $0x528] sm:$0xff]  ;;  %v6403_v29 = vcombine.low %v262_v36, %v266_v15 }
  0xd1   :  { %v689_v37 = vld [vmem:[#allocation5 + $0xea0] sm:$0xff]  ;;  %v6531_v32 = vcombine.low %v390_v17, %v394_v18  ;;  %v246_v34 = vld [vmem:[#allocation5 + $0xc8] sm:$0xff] }
  0xd2   :  { %v549_v41 = vld [vmem:[#allocation5 + $0xa40] sm:$0xff]  ;;  %v6826_v42 = vcombine.high %v685_v33, %v689_v37  ;;  %3483 = vmatpush2.bf16.msra.mxu1 %v6833_v39  ;;  %3443 = vmatprep.subr.bf16.mxu0 %v6698_v40  ;;  %v6825_v45 = vcombine.low %v685_v33, %v689_v37  ;;  %v6396_v33 = vcombine.high %v254_v24, %v258_v25  ;;  %v250_v37 = vld [vmem:[#allocation5 + $0xe8] sm:$0xff] }
  0xd3   :  { %v553_v7 = vld [vmem:[#allocation5 + $0xa60] sm:$0xff]  ;;  %v374_v38 = vld [vmem:[#allocation5 + $0x4c8] sm:$0xff]  ;;  %v6524_v39 = vcombine.high %v382_v26, %v386_v28 }
  0xd4   :  { %v677_v8 = vld [vmem:[#allocation5 + $0xe40] sm:$0xff]  ;;  %v6690_v10 = vcombine.high %v549_v41, %v553_v7  ;;  %3484 = vmatprep.subr.bf16.mxu1 %v6826_v42  ;;  %3444 = vmatpush2.bf16.msra.mxu0 %v6697_v44  ;;  %v6689_v53 = vcombine.low %v549_v41, %v553_v7  ;;  %v378_v40 = vld [vmem:[#allocation5 + $0x4e8] sm:$0xff]  ;;  %v6395_v41 = vcombine.low %v254_v24, %v258_v25 }
  0xd5   :  { %v681_v58 = vld [vmem:[#allocation5 + $0xe60] sm:$0xff]  ;;  %v6523_v7 = vcombine.low %v382_v26, %v386_v28  ;;  %v238_v42 = vld [vmem:[#allocation5 + $0x88] sm:$0xff] }
  0xd6   :  { %v541_v46 = vld [vmem:[#allocation5 + $0xa00] sm:$0xff]  ;;  %v6818_v50 = vcombine.high %v677_v8, %v681_v58  ;;  %3485 = vmatpush2.bf16.msra.mxu1 %v6825_v45  ;;  %3445 = vmatprep.subr.bf16.mxu0 %v6690_v10  ;;  %v6817_v54 = vcombine.low %v677_v8, %v681_v58  ;;  %v6388_v8 = vcombine.high %v246_v34, %v250_v37  ;;  %v242_v58 = vld [vmem:[#allocation5 + $0xa8] sm:$0xff] }
  0xd7   :  { %v545_v48 = vld [vmem:[#allocation5 + $0xa20] sm:$0xff]  ;;  %v366_v44 = vld [vmem:[#allocation5 + $0x488] sm:$0xff]  ;;  %v6516_v45 = vcombine.high %v374_v38, %v378_v40  ;;  %v6379_v57 = vcombine.low %v238_v42, %v242_v58 }
  0xd8   :  { %v669_v49 = vld [vmem:[#allocation5 + $0xe00] sm:$0xff]  ;;  %v6682_v56 = vcombine.high %v541_v46, %v545_v48  ;;  %3486 = vmatprep.subr.bf16.mxu1 %v6818_v50  ;;  %3446 = vmatpush2.bf16.msra.mxu0 %v6689_v53  ;;  %v6681_v0 = vcombine.low %v541_v46, %v545_v48  ;;  %v370_v10 = vld [vmem:[#allocation5 + $0x4a8] sm:$0xff]  ;;  %v6387_v46 = vcombine.low %v246_v34, %v250_v37 }
  0xd9   :  { %v673_v51 = vld [vmem:[#allocation5 + $0xe20] sm:$0xff]  ;;  %v6515_v48 = vcombine.low %v374_v38, %v378_v40  ;;  %v230_v50 = vld [vmem:[#allocation5 + $0x48] sm:$0xff]  ;;  %v6507_v59 = vcombine.low %v366_v44, %v370_v10 }
  0xda   :  { %v6810_v61 = vcombine.high %v669_v49, %v673_v51  ;;  %3487 = vmatpush2.bf16.msra.mxu1 %v6817_v54  ;;  %3447 = vmatprep.subr.bf16.mxu0 %v6682_v56  ;;  %v6809_v2 = vcombine.low %v669_v49, %v673_v51  ;;  %v6380_v49 = vcombine.high %v238_v42, %v242_v58  ;;  %v234_v51 = vld [vmem:[#allocation5 + $0x68] sm:$0xff] }
  0xdb   :  { %v358_v53 = vld [vmem:[#allocation5 + $0x448] sm:$0xff]  ;;  %v6508_v54 = vcombine.high %v366_v44, %v370_v10  ;;  %v6372_v60 = vcombine.high %v230_v50, %v234_v51 }
  0xdc   :  { %3488 = vmatprep.subr.bf16.mxu1 %v6810_v61  ;;  %3448 = vmatpush2.bf16.msra.mxu0 %v6681_v0  ;;  %v362_v56 = vld [vmem:[#allocation5 + $0x468] sm:$0xff] }
  0xdd   :  { %3499 = vmatprep.subr.bf16.mxu0 %v6420_v3  ;;  %v222_v61 = vld [vmem:[#allocation5 + $0x8] sm:$0xff]  ;;  %v6500_v0 = vcombine.high %v358_v53, %v362_v56  ;;  %v6499_v3 = vcombine.low %v358_v53, %v362_v56 }
  0xde   :  { %3489 = vmatpush2.bf16.msra.mxu1 %v6809_v2  ;;  %v226_v62 = vld [vmem:[#allocation5 + $0x28] sm:$0xff]  ;;  %v6371_v2 = vcombine.low %v230_v50, %v234_v51 }
  0xdf   :  { %3540 = vmatprep.subr.bf16.mxu1 %v6548_v11  ;;  %3450 = vmatmul.mubr.bf16.vlgmr.msra.gmra.mxu0 %v7992_v13  ;;  %v350_v63 = vld [vmem:[#allocation5 + $0x408] sm:$0xff]  ;;  %v6364_v4 = vcombine.high %v222_v61, %v226_v62 }
  0xe0   :  { %3500 = vmatpush1.bf16.msra.mxu0 %v6419_v30  ;;  %3531 = vmatprep.mubr.bf16.mxu0 %v7950_v21  ;;  %v354_v1 = vld [vmem:[#allocation5 + $0x428] sm:$0xff] }
  0xe1   :  { %3491 = vmatmul.mubr.bf16.vlgmr.msra.gmra.mxu1 %v7994_v14  ;;  %3501 = vmatprep.subr.bf16.mxu0 %v6412_v35  ;;  %v342_v5 = vld [vmem:[#allocation5 + $0x3c8] sm:$0xff]  ;;  %v6492_v12 = vcombine.high %v350_v63, %v354_v1  ;;  %v6491_v35 = vcombine.low %v350_v63, %v354_v1 }
  0xe2   :  { %3541 = vmatpush1.bf16.msra.mxu1 %v6547_v31  ;;  %3572 = vmatprep.mubr.bf16.mxu1 %v7952_v22  ;;  %v346_v6 = vld [vmem:[#allocation5 + $0x3e8] sm:$0xff]  ;;  %v6363_v31 = vcombine.low %v222_v61, %v226_v62 }
  0xe3   :  { %3542 = vmatprep.subr.bf16.mxu1 %v6540_v16  ;;  %v470_v11 = vld [vmem:[#allocation5 + $0x7c8] sm:$0xff]  ;;  %v6484_v36 = vcombine.high %v342_v5, %v346_v6 }
  0xe4   :  { %3502 = vmatpush1.bf16.msra.mxu0 %v6411_v19  ;;  %v474_v30 = vld [vmem:[#allocation5 + $0x7e8] sm:$0xff] }
  0xe5   :  { %3503 = vmatprep.subr.bf16.mxu0 %v6404_v23  ;;  %v334_v15 = vld [vmem:[#allocation5 + $0x388] sm:$0xff]  ;;  %v6612_v18 = vcombine.high %v470_v11, %v474_v30  ;;  %v6611_v23 = vcombine.low %v470_v11, %v474_v30 }
  0xe6   :  { %3543 = vmatpush1.bf16.msra.mxu1 %v6539_v20  ;;  %v338_v16 = vld [vmem:[#allocation5 + $0x3a8] sm:$0xff]  ;;  %v6483_v20 = vcombine.low %v342_v5, %v346_v6 }
  0xe7   :  { %3544 = vmatprep.subr.bf16.mxu1 %v6532_v27  ;;  %v462_v17 = vld [vmem:[#allocation5 + $0x788] sm:$0xff]  ;;  %v6476_v24 = vcombine.high %v334_v15, %v338_v16 }
  0xe8   :  { %3504 = vmatpush1.bf16.msra.mxu0 %v6403_v29  ;;  %v466_v19 = vld [vmem:[#allocation5 + $0x7a8] sm:$0xff] }
  0xe9   :  { %3505 = vmatprep.subr.bf16.mxu0 %v6396_v33  ;;  %v326_v25 = vld [vmem:[#allocation5 + $0x348] sm:$0xff]  ;;  %v6604_v28 = vcombine.high %v462_v17, %v466_v19  ;;  %v6603_v33 = vcombine.low %v462_v17, %v466_v19 }
  0xea   :  { %3545 = vmatpush1.bf16.msra.mxu1 %v6531_v32  ;;  %v330_v26 = vld [vmem:[#allocation5 + $0x368] sm:$0xff]  ;;  %v6475_v32 = vcombine.low %v334_v15, %v338_v16 }
  0xeb   :  { %3546 = vmatprep.subr.bf16.mxu1 %v6524_v39  ;;  %v454_v27 = vld [vmem:[#allocation5 + $0x748] sm:$0xff]  ;;  %v6468_v34 = vcombine.high %v326_v25, %v330_v26 }
  0xec   :  { %3506 = vmatpush1.bf16.msra.mxu0 %v6395_v41  ;;  %v458_v29 = vld [vmem:[#allocation5 + $0x768] sm:$0xff] }
  0xed   :  { %3507 = vmatprep.subr.bf16.mxu0 %v6388_v8  ;;  %v318_v37 = vld [vmem:[#allocation5 + $0x308] sm:$0xff]  ;;  %v6596_v40 = vcombine.high %v454_v27, %v458_v29  ;;  %v6595_v8 = vcombine.low %v454_v27, %v458_v29 }
  0xee   :  { %3547 = vmatpush1.bf16.msra.mxu1 %v6523_v7  ;;  %v322_v38 = vld [vmem:[#allocation5 + $0x328] sm:$0xff]  ;;  %v6467_v7 = vcombine.low %v326_v25, %v330_v26 }
  0xef   :  { %3548 = vmatprep.subr.bf16.mxu1 %v6516_v45  ;;  %v446_v39 = vld [vmem:[#allocation5 + $0x708] sm:$0xff]  ;;  %v6460_v42 = vcombine.high %v318_v37, %v322_v38 }
  0xf0   :  { %3508 = vmatpush1.bf16.msra.mxu0 %v6387_v46  ;;  %v450_v41 = vld [vmem:[#allocation5 + $0x728] sm:$0xff] }
  0xf1   :  { %3509 = vmatprep.subr.bf16.mxu0 %v6380_v49  ;;  %v310_v58 = vld [vmem:[#allocation5 + $0x2c8] sm:$0xff]  ;;  %v6588_v10 = vcombine.high %v446_v39, %v450_v41  ;;  %v6587_v49 = vcombine.low %v446_v39, %v450_v41 }
  0xf2   :  { %3549 = vmatpush1.bf16.msra.mxu1 %v6515_v48  ;;  %v314_v44 = vld [vmem:[#allocation5 + $0x2e8] sm:$0xff]  ;;  %v6459_v48 = vcombine.low %v318_v37, %v322_v38 }
  0xf3   :  { %3550 = vmatprep.subr.bf16.mxu1 %v6508_v54  ;;  %v438_v45 = vld [vmem:[#allocation5 + $0x6c8] sm:$0xff]  ;;  %v6452_v50 = vcombine.high %v310_v58, %v314_v44 }
  0xf4   :  { %3510 = vmatpush1.bf16.msra.mxu0 %v6379_v57  ;;  %v442_v46 = vld [vmem:[#allocation5 + $0x6e8] sm:$0xff] }
  0xf5   :  { %3511 = vmatprep.subr.bf16.mxu0 %v6372_v60  ;;  %v302_v51 = vld [vmem:[#allocation5 + $0x288] sm:$0xff]  ;;  %v6580_v56 = vcombine.high %v438_v45, %v442_v46  ;;  %v6579_v60 = vcombine.low %v438_v45, %v442_v46 }
  0xf6   :  { %3551 = vmatpush1.bf16.msra.mxu1 %v6507_v59  ;;  %v306_v53 = vld [vmem:[#allocation5 + $0x2a8] sm:$0xff]  ;;  %v6451_v59 = vcombine.low %v310_v58, %v314_v44 }
  0xf7   :  { %3552 = vmatprep.subr.bf16.mxu1 %v6500_v0  ;;  %v430_v54 = vld [vmem:[#allocation5 + $0x688] sm:$0xff]  ;;  %v6444_v61 = vcombine.high %v302_v51, %v306_v53 }
  0xf8   :  { %3512 = vmatpush1.bf16.msra.mxu0 %v6371_v2  ;;  %v434_v57 = vld [vmem:[#allocation5 + $0x6a8] sm:$0xff] }
  0xf9   :  { %3513 = vmatprep.subr.bf16.mxu0 %v6364_v4  ;;  %v294_v62 = vld [vmem:[#allocation5 + $0x248] sm:$0xff]  ;;  %v6572_v1 = vcombine.high %v430_v54, %v434_v57  ;;  %v6571_v4 = vcombine.low %v430_v54, %v434_v57 }
  0xfa   :  { %3553 = vmatpush1.bf16.msra.mxu1 %v6499_v3  ;;  %v298_v63 = vld [vmem:[#allocation5 + $0x268] sm:$0xff]  ;;  %v6443_v3 = vcombine.low %v302_v51, %v306_v53 }
  0xfb   :  { %3554 = vmatprep.subr.bf16.mxu1 %v6492_v12  ;;  %v422_v0 = vld [vmem:[#allocation5 + $0x648] sm:$0xff]  ;;  %v6436_v5 = vcombine.high %v294_v62, %v298_v63 }
  0xfc   :  { %3514 = vmatpush1.bf16.msra.mxu0 %v6363_v31  ;;  %v426_v2 = vld [vmem:[#allocation5 + $0x668] sm:$0xff] }
  0xfd   :  { %3515 = vmatprep.subr.bf16.mxu0 %v6484_v36  ;;  %v286_v6 = vld [vmem:[#allocation5 + $0x208] sm:$0xff]  ;;  %v6564_v30 = vcombine.high %v422_v0, %v426_v2  ;;  %v6563_v36 = vcombine.low %v422_v0, %v426_v2 }
  0xfe   :  { %3555 = vmatpush1.bf16.msra.mxu1 %v6491_v35  ;;  %v290_v11 = vld [vmem:[#allocation5 + $0x228] sm:$0xff]  ;;  %v6435_v35 = vcombine.low %v294_v62, %v298_v63 }
  0xff   :  { %3556 = vmatprep.subr.bf16.mxu1 %v6612_v18  ;;  %v414_v12 = vld [vmem:[#allocation5 + $0x608] sm:$0xff]  ;;  %v6428_v15 = vcombine.high %v286_v6, %v290_v11 }
 0x100   :  { %3516 = vmatpush2.bf16.msra.mxu0 %v6483_v20  ;;  %v418_v31 = vld [vmem:[#allocation5 + $0x628] sm:$0xff] }
 0x101   :  { %3517 = vmatprep.subr.bf16.mxu0 %v6476_v24  ;;  %v534_v16 = vld [vmem:[#allocation5 + $0x9c8] sm:$0xff]  ;;  %v6556_v19 = vcombine.high %v414_v12, %v418_v31  ;;  %v6555_v24 = vcombine.low %v414_v12, %v418_v31 }
 0x102   :  { %3557 = vmatpush2.bf16.msra.mxu1 %v6611_v23  ;;  %v538_v17 = vld [vmem:[#allocation5 + $0x9e8] sm:$0xff]  ;;  %v6427_v23 = vcombine.low %v286_v6, %v290_v11 }
 0x103   :  { %3558 = vmatprep.subr.bf16.mxu1 %v6604_v28  ;;  %v662_v18 = vld [vmem:[#allocation5 + $0xdc8] sm:$0xff]  ;;  %v6676_v25 = vcombine.high %v534_v16, %v538_v17 }
 0x104   :  { %3518 = vmatpush2.bf16.msra.mxu0 %v6475_v32  ;;  %v666_v20 = vld [vmem:[#allocation5 + $0xde8] sm:$0xff] }
 0x105   :  { %3519 = vmatprep.subr.bf16.mxu0 %v6468_v34  ;;  %v526_v26 = vld [vmem:[#allocation5 + $0x988] sm:$0xff]  ;;  %v6804_v29 = vcombine.high %v662_v18, %v666_v20  ;;  %v6803_v34 = vcombine.low %v662_v18, %v666_v20 }
 0x106   :  { %3559 = vmatpush2.bf16.msra.mxu1 %v6603_v33  ;;  %v530_v27 = vld [vmem:[#allocation5 + $0x9a8] sm:$0xff]  ;;  %v6675_v33 = vcombine.low %v534_v16, %v538_v17 }
 0x107   :  { %3560 = vmatprep.subr.bf16.mxu1 %v6596_v40  ;;  %v654_v28 = vld [vmem:[#allocation5 + $0xd88] sm:$0xff]  ;;  %v6668_v37 = vcombine.high %v526_v26, %v530_v27 }
 0x108   :  { %3520 = vmatpush2.bf16.msra.mxu0 %v6467_v7  ;;  %v658_v32 = vld [vmem:[#allocation5 + $0xda8] sm:$0xff] }
 0x109   :  { %3521 = vmatprep.subr.bf16.mxu0 %v6460_v42  ;;  %v518_v38 = vld [vmem:[#allocation5 + $0x948] sm:$0xff]  ;;  %v6796_v41 = vcombine.high %v654_v28, %v658_v32  ;;  %v6795_v42 = vcombine.low %v654_v28, %v658_v32 }
 0x10a   :  { %3561 = vmatpush2.bf16.msra.mxu1 %v6595_v8  ;;  %v522_v39 = vld [vmem:[#allocation5 + $0x968] sm:$0xff]  ;;  %v6667_v8 = vcombine.low %v526_v26, %v530_v27 }
 0x10b   :  { %3562 = vmatprep.subr.bf16.mxu1 %v6588_v10  ;;  %v646_v40 = vld [vmem:[#allocation5 + $0xd48] sm:$0xff]  ;;  %v6660_v58 = vcombine.high %v518_v38, %v522_v39 }
 0x10c   :  { %3522 = vmatpush2.bf16.msra.mxu0 %v6459_v48  ;;  %v650_v7 = vld [vmem:[#allocation5 + $0xd68] sm:$0xff] }
 0x10d   :  { %3523 = vmatprep.subr.bf16.mxu0 %v6452_v50  ;;  %v510_v44 = vld [vmem:[#allocation5 + $0x908] sm:$0xff]  ;;  %v6788_v46 = vcombine.high %v646_v40, %v650_v7  ;;  %v6787_v50 = vcombine.low %v646_v40, %v650_v7 }
 0x10e   :  { %3563 = vmatpush2.bf16.msra.mxu1 %v6587_v49  ;;  %v514_v45 = vld [vmem:[#allocation5 + $0x928] sm:$0xff]  ;;  %v6659_v49 = vcombine.low %v518_v38, %v522_v39 }
 0x10f   :  { %3564 = vmatprep.subr.bf16.mxu1 %v6580_v56  ;;  %v638_v10 = vld [vmem:[#allocation5 + $0xd08] sm:$0xff]  ;;  %v6652_v51 = vcombine.high %v510_v44, %v514_v45 }
 0x110   :  { %3524 = vmatpush2.bf16.msra.mxu0 %v6451_v59  ;;  %v642_v48 = vld [vmem:[#allocation5 + $0xd28] sm:$0xff] }
 0x111   :  { %3525 = vmatprep.subr.bf16.mxu0 %v6444_v61  ;;  %v502_v53 = vld [vmem:[#allocation5 + $0x8c8] sm:$0xff]  ;;  %v6780_v57 = vcombine.high %v638_v10, %v642_v48  ;;  %v6779_v61 = vcombine.low %v638_v10, %v642_v48 }
 0x112   :  { %3565 = vmatpush2.bf16.msra.mxu1 %v6579_v60  ;;  %v506_v54 = vld [vmem:[#allocation5 + $0x8e8] sm:$0xff]  ;;  %v6651_v60 = vcombine.low %v510_v44, %v514_v45 }
 0x113   :  { %3566 = vmatprep.subr.bf16.mxu1 %v6572_v1  ;;  %v630_v56 = vld [vmem:[#allocation5 + $0xcc8] sm:$0xff]  ;;  %v6644_v62 = vcombine.high %v502_v53, %v506_v54 }
 0x114   :  { %3526 = vmatpush2.bf16.msra.mxu0 %v6443_v3  ;;  %v634_v59 = vld [vmem:[#allocation5 + $0xce8] sm:$0xff] }
 0x115   :  { %3527 = vmatprep.subr.bf16.mxu0 %v6436_v5  ;;  %v494_v63 = vld [vmem:[#allocation5 + $0x888] sm:$0xff]  ;;  %v6772_v2 = vcombine.high %v630_v56, %v634_v59  ;;  %v6771_v5 = vcombine.low %v630_v56, %v634_v59 }
 0x116   :  { %3567 = vmatpush2.bf16.msra.mxu1 %v6571_v4  ;;  %v498_v0 = vld [vmem:[#allocation5 + $0x8a8] sm:$0xff]  ;;  %v6643_v4 = vcombine.low %v502_v53, %v506_v54 }
 0x117   :  { %3568 = vmatprep.subr.bf16.mxu1 %v6564_v30  ;;  %v622_v1 = vld [vmem:[#allocation5 + $0xc88] sm:$0xff]  ;;  %v6636_v6 = vcombine.high %v494_v63, %v498_v0 }
 0x118   :  { %3528 = vmatpush2.bf16.msra.mxu0 %v6435_v35  ;;  %v626_v3 = vld [vmem:[#allocation5 + $0xca8] sm:$0xff] }
 0x119   :  { %3529 = vmatprep.subr.bf16.mxu0 %v6428_v15  ;;  %v486_v11 = vld [vmem:[#allocation5 + $0x848] sm:$0xff]  ;;  %v6764_v31 = vcombine.high %v622_v1, %v626_v3  ;;  %v6763_v15 = vcombine.low %v622_v1, %v626_v3 }
 0x11a   :  { %3569 = vmatpush2.bf16.msra.mxu1 %v6563_v36  ;;  %v490_v12 = vld [vmem:[#allocation5 + $0x868] sm:$0xff]  ;;  %v6635_v36 = vcombine.low %v494_v63, %v498_v0 }
 0x11b   :  { %3570 = vmatprep.subr.bf16.mxu1 %v6556_v19  ;;  %v614_v30 = vld [vmem:[#allocation5 + $0xc48] sm:$0xff]  ;;  %v6628_v16 = vcombine.high %v486_v11, %v490_v12 }
 0x11c   :  { %3530 = vmatpush2.bf16.msra.mxu0 %v6427_v23  ;;  %v618_v35 = vld [vmem:[#allocation5 + $0xc68] sm:$0xff] }
 0x11d   :  { %3581 = vmatprep.subr.bf16.mxu0 %v6676_v25  ;;  %v478_v17 = vld [vmem:[#allocation5 + $0x808] sm:$0xff]  ;;  %v6756_v20 = vcombine.high %v614_v30, %v618_v35  ;;  %v6755_v25 = vcombine.low %v614_v30, %v618_v35 }
 0x11e   :  { %3571 = vmatpush2.bf16.msra.mxu1 %v6555_v24  ;;  %v482_v18 = vld [vmem:[#allocation5 + $0x828] sm:$0xff]  ;;  %v6627_v24 = vcombine.low %v486_v11, %v490_v12 }
 0x11f   :  { %3622 = vmatprep.subr.bf16.mxu1 %v6804_v29  ;;  %3532 = vmatmul.mubr.bf16.vlgmr.msra.gmra.mxu0 %v7974_v43  ;;  %v606_v19 = vld [vmem:[#allocation5 + $0xc08] sm:$0xff]  ;;  %v6620_v26 = vcombine.high %v478_v17, %v482_v18 }
 0x120   :  { %3582 = vmatpush1.bf16.msra.mxu0 %v6675_v33  ;;  %3613 = vmatprep.mubr.bf16.mxu0 %v7980_v52  ;;  %v610_v23 = vld [vmem:[#allocation5 + $0xc28] sm:$0xff] }
 0x121   :  { %3573 = vmatmul.mubr.bf16.vlgmr.msra.gmra.mxu1 %v7978_v9  ;;  %3583 = vmatprep.subr.bf16.mxu0 %v6668_v37  ;;  %v598_v27 = vld [vmem:[#allocation5 + $0xbc8] sm:$0xff]  ;;  %v6748_v32 = vcombine.high %v606_v19, %v610_v23  ;;  %v6747_v37 = vcombine.low %v606_v19, %v610_v23 }
 0x122   :  { %3623 = vmatpush1.bf16.msra.mxu1 %v6803_v34  ;;  %3654 = vmatprep.mubr.bf16.mxu1 %v7983_v55  ;;  %v602_v28 = vld [vmem:[#allocation5 + $0xbe8] sm:$0xff]  ;;  %v6619_v34 = vcombine.low %v478_v17, %v482_v18 }
 0x123   :  { %3624 = vmatprep.subr.bf16.mxu1 %v6796_v41  ;;  %v726_v29 = vld [vmem:[#allocation5 + $0xfc8] sm:$0xff]  ;;  %v6740_v38 = vcombine.high %v598_v27, %v602_v28 }
 0x124   :  { %3584 = vmatpush1.bf16.msra.mxu0 %v6667_v8  ;;  %v730_v33 = vld [vmem:[#allocation5 + $0xfe8] sm:$0xff] }
 0x125   :  { %3585 = vmatprep.subr.bf16.mxu0 %v6660_v58  ;;  %v590_v39 = vld [vmem:[#allocation5 + $0xb88] sm:$0xff]  ;;  %v6868_v7 = vcombine.high %v726_v29, %v730_v33  ;;  %v6867_v58 = vcombine.low %v726_v29, %v730_v33 }
 0x126   :  { %3625 = vmatpush1.bf16.msra.mxu1 %v6795_v42  ;;  %v594_v40 = vld [vmem:[#allocation5 + $0xba8] sm:$0xff]  ;;  %v6739_v42 = vcombine.low %v598_v27, %v602_v28 }
 0x127   :  { %3626 = vmatprep.subr.bf16.mxu1 %v6788_v46  ;;  %v718_v41 = vld [vmem:[#allocation5 + $0xf88] sm:$0xff]  ;;  %v6732_v44 = vcombine.high %v590_v39, %v594_v40 }
 0x128   :  { %3586 = vmatpush1.bf16.msra.mxu0 %v6659_v49  ;;  %v722_v8 = vld [vmem:[#allocation5 + $0xfa8] sm:$0xff] }
 0x129   :  { %3587 = vmatprep.subr.bf16.mxu0 %v6652_v51  ;;  %v582_v45 = vld [vmem:[#allocation5 + $0xb48] sm:$0xff]  ;;  %v6860_v48 = vcombine.high %v718_v41, %v722_v8  ;;  %v6859_v51 = vcombine.low %v718_v41, %v722_v8  ;;  %v279_v41 = vld [vmem:[#allocation5 + $0x1d0] sm:$0xff] }
 0x12a   :  { %3627 = vmatpush1.bf16.msra.mxu1 %v6787_v50  ;;  %v586_v10 = vld [vmem:[#allocation5 + $0xb68] sm:$0xff]  ;;  %v6731_v50 = vcombine.low %v590_v39, %v594_v40  ;;  %v407_v8 = vld [vmem:[#allocation5 + $0x5d0] sm:$0xff] }
 0x12b   :  { %3628 = vmatprep.subr.bf16.mxu1 %v6780_v57  ;;  %v710_v46 = vld [vmem:[#allocation5 + $0xf48] sm:$0xff]  ;;  %v6724_v53 = vcombine.high %v582_v45, %v586_v10 }
 0x12c   :  { %3588 = vmatpush1.bf16.msra.mxu0 %v6651_v60  ;;  %v714_v49 = vld [vmem:[#allocation5 + $0xf68] sm:$0xff] }
 0x12d   :  { %3589 = vmatprep.subr.bf16.mxu0 %v6644_v62  ;;  %v574_v54 = vld [vmem:[#allocation5 + $0xb08] sm:$0xff]  ;;  %v6852_v59 = vcombine.high %v710_v46, %v714_v49  ;;  %v6851_v62 = vcombine.low %v710_v46, %v714_v49  ;;  %v741_v49 = vsub.s32 1, %v7929_v47 }
 0x12e   :  { %3629 = vmatpush1.bf16.msra.mxu1 %v6779_v61  ;;  %v578_v56 = vld [vmem:[#allocation5 + $0xb28] sm:$0xff]  ;;  %v6723_v61 = vcombine.low %v582_v45, %v586_v10  ;;  %v8005_v10 = vld [vmem:[#allocation7] sm:$0xff] }
 0x12f   :  { %3630 = vmatprep.subr.bf16.mxu1 %v6772_v2  ;;  %v702_v57 = vld [vmem:[#allocation5 + $0xf08] sm:$0xff]  ;;  %v6716_v63 = vcombine.high %v574_v54, %v578_v56 }
 0x130   :  { %3590 = vmatpush1.bf16.msra.mxu0 %v6643_v4  ;;  %v706_v60 = vld [vmem:[#allocation5 + $0xf28] sm:$0xff] }
 0x131   :  { %3591 = vmatprep.subr.bf16.mxu0 %v6636_v6  ;;  %v6844_v0 = vcombine.high %v702_v57, %v706_v60  ;;  %v566_v1 = vld [vmem:[#allocation5 + $0xac8] sm:$0xff]  ;;  %v6843_v6 = vcombine.low %v702_v57, %v706_v60 }
 0x132   :  { %3631 = vmatpush1.bf16.msra.mxu1 %v6771_v5  ;;  %v570_v2 = vld [vmem:[#allocation5 + $0xae8] sm:$0xff]  ;;  %v6715_v5 = vcombine.low %v574_v54, %v578_v56  ;;  %v403_v54 = vld [vmem:[#allocation5 + $0x5b0] sm:$0xff] }
 0x133   :  { %3632 = vmatprep.subr.bf16.mxu1 %v6764_v31  ;;  %v694_v3 = vld [vmem:[#allocation5 + $0xec8] sm:$0xff]  ;;  %v6708_v11 = vcombine.high %v566_v1, %v570_v2 }
 0x134   :  { %3592 = vmatpush1.bf16.msra.mxu0 %v6635_v36  ;;  %v698_v4 = vld [vmem:[#allocation5 + $0xee8] sm:$0xff] }
 0x135   :  { %3593 = vmatprep.subr.bf16.mxu0 %v6628_v16  ;;  %v6836_v12 = vcombine.high %v694_v3, %v698_v4  ;;  %v558_v30 = vld [vmem:[#allocation5 + $0xa88] sm:$0xff]  ;;  %v6835_v16 = vcombine.low %v694_v3, %v698_v4  ;;  %v395_v3 = vld [vmem:[#allocation5 + $0x570] sm:$0xff] }
 0x136   :  { %3633 = vmatpush1.bf16.msra.mxu1 %v6763_v15  ;;  %v562_v31 = vld [vmem:[#allocation5 + $0xaa8] sm:$0xff]  ;;  %v6707_v15 = vcombine.low %v566_v1, %v570_v2  ;;  %v391_v2 = vld [vmem:[#allocation5 + $0x550] sm:$0xff] }
 0x137   :  { %3634 = vmatprep.subr.bf16.mxu1 %v6756_v20  ;;  %v686_v35 = vld [vmem:[#allocation5 + $0xe88] sm:$0xff]  ;;  %v6700_v17 = vcombine.high %v558_v30, %v562_v31 }
 0x138   :  { %3594 = vmatpush1.bf16.msra.mxu0 %v6627_v24  ;;  %v690_v36 = vld [vmem:[#allocation5 + $0xea8] sm:$0xff] }
 0x139   :  { %3595 = vmatprep.subr.bf16.mxu0 %v6620_v26  ;;  %v6828_v18 = vcombine.high %v686_v35, %v690_v36  ;;  %v550_v19 = vld [vmem:[#allocation5 + $0xa48] sm:$0xff]  ;;  %v6827_v26 = vcombine.low %v686_v35, %v690_v36 }
 0x13a   :  { %3635 = vmatpush1.bf16.msra.mxu1 %v6755_v25  ;;  %v554_v20 = vld [vmem:[#allocation5 + $0xa68] sm:$0xff]  ;;  %v6699_v25 = vcombine.low %v558_v30, %v562_v31 }
 0x13b   :  { %3636 = vmatprep.subr.bf16.mxu1 %v6748_v32  ;;  %v678_v23 = vld [vmem:[#allocation5 + $0xe48] sm:$0xff]  ;;  %v6692_v27 = vcombine.high %v550_v19, %v554_v20 }
 0x13c   :  { %3596 = vmatpush1.bf16.msra.mxu0 %v6619_v34  ;;  %v682_v24 = vld [vmem:[#allocation5 + $0xe68] sm:$0xff] }
 0x13d   :  { %3597 = vmatprep.subr.bf16.mxu0 %v6740_v38  ;;  %v6820_v28 = vcombine.high %v678_v23, %v682_v24  ;;  %v542_v29 = vld [vmem:[#allocation5 + $0xa08] sm:$0xff]  ;;  %v6819_v38 = vcombine.low %v678_v23, %v682_v24 }
 0x13e   :  { %3637 = vmatpush1.bf16.msra.mxu1 %v6747_v37  ;;  %v546_v32 = vld [vmem:[#allocation5 + $0xa28] sm:$0xff]  ;;  %v6691_v37 = vcombine.low %v550_v19, %v554_v20  ;;  %v383_v19 = vld [vmem:[#allocation5 + $0x510] sm:$0xff] }
 0x13f   :  { %3638 = vmatprep.subr.bf16.mxu1 %v6868_v7  ;;  %v670_v33 = vld [vmem:[#allocation5 + $0xe08] sm:$0xff]  ;;  %v6684_v39 = vcombine.high %v542_v29, %v546_v32  ;;  %v283_v7 = vld [vmem:[#allocation5 + $0x1f0] sm:$0xff] }
 0x140   :  { %3598 = vmatpush2.bf16.msra.mxu0 %v6739_v42  ;;  %v674_v34 = vld [vmem:[#allocation5 + $0xe28] sm:$0xff]  ;;  %v411_v42 = vld [vmem:[#allocation5 + $0x5f0] sm:$0xff]  ;;  %v6422_v46 = vcombine.high %v279_v41, %v283_v7  ;;  %v6421_v57 = vcombine.low %v279_v41, %v283_v7 }
 0x141   :  { %3599 = vmatprep.subr.bf16.mxu0 %v6732_v44  ;;  %v6812_v40 = vcombine.high %v670_v33, %v674_v34  ;;  %v737_v44 = vsub.s32 0, %v7929_v47  ;;  %v6811_v45 = vcombine.low %v670_v33, %v674_v34  ;;  %v387_v20 = vld [vmem:[#allocation5 + $0x530] sm:$0xff] }
 0x142   :  { %3639 = vmatpush2.bf16.msra.mxu1 %v6867_v58  ;;  %v6683_v58 = vcombine.low %v542_v29, %v546_v32  ;;  %v6526_v32 = vcombine.high %v383_v19, %v387_v20  ;;  %v247_v33 = vld [vmem:[#allocation5 + $0xd0] sm:$0xff] }
 0x143   :  { %3640 = vmatprep.subr.bf16.mxu1 %v6860_v48  ;;  %v6550_v48 = vcombine.high %v407_v8, %v411_v42  ;;  %v738_v56 = vrot.slane %v8005_v10, %v737_v44  ;;  %v251_v34 = vld [vmem:[#allocation5 + $0xf0] sm:$0xff] }
 0x144   :  { %3600 = vmatpush2.bf16.msra.mxu0 %v6731_v50  ;;  %v271_v50 = vld [vmem:[#allocation5 + $0x190] sm:$0xff]  ;;  %v6390_v41 = vcombine.high %v247_v33, %v251_v34 }
 0x145   :  { %3601 = vmatprep.subr.bf16.mxu0 %v6724_v53  ;;  %v399_v53 = vld [vmem:[#allocation5 + $0x590] sm:$0xff] }
 0x146   :  { %3641 = vmatpush2.bf16.msra.mxu1 %v6859_v51  ;;  %v275_v51 = vld [vmem:[#allocation5 + $0x1b0] sm:$0xff] }
 0x147   :  { %3642 = vmatprep.subr.bf16.mxu1 %v6852_v59  ;;  %v6549_v59 = vcombine.low %v407_v8, %v411_v42  ;;  %v6414_v60 = vcombine.high %v271_v50, %v275_v51  ;;  %v239_v8 = vld [vmem:[#allocation5 + $0x90] sm:$0xff] }
 0x148   :  { %3602 = vmatpush2.bf16.msra.mxu0 %v6723_v61  ;;  %v742_v61 = vrot.slane %v8005_v10, %v741_v49  ;;  %v243_v42 = vld [vmem:[#allocation5 + $0xb0] sm:$0xff] }
 0x149   :  { %3603 = vmatprep.subr.bf16.mxu0 %v6716_v63  ;;  %v263_v63 = vld [vmem:[#allocation5 + $0x150] sm:$0xff] }
 0x14a   :  { %3643 = vmatpush2.bf16.msra.mxu1 %v6851_v62  ;;  %v6542_v62 = vcombine.high %v399_v53, %v403_v54 }
 0x14b   :  { %3644 = vmatprep.subr.bf16.mxu1 %v6844_v0  ;;  %v267_v0 = vld [vmem:[#allocation5 + $0x170] sm:$0xff] }
 0x14c   :  { %3604 = vmatpush2.bf16.msra.mxu0 %v6715_v5  ;;  %v6406_v30 = vcombine.high %v263_v63, %v267_v0 }
 0x14d   :  { %3605 = vmatprep.subr.bf16.mxu0 %v6708_v11 }
 0x14e   :  { %3645 = vmatpush2.bf16.msra.mxu1 %v6843_v6  ;;  %v6413_v6 = vcombine.low %v271_v50, %v275_v51  ;;  %v6382_v50 = vcombine.high %v239_v8, %v243_v42 }
 0x14f   :  { %3646 = vmatprep.subr.bf16.mxu1 %v6836_v12  ;;  %v6541_v12 = vcombine.low %v399_v53, %v403_v54  ;;  %v231_v53 = vld [vmem:[#allocation5 + $0x50] sm:$0xff] }
 0x150   :  { %3606 = vmatpush2.bf16.msra.mxu0 %v6707_v15  ;;  %v6534_v15 = vcombine.high %v391_v2, %v395_v3  ;;  %v235_v54 = vld [vmem:[#allocation5 + $0x70] sm:$0xff] }
 0x151   :  { %3607 = vmatprep.subr.bf16.mxu0 %v6700_v17  ;;  %v259_v17 = vld [vmem:[#allocation5 + $0x130] sm:$0xff] }
 0x152   :  { %3647 = vmatpush2.bf16.msra.mxu1 %v6835_v16  ;;  %v255_v16 = vld [vmem:[#allocation5 + $0x110] sm:$0xff] }
 0x153   :  { %3648 = vmatprep.subr.bf16.mxu1 %v6828_v18 }
 0x154   :  { %3608 = vmatpush2.bf16.msra.mxu0 %v6699_v25  ;;  %v6405_v25 = vcombine.low %v263_v63, %v267_v0  ;;  %v223_v63 = vld [vmem:[#allocation5 + $0x10] sm:$0xff] }
 0x155   :  { %3609 = vmatprep.subr.bf16.mxu0 %v6692_v27  ;;  %v6533_v27 = vcombine.low %v391_v2, %v395_v3  ;;  %v227_v0 = vld [vmem:[#allocation5 + $0x30] sm:$0xff]  ;;  %v6373_v3 = vcombine.low %v231_v53, %v235_v54 }
 0x156   :  { %3649 = vmatpush2.bf16.msra.mxu1 %v6827_v26  ;;  %v355_v2 = vld [vmem:[#allocation5 + $0x430] sm:$0xff] }
 0x157   :  { %3650 = vmatprep.subr.bf16.mxu1 %v6820_v28  ;;  %v6398_v28 = vcombine.high %v255_v16, %v259_v17 }
 0x158   :  { %3610 = vmatpush2.bf16.msra.mxu0 %v6691_v37  ;;  %v375_v37 = vld [vmem:[#allocation5 + $0x4d0] sm:$0xff] }
 0x159   :  { %3611 = vmatprep.subr.bf16.mxu0 %v6684_v39  ;;  %v6397_v39 = vcombine.low %v255_v16, %v259_v17 }
 0x15a   :  { %3651 = vmatpush2.bf16.msra.mxu1 %v6819_v38  ;;  %v379_v38 = vld [vmem:[#allocation5 + $0x4f0] sm:$0xff] }
 0x15b   :  { %3652 = vmatprep.subr.bf16.mxu1 %v6812_v40  ;;  %v6525_v40 = vcombine.low %v383_v19, %v387_v20  ;;  %v6518_v7 = vcombine.high %v375_v37, %v379_v38  ;;  %v339_v19 = vld [vmem:[#allocation5 + $0x3b0] sm:$0xff] }
 0x15c   :  { %3612 = vmatpush2.bf16.msra.mxu0 %v6683_v58  ;;  %v367_v58 = vld [vmem:[#allocation5 + $0x490] sm:$0xff] }
 0x15d   :  { %3663 = vmatprep.subr.bf16.mxu0 %v6422_v46  ;;  %v6389_v46 = vcombine.low %v247_v33, %v251_v34  ;;  %v463_v20 = vld [vmem:[#allocation5 + $0x790] sm:$0xff] }
 0x15e   :  { %3653 = vmatpush2.bf16.msra.mxu1 %v6811_v45  ;;  %v371_v45 = vld [vmem:[#allocation5 + $0x4b0] sm:$0xff] }
 0x15f   :  { %3704 = vmatprep.subr.bf16.mxu1 %v6550_v48  ;;  %v3369_v1 = vpop.f32.mrf.mxu0  ;;  %3614 = vmatmul.mubr.bf16.vlgmr.msra.gmra.mxu0 %v7992_v13  ;;  %v6517_v48 = vcombine.low %v375_v37, %v379_v38  ;;  %v6510_v51 = vcombine.high %v367_v58, %v371_v45  ;;  %v455_v33 = vld [vmem:[#allocation5 + $0x750] sm:$0xff] }
 0x160   :  { %v3370_v4 = vadd.f32 %v3369_v1, %v738_v56  ;;  %3664 = vmatpush1.bf16.msra.mxu0 %v6421_v57  ;;  %3695 = vmatprep.mubr.bf16.mxu0 %v7950_v21  ;;  %v359_v56 = vld [vmem:[#allocation5 + $0x450] sm:$0xff] }
 0x161   :  { %v3410_v5 = vpop.f32.mrf.mxu1  ;;  %3655 = vmatmul.mubr.bf16.vlgmr.msra.gmra.mxu1 %v7994_v14  ;;  %v3371_v11 = vpop.f32.mrf.mxu0  ;;  %3665 = vmatprep.subr.bf16.mxu0 %v6414_v60  ;;  %v363_v57 = vld [vmem:[#allocation5 + $0x470] sm:$0xff]  ;;  %v6509_v60 = vcombine.low %v367_v58, %v371_v45 }
 0x162   :  { %3705 = vmatpush1.bf16.msra.mxu1 %v6549_v59  ;;  %v8016_v31 = vadd.f32 %v3410_v5, %v3370_v4  ;;  %v3372_v35 = vadd.f32 %v3371_v11, %v742_v61  ;;  %3736 = vmatprep.mubr.bf16.mxu1 %v7952_v22  ;;  %v6381_v59 = vcombine.low %v239_v8, %v243_v42  ;;  %v351_v1 = vld [vmem:[#allocation5 + $0x410] sm:$0xff] }
 0x163   :  { %v3412_v36 = vpop.f32.mrf.mxu1  ;;  %3706 = vmatprep.subr.bf16.mxu1 %v6542_v62  ;;  %v3373_v18 = vpop.f32.mrf.mxu0  ;;  %v6374_v61 = vcombine.high %v231_v53, %v235_v54  ;;  %v6502_v62 = vcombine.high %v359_v56, %v363_v57  ;;  %v6501_v4 = vcombine.low %v359_v56, %v363_v57  ;;  %v6366_v5 = vcombine.high %v223_v63, %v227_v0  ;;  %v343_v11 = vld [vmem:[#allocation5 + $0x3d0] sm:$0xff] }
 0x164   :  { %v8020_v23 = vadd.f32 %v3412_v36, %v3372_v35  ;;  %3666 = vmatpush1.bf16.msra.mxu0 %v6413_v6  ;;  %v6494_v6 = vcombine.high %v351_v1, %v355_v2  ;;  %v475_v35 = vld [vmem:[#allocation5 + $0x7f0] sm:$0xff]  ;;  %v6365_v36 = vcombine.low %v223_v63, %v227_v0 }
 0x165   :  { %v3414_v24 = vpop.f32.mrf.mxu1  ;;  %v3374_v26 = vpop.f32.mrf.mxu0  ;;  %3667 = vmatprep.subr.bf16.mxu0 %v6406_v30  ;;  %v471_v30 = vld [vmem:[#allocation5 + $0x7d0] sm:$0xff] }
 0x166   :  { %3707 = vmatpush1.bf16.msra.mxu1 %v6541_v12  ;;  %v347_v12 = vld [vmem:[#allocation5 + $0x3f0] sm:$0xff]  ;;  %v6614_v17 = vcombine.high %v471_v30, %v475_v35  ;;  %v6613_v26 = vcombine.low %v471_v30, %v475_v35 }
 0x167   :  { %v3415_v29 = vpop.f32.mrf.mxu1  ;;  %3708 = vmatprep.subr.bf16.mxu1 %v6534_v15  ;;  %v6493_v15 = vcombine.low %v351_v1, %v355_v2  ;;  %v6486_v16 = vcombine.high %v343_v11, %v347_v12  ;;  %v335_v18 = vld [vmem:[#allocation5 + $0x390] sm:$0xff] }
 0x168   :  { %3668 = vmatpush1.bf16.msra.mxu0 %v6405_v25  ;;  %v467_v24 = vld [vmem:[#allocation5 + $0x7b0] sm:$0xff]  ;;  %v6485_v25 = vcombine.low %v343_v11, %v347_v12  ;;  %v6477_v37 = vcombine.low %v335_v18, %v339_v19 }
 0x169   :  { %3669 = vmatprep.subr.bf16.mxu0 %v6398_v28  ;;  %v6606_v28 = vcombine.high %v463_v20, %v467_v24  ;;  %v327_v29 = vld [vmem:[#allocation5 + $0x350] sm:$0xff]  ;;  %v6605_v38 = vcombine.low %v463_v20, %v467_v24 }
 0x16a   :  { %3709 = vmatpush1.bf16.msra.mxu1 %v6533_v27  ;;  %v6478_v27 = vcombine.high %v335_v18, %v339_v19  ;;  %v459_v34 = vld [vmem:[#allocation5 + $0x770] sm:$0xff] }
 0x16b   :  { %3710 = vmatprep.subr.bf16.mxu1 %v6526_v32  ;;  %v331_v32 = vld [vmem:[#allocation5 + $0x370] sm:$0xff]  ;;  %v6597_v45 = vcombine.low %v455_v33, %v459_v34 }
 0x16c   :  { %3670 = vmatpush1.bf16.msra.mxu0 %v6397_v39  ;;  %v6470_v39 = vcombine.high %v327_v29, %v331_v32  ;;  %v447_v8 = vld [vmem:[#allocation5 + $0x710] sm:$0xff]  ;;  %v6469_v58 = vcombine.low %v327_v29, %v331_v32 }
 0x16d   :  { %3671 = vmatprep.subr.bf16.mxu0 %v6390_v41  ;;  %v319_v41 = vld [vmem:[#allocation5 + $0x310] sm:$0xff] }
 0x16e   :  { %3711 = vmatpush1.bf16.msra.mxu1 %v6525_v40  ;;  %v6598_v40 = vcombine.high %v455_v33, %v459_v34  ;;  %v451_v42 = vld [vmem:[#allocation5 + $0x730] sm:$0xff] }
 0x16f   :  { %3712 = vmatprep.subr.bf16.mxu1 %v6518_v7  ;;  %v323_v7 = vld [vmem:[#allocation5 + $0x330] sm:$0xff]  ;;  %v6589_v57 = vcombine.low %v447_v8, %v451_v42 }
 0x170   :  { %3672 = vmatpush1.bf16.msra.mxu0 %v6389_v46  ;;  %v6462_v46 = vcombine.high %v319_v41, %v323_v7  ;;  %v439_v53 = vld [vmem:[#allocation5 + $0x6d0] sm:$0xff]  ;;  %v6461_v56 = vcombine.low %v319_v41, %v323_v7 }
 0x171   :  { %3673 = vmatprep.subr.bf16.mxu0 %v6382_v50  ;;  %v311_v50 = vld [vmem:[#allocation5 + $0x2d0] sm:$0xff] }
 0x172   :  { %3713 = vmatpush1.bf16.msra.mxu1 %v6517_v48  ;;  %v6590_v48 = vcombine.high %v447_v8, %v451_v42  ;;  %v443_v54 = vld [vmem:[#allocation5 + $0x6f0] sm:$0xff] }
 0x173   :  { %3714 = vmatprep.subr.bf16.mxu1 %v6510_v51  ;;  %v315_v51 = vld [vmem:[#allocation5 + $0x2f0] sm:$0xff]  ;;  %v6581_v2 = vcombine.low %v439_v53, %v443_v54 }
 0x174   :  { %3674 = vmatpush1.bf16.msra.mxu0 %v6381_v59  ;;  %v6454_v59 = vcombine.high %v311_v50, %v315_v51  ;;  %v431_v63 = vld [vmem:[#allocation5 + $0x690] sm:$0xff]  ;;  %v6453_v1 = vcombine.low %v311_v50, %v315_v51 }
 0x175   :  { %3675 = vmatprep.subr.bf16.mxu0 %v6374_v61  ;;  %v303_v61 = vld [vmem:[#allocation5 + $0x290] sm:$0xff] }
 0x176   :  { %3715 = vmatpush1.bf16.msra.mxu1 %v6509_v60  ;;  %v6582_v60 = vcombine.high %v439_v53, %v443_v54  ;;  %v435_v0 = vld [vmem:[#allocation5 + $0x6b0] sm:$0xff] }
 0x177   :  { %3716 = vmatprep.subr.bf16.mxu1 %v6502_v62  ;;  %v307_v62 = vld [vmem:[#allocation5 + $0x2b0] sm:$0xff]  ;;  %v6573_v35 = vcombine.low %v431_v63, %v435_v0 }
 0x178   :  { %3676 = vmatpush1.bf16.msra.mxu0 %v6373_v3  ;;  %v6446_v3 = vcombine.high %v303_v61, %v307_v62  ;;  %v423_v11 = vld [vmem:[#allocation5 + $0x650] sm:$0xff]  ;;  %v6445_v30 = vcombine.low %v303_v61, %v307_v62 }
 0x179   :  { %3677 = vmatprep.subr.bf16.mxu0 %v6366_v5  ;;  %v295_v5 = vld [vmem:[#allocation5 + $0x250] sm:$0xff] }
 0x17a   :  { %3717 = vmatpush1.bf16.msra.mxu1 %v6501_v4  ;;  %v6574_v4 = vcombine.high %v431_v63, %v435_v0  ;;  %v427_v12 = vld [vmem:[#allocation5 + $0x670] sm:$0xff] }
 0x17b   :  { %3718 = vmatprep.subr.bf16.mxu1 %v6494_v6  ;;  %v299_v6 = vld [vmem:[#allocation5 + $0x270] sm:$0xff]  ;;  %v6565_v24 = vcombine.low %v423_v11, %v427_v12 }
 0x17c   :  { %3678 = vmatpush1.bf16.msra.mxu0 %v6365_v36  ;;  %v6438_v36 = vcombine.high %v295_v5, %v299_v6  ;;  %v415_v18 = vld [vmem:[#allocation5 + $0x610] sm:$0xff]  ;;  %v6437_v20 = vcombine.low %v295_v5, %v299_v6 }
 0x17d   :  { %3679 = vmatprep.subr.bf16.mxu0 %v6486_v16  ;;  %v287_v16 = vld [vmem:[#allocation5 + $0x210] sm:$0xff] }
 0x17e   :  { %3719 = vmatpush1.bf16.msra.mxu1 %v6493_v15  ;;  %v6566_v15 = vcombine.high %v423_v11, %v427_v12  ;;  %v419_v19 = vld [vmem:[#allocation5 + $0x630] sm:$0xff] }
 0x17f   :  { %3720 = vmatprep.subr.bf16.mxu1 %v6614_v17  ;;  %v291_v17 = vld [vmem:[#allocation5 + $0x230] sm:$0xff]  ;;  %v6557_v34 = vcombine.low %v415_v18, %v419_v19 }
 0x180   :  { %3680 = vmatpush2.bf16.msra.mxu0 %v6485_v25  ;;  %v6430_v25 = vcombine.high %v287_v16, %v291_v17  ;;  %v663_v29 = vld [vmem:[#allocation5 + $0xdd0] sm:$0xff]  ;;  %v6429_v33 = vcombine.low %v287_v16, %v291_v17 }
 0x181   :  { %3681 = vmatprep.subr.bf16.mxu0 %v6478_v27  ;;  %v535_v27 = vld [vmem:[#allocation5 + $0x9d0] sm:$0xff] }
 0x182   :  { %3721 = vmatpush2.bf16.msra.mxu1 %v6613_v26  ;;  %v6558_v26 = vcombine.high %v415_v18, %v419_v19  ;;  %v667_v32 = vld [vmem:[#allocation5 + $0xdf0] sm:$0xff] }
 0x183   :  { %3722 = vmatprep.subr.bf16.mxu1 %v6606_v28  ;;  %v539_v28 = vld [vmem:[#allocation5 + $0x9f0] sm:$0xff]  ;;  %v6805_v42 = vcombine.low %v663_v29, %v667_v32 }
 0x184   :  { %3682 = vmatpush2.bf16.msra.mxu0 %v6477_v37  ;;  %v6678_v37 = vcombine.high %v535_v27, %v539_v28  ;;  %v655_v41 = vld [vmem:[#allocation5 + $0xd90] sm:$0xff]  ;;  %v6677_v8 = vcombine.low %v535_v27, %v539_v28 }
 0x185   :  { %3683 = vmatprep.subr.bf16.mxu0 %v6470_v39  ;;  %v527_v39 = vld [vmem:[#allocation5 + $0x990] sm:$0xff] }
 0x186   :  { %3723 = vmatpush2.bf16.msra.mxu1 %v6605_v38  ;;  %v6806_v38 = vcombine.high %v663_v29, %v667_v32  ;;  %v659_v7 = vld [vmem:[#allocation5 + $0xdb0] sm:$0xff] }
 0x187   :  { %3724 = vmatprep.subr.bf16.mxu1 %v6598_v40  ;;  %v531_v40 = vld [vmem:[#allocation5 + $0x9b0] sm:$0xff] }
 0x188   :  { %3684 = vmatpush2.bf16.msra.mxu0 %v6469_v58  ;;  %v6670_v58 = vcombine.high %v527_v39, %v531_v40  ;;  %v647_v51 = vld [vmem:[#allocation5 + $0xd50] sm:$0xff] }
 0x189   :  { %3685 = vmatprep.subr.bf16.mxu0 %v6462_v46  ;;  %v519_v46 = vld [vmem:[#allocation5 + $0x950] sm:$0xff] }
 0x18a   :  { %3725 = vmatpush2.bf16.msra.mxu1 %v6597_v45  ;;  %v6798_v45 = vcombine.high %v655_v41, %v659_v7  ;;  %v651_v53 = vld [vmem:[#allocation5 + $0xd70] sm:$0xff] }
 0x18b   :  { %3726 = vmatprep.subr.bf16.mxu1 %v6590_v48  ;;  %v523_v48 = vld [vmem:[#allocation5 + $0x970] sm:$0xff] }
 0x18c   :  { %3686 = vmatpush2.bf16.msra.mxu0 %v6461_v56  ;;  %v6662_v61 = vcombine.high %v519_v46, %v523_v48  ;;  %v643_v5 = vld [vmem:[#allocation5 + $0xd30] sm:$0xff]  ;;  %v6661_v12 = vcombine.low %v519_v46, %v523_v48 }
 0x18d   :  { %3687 = vmatprep.subr.bf16.mxu0 %v6454_v59  ;;  %v503_v16 = vld [vmem:[#allocation5 + $0x8d0] sm:$0xff] }
 0x18e   :  { %3727 = vmatpush2.bf16.msra.mxu1 %v6589_v57  ;;  %v6669_v57 = vcombine.low %v527_v39, %v531_v40  ;;  %v507_v17 = vld [vmem:[#allocation5 + $0x8f0] sm:$0xff] }
 0x18f   :  { %3728 = vmatprep.subr.bf16.mxu1 %v6582_v60  ;;  %v6797_v60 = vcombine.low %v655_v41, %v659_v7  ;;  %v631_v18 = vld [vmem:[#allocation5 + $0xcd0] sm:$0xff] }
 0x190   :  { %3688 = vmatpush2.bf16.msra.mxu0 %v6453_v1  ;;  %v6790_v1 = vcombine.high %v647_v51, %v651_v53  ;;  %v635_v19 = vld [vmem:[#allocation5 + $0xcf0] sm:$0xff] }
 0x191   :  { %3689 = vmatprep.subr.bf16.mxu0 %v6446_v3  ;;  %v515_v3 = vld [vmem:[#allocation5 + $0x930] sm:$0xff] }
 0x192   :  { %3729 = vmatpush2.bf16.msra.mxu1 %v6581_v2  ;;  %v511_v2 = vld [vmem:[#allocation5 + $0x910] sm:$0xff] }
 0x193   :  { %3730 = vmatprep.subr.bf16.mxu1 %v6574_v4  ;;  %v639_v4 = vld [vmem:[#allocation5 + $0xd10] sm:$0xff] }
 0x194   :  { %3690 = vmatpush2.bf16.msra.mxu0 %v6445_v30  ;;  %v495_v27 = vld [vmem:[#allocation5 + $0x890] sm:$0xff] }
 0x195   :  { %3691 = vmatprep.subr.bf16.mxu0 %v6438_v36  ;;  %v499_v28 = vld [vmem:[#allocation5 + $0x8b0] sm:$0xff] }
 0x196   :  { %3731 = vmatpush2.bf16.msra.mxu1 %v6573_v35  ;;  %v6654_v35 = vcombine.high %v511_v2, %v515_v3  ;;  %v623_v29 = vld [vmem:[#allocation5 + $0xc90] sm:$0xff] }
 0x197   :  { %3732 = vmatprep.subr.bf16.mxu1 %v6566_v15  ;;  %v6782_v15 = vcombine.high %v639_v4, %v643_v5  ;;  %v627_v32 = vld [vmem:[#allocation5 + $0xcb0] sm:$0xff] }
 0x198   :  { %3692 = vmatpush2.bf16.msra.mxu0 %v6437_v20  ;;  %v6653_v20 = vcombine.low %v511_v2, %v515_v3  ;;  %v487_v39 = vld [vmem:[#allocation5 + $0x850] sm:$0xff] }
 0x199   :  { %3693 = vmatprep.subr.bf16.mxu0 %v6430_v25  ;;  %v6646_v25 = vcombine.high %v503_v16, %v507_v17  ;;  %v491_v40 = vld [vmem:[#allocation5 + $0x870] sm:$0xff] }
 0x19a   :  { %3733 = vmatpush2.bf16.msra.mxu1 %v6565_v24  ;;  %v6781_v24 = vcombine.low %v639_v4, %v643_v5  ;;  %v615_v41 = vld [vmem:[#allocation5 + $0xc50] sm:$0xff] }
 0x19b   :  { %3734 = vmatprep.subr.bf16.mxu1 %v6558_v26  ;;  %v6774_v26 = vcombine.high %v631_v18, %v635_v19  ;;  %v619_v7 = vld [vmem:[#allocation5 + $0xc70] sm:$0xff] }
 0x19c   :  { %3694 = vmatpush2.bf16.msra.mxu0 %v6429_v33  ;;  %v6645_v33 = vcombine.low %v503_v16, %v507_v17  ;;  %v479_v46 = vld [vmem:[#allocation5 + $0x810] sm:$0xff] }
 0x19d   :  { %3745 = vmatprep.subr.bf16.mxu0 %v6678_v37  ;;  %v6638_v37 = vcombine.high %v495_v27, %v499_v28  ;;  %v483_v48 = vld [vmem:[#allocation5 + $0x830] sm:$0xff] }
 0x19e   :  { %3735 = vmatpush2.bf16.msra.mxu1 %v6557_v34  ;;  %v6773_v34 = vcombine.low %v631_v18, %v635_v19  ;;  %v595_v4 = vld [vmem:[#allocation5 + $0xbb0] sm:$0xff] }
 0x19f   :  { %3786 = vmatprep.subr.bf16.mxu1 %v6806_v38  ;;  %v3451_v50 = vpop.f32.mrf.mxu0  ;;  %3696 = vmatmul.mubr.bf16.vlgmr.msra.gmra.mxu0 %v7974_v43  ;;  %v6766_v38 = vcombine.high %v623_v29, %v627_v32  ;;  %v719_v5 = vld [vmem:[#allocation5 + $0xf90] sm:$0xff] }
 0x1a0   :  { %v3452_v54 = vadd.f32 %v3451_v50, %v8016_v31  ;;  %3746 = vmatpush1.bf16.msra.mxu0 %v6677_v8  ;;  %3777 = vmatprep.mubr.bf16.mxu0 %v7980_v52  ;;  %v6637_v8 = vcombine.low %v495_v27, %v499_v28  ;;  %v607_v50 = vld [vmem:[#allocation5 + $0xc10] sm:$0xff] }
 0x1a1   :  { %v3492_v56 = vpop.f32.mrf.mxu1  ;;  %3737 = vmatmul.mubr.bf16.vlgmr.msra.gmra.mxu1 %v7978_v9  ;;  %v3453_v59 = vpop.f32.mrf.mxu0  ;;  %3747 = vmatprep.subr.bf16.mxu0 %v6670_v58  ;;  %v6630_v58 = vcombine.high %v487_v39, %v491_v40  ;;  %v711_v16 = vld [vmem:[#allocation5 + $0xf50] sm:$0xff] }
 0x1a2   :  { %3787 = vmatpush1.bf16.msra.mxu1 %v6805_v42  ;;  %v8025_v62 = vadd.f32 %v3492_v56, %v3452_v54  ;;  %v3454_v63 = vadd.f32 %v3453_v59, %v8020_v23  ;;  %3818 = vmatprep.mubr.bf16.mxu1 %v7983_v55  ;;  %v6789_v23 = vcombine.low %v647_v51, %v651_v53  ;;  %v611_v51 = vld [vmem:[#allocation5 + $0xc30] sm:$0xff] }
 0x1a3   :  { %v3494_v0 = vpop.f32.mrf.mxu1  ;;  %3788 = vmatprep.subr.bf16.mxu1 %v6798_v45  ;;  %v3455_v31 = vpop.f32.mrf.mxu0  ;;  %v6765_v42 = vcombine.low %v623_v29, %v627_v32  ;;  %v6758_v45 = vcombine.high %v615_v41, %v619_v7  ;;  %v6629_v53 = vcombine.low %v487_v39, %v491_v40  ;;  %v6757_v54 = vcombine.low %v615_v41, %v619_v7  ;;  %v599_v59 = vld [vmem:[#allocation5 + $0xbd0] sm:$0xff] }
 0x1a4   :  { %v8030_v6 = vadd.f32 %v3494_v0, %v3454_v63  ;;  %3748 = vmatpush1.bf16.msra.mxu0 %v6669_v57  ;;  %v6622_v56 = vcombine.high %v479_v46, %v483_v48  ;;  %v6750_v57 = vcombine.high %v607_v50, %v611_v51  ;;  %v731_v63 = vld [vmem:[#allocation5 + $0xff0] sm:$0xff]  ;;  %v6621_v0 = vcombine.low %v479_v46, %v483_v48 }
 0x1a5   :  { %v3496_v11 = vpop.f32.mrf.mxu1  ;;  %v3456_v30 = vpop.f32.mrf.mxu0  ;;  %3749 = vmatprep.subr.bf16.mxu0 %v6662_v61  ;;  %v727_v61 = vld [vmem:[#allocation5 + $0xfd0] sm:$0xff] }
 0x1a6   :  { %3789 = vmatpush1.bf16.msra.mxu1 %v6797_v60  ;;  %v603_v60 = vld [vmem:[#allocation5 + $0xbf0] sm:$0xff]  ;;  %v6870_v3 = vcombine.high %v727_v61, %v731_v63  ;;  %v6869_v30 = vcombine.low %v727_v61, %v731_v63 }
 0x1a7   :  { %v3497_v36 = vpop.f32.mrf.mxu1  ;;  %3790 = vmatprep.subr.bf16.mxu1 %v6790_v1  ;;  %v6749_v1 = vcombine.low %v607_v50, %v611_v51  ;;  %v6742_v2 = vcombine.high %v599_v59, %v603_v60  ;;  %v591_v31 = vld [vmem:[#allocation5 + $0xb90] sm:$0xff] }
 0x1a8   :  { %3750 = vmatpush1.bf16.msra.mxu0 %v6661_v12  ;;  %v723_v11 = vld [vmem:[#allocation5 + $0xfb0] sm:$0xff]  ;;  %v6741_v12 = vcombine.low %v599_v59, %v603_v60  ;;  %v6733_v18 = vcombine.low %v591_v31, %v595_v4 }
 0x1a9   :  { %3751 = vmatprep.subr.bf16.mxu0 %v6654_v35  ;;  %v6862_v35 = vcombine.high %v719_v5, %v723_v11  ;;  %v583_v36 = vld [vmem:[#allocation5 + $0xb50] sm:$0xff]  ;;  %v6861_v19 = vcombine.low %v719_v5, %v723_v11 }
 0x1aa   :  { %3791 = vmatpush1.bf16.msra.mxu1 %v6789_v23  ;;  %v6734_v23 = vcombine.high %v591_v31, %v595_v4  ;;  %v715_v17 = vld [vmem:[#allocation5 + $0xf70] sm:$0xff] }
 0x1ab   :  { %3792 = vmatprep.subr.bf16.mxu1 %v6782_v15  ;;  %v587_v15 = vld [vmem:[#allocation5 + $0xb70] sm:$0xff]  ;;  %v6853_v32 = vcombine.low %v711_v16, %v715_v17 }
 0x1ac   :  { %3752 = vmatpush1.bf16.msra.mxu0 %v6653_v20  ;;  %v6726_v20 = vcombine.high %v583_v36, %v587_v15  ;;  %v703_v27 = vld [vmem:[#allocation5 + $0xf10] sm:$0xff]  ;;  %v6725_v29 = vcombine.low %v583_v36, %v587_v15  ;;  %v408_v36 = vld [vmem:[#allocation5 + $0x5d8] sm:$0xff] }
 0x1ad   :  { %3753 = vmatprep.subr.bf16.mxu0 %v6646_v25  ;;  %v575_v25 = vld [vmem:[#allocation5 + $0xb10] sm:$0xff]  ;;  %v412_v15 = vld [vmem:[#allocation5 + $0x5f8] sm:$0xff] }
 0x1ae   :  { %3793 = vmatpush1.bf16.msra.mxu1 %v6781_v24  ;;  %v6854_v24 = vcombine.high %v711_v16, %v715_v17  ;;  %v707_v28 = vld [vmem:[#allocation5 + $0xf30] sm:$0xff]  ;;  %v745_v17 = vsub.s32 2, %v7929_v47 }
 0x1af   :  { %3794 = vmatprep.subr.bf16.mxu1 %v6774_v26  ;;  %v579_v26 = vld [vmem:[#allocation5 + $0xb30] sm:$0xff]  ;;  %v6845_v7 = vcombine.low %v703_v27, %v707_v28 }
 0x1b0   :  { %3754 = vmatpush1.bf16.msra.mxu0 %v6645_v33  ;;  %v6718_v33 = vcombine.high %v575_v25, %v579_v26  ;;  %v695_v39 = vld [vmem:[#allocation5 + $0xed0] sm:$0xff]  ;;  %v6717_v41 = vcombine.low %v575_v25, %v579_v26  ;;  %v272_v25 = vld [vmem:[#allocation5 + $0x198] sm:$0xff] }
 0x1b1   :  { %3755 = vmatprep.subr.bf16.mxu0 %v6638_v37  ;;  %v567_v37 = vld [vmem:[#allocation5 + $0xad0] sm:$0xff]  ;;  %v276_v26 = vld [vmem:[#allocation5 + $0x1b8] sm:$0xff] }
 0x1b2   :  { %3795 = vmatpush1.bf16.msra.mxu1 %v6773_v34  ;;  %v6846_v34 = vcombine.high %v703_v27, %v707_v28  ;;  %v699_v40 = vld [vmem:[#allocation5 + $0xef0] sm:$0xff]  ;;  %v400_v27 = vld [vmem:[#allocation5 + $0x598] sm:$0xff] }
 0x1b3   :  { %3796 = vmatprep.subr.bf16.mxu1 %v6766_v38  ;;  %v571_v38 = vld [vmem:[#allocation5 + $0xaf0] sm:$0xff]  ;;  %v6837_v51 = vcombine.low %v695_v39, %v699_v40  ;;  %v404_v28 = vld [vmem:[#allocation5 + $0x5b8] sm:$0xff] }
 0x1b4   :  { %3756 = vmatpush1.bf16.msra.mxu0 %v6637_v8  ;;  %v6710_v8 = vcombine.high %v567_v37, %v571_v38  ;;  %v687_v46 = vld [vmem:[#allocation5 + $0xe90] sm:$0xff]  ;;  %v6709_v50 = vcombine.low %v567_v37, %v571_v38  ;;  %v6544_v38 = vcombine.high %v400_v27, %v404_v28 }
 0x1b5   :  { %3757 = vmatprep.subr.bf16.mxu0 %v6630_v58  ;;  %v559_v58 = vld [vmem:[#allocation5 + $0xa90] sm:$0xff] }
 0x1b6   :  { %3797 = vmatpush1.bf16.msra.mxu1 %v6765_v42  ;;  %v6838_v42 = vcombine.high %v695_v39, %v699_v40  ;;  %v691_v48 = vld [vmem:[#allocation5 + $0xeb0] sm:$0xff]  ;;  %v264_v39 = vld [vmem:[#allocation5 + $0x158] sm:$0xff] }
 0x1b7   :  { %3798 = vmatprep.subr.bf16.mxu1 %v6758_v45  ;;  %v563_v45 = vld [vmem:[#allocation5 + $0xab0] sm:$0xff]  ;;  %v6829_v63 = vcombine.low %v687_v46, %v691_v48  ;;  %v268_v40 = vld [vmem:[#allocation5 + $0x178] sm:$0xff] }
 0x1b8   :  { %3758 = vmatpush1.bf16.msra.mxu0 %v6629_v53  ;;  %v6702_v53 = vcombine.high %v559_v58, %v563_v45  ;;  %v679_v59 = vld [vmem:[#allocation5 + $0xe50] sm:$0xff]  ;;  %v6701_v61 = vcombine.low %v559_v58, %v563_v45  ;;  %v6415_v45 = vcombine.low %v272_v25, %v276_v26 }
 0x1b9   :  { %3759 = vmatprep.subr.bf16.mxu0 %v6622_v56  ;;  %v551_v56 = vld [vmem:[#allocation5 + $0xa50] sm:$0xff] }
 0x1ba   :  { %3799 = vmatpush1.bf16.msra.mxu1 %v6757_v54  ;;  %v6830_v54 = vcombine.high %v687_v46, %v691_v48  ;;  %v683_v60 = vld [vmem:[#allocation5 + $0xe70] sm:$0xff]  ;;  %v6543_v48 = vcombine.low %v400_v27, %v404_v28  ;;  %v232_v28 = vld [vmem:[#allocation5 + $0x58] sm:$0xff] }
 0x1bb   :  { %3800 = vmatprep.subr.bf16.mxu1 %v6750_v57  ;;  %v555_v57 = vld [vmem:[#allocation5 + $0xa70] sm:$0xff]  ;;  %v6821_v11 = vcombine.low %v679_v59, %v683_v60 }
 0x1bc   :  { %3760 = vmatpush1.bf16.msra.mxu0 %v6621_v0  ;;  %v6694_v0 = vcombine.high %v551_v56, %v555_v57  ;;  %v671_v31 = vld [vmem:[#allocation5 + $0xe10] sm:$0xff]  ;;  %v6693_v5 = vcombine.low %v551_v56, %v555_v57  ;;  %v256_v56 = vld [vmem:[#allocation5 + $0x118] sm:$0xff] }
 0x1bd   :  { %3761 = vmatprep.subr.bf16.mxu0 %v6742_v2  ;;  %v543_v2 = vld [vmem:[#allocation5 + $0xa10] sm:$0xff]  ;;  %v260_v57 = vld [vmem:[#allocation5 + $0x138] sm:$0xff] }
 0x1be   :  { %3801 = vmatpush1.bf16.msra.mxu1 %v6749_v1  ;;  %v6822_v1 = vcombine.high %v679_v59, %v683_v60  ;;  %v675_v4 = vld [vmem:[#allocation5 + $0xe30] sm:$0xff]  ;;  %v384_v60 = vld [vmem:[#allocation5 + $0x518] sm:$0xff] }
 0x1bf   :  { %3802 = vmatprep.subr.bf16.mxu1 %v6870_v3  ;;  %v547_v3 = vld [vmem:[#allocation5 + $0xa30] sm:$0xff] }
 0x1c0   :  { %3762 = vmatpush2.bf16.msra.mxu0 %v6741_v12  ;;  %v6686_v12 = vcombine.high %v543_v2, %v547_v3  ;;  %v6685_v16 = vcombine.low %v543_v2, %v547_v3 }
 0x1c1   :  { %3763 = vmatprep.subr.bf16.mxu0 %v6734_v23  ;;  %v280_v23 = vld [vmem:[#allocation5 + $0x1d8] sm:$0xff] }
 0x1c2   :  { %3803 = vmatpush2.bf16.msra.mxu1 %v6869_v30  ;;  %v6814_v30 = vcombine.high %v671_v31, %v675_v4 }
 0x1c3   :  { %3804 = vmatprep.subr.bf16.mxu1 %v6862_v35  ;;  %v284_v35 = vld [vmem:[#allocation5 + $0x1f8] sm:$0xff] }
 0x1c4   :  { %3764 = vmatpush2.bf16.msra.mxu0 %v6733_v18  ;;  %v6813_v18 = vcombine.low %v671_v31, %v675_v4  ;;  %v6400_v31 = vcombine.high %v256_v56, %v260_v57 }
 0x1c5   :  { %3765 = vmatprep.subr.bf16.mxu0 %v6726_v20  ;;  %v6552_v20 = vcombine.high %v408_v36, %v412_v15 }
 0x1c6   :  { %3805 = vmatpush2.bf16.msra.mxu1 %v6861_v19  ;;  %v6424_v19 = vcombine.high %v280_v23, %v284_v35 }
 0x1c7   :  { %3806 = vmatprep.subr.bf16.mxu1 %v6854_v24  ;;  %v749_v24 = vsub.s32 3, %v7929_v47 }
 0x1c8   :  { %3766 = vmatpush2.bf16.msra.mxu0 %v6725_v29  ;;  %v746_v29 = vrot.slane %v8005_v10, %v745_v17 }
 0x1c9   :  { %3767 = vmatprep.subr.bf16.mxu0 %v6718_v33  ;;  %v6551_v33 = vcombine.low %v408_v36, %v412_v15  ;;  %v750_v37 = vrot.slane %v8005_v10, %v749_v24  ;;  %v240_v15 = vld [vmem:[#allocation5 + $0x98] sm:$0xff] }
 0x1ca   :  { %3807 = vmatpush2.bf16.msra.mxu1 %v6853_v32  ;;  %v6423_v32 = vcombine.low %v280_v23, %v284_v35  ;;  %v6399_v23 = vcombine.low %v256_v56, %v260_v57 }
 0x1cb   :  { %3808 = vmatprep.subr.bf16.mxu1 %v6846_v34  ;;  %v6416_v34 = vcombine.high %v272_v25, %v276_v26 }
 0x1cc   :  { %3768 = vmatpush2.bf16.msra.mxu0 %v6717_v41 }
 0x1cd   :  { %3769 = vmatprep.subr.bf16.mxu0 %v6710_v8  ;;  %v396_v8 = vld [vmem:[#allocation5 + $0x578] sm:$0xff] }
 0x1ce   :  { %3809 = vmatpush2.bf16.msra.mxu1 %v6845_v7  ;;  %v392_v7 = vld [vmem:[#allocation5 + $0x558] sm:$0xff] }
 0x1cf   :  { %3810 = vmatprep.subr.bf16.mxu1 %v6838_v42  ;;  %v6535_v3 = vcombine.low %v392_v7, %v396_v8 }
 0x1d0   :  { %3770 = vmatpush2.bf16.msra.mxu0 %v6709_v50  ;;  %v6408_v50 = vcombine.high %v264_v39, %v268_v40 }
 0x1d1   :  { %3771 = vmatprep.subr.bf16.mxu0 %v6702_v53 }
 0x1d2   :  { %3811 = vmatpush2.bf16.msra.mxu1 %v6837_v51 }
 0x1d3   :  { %3812 = vmatprep.subr.bf16.mxu1 %v6830_v54  ;;  %v6536_v54 = vcombine.high %v392_v7, %v396_v8  ;;  %v352_v7 = vld [vmem:[#allocation5 + $0x418] sm:$0xff] }
 0x1d4   :  { %3772 = vmatpush2.bf16.msra.mxu0 %v6701_v61  ;;  %v388_v61 = vld [vmem:[#allocation5 + $0x538] sm:$0xff] }
 0x1d5   :  { %3773 = vmatprep.subr.bf16.mxu0 %v6694_v0  ;;  %v356_v8 = vld [vmem:[#allocation5 + $0x438] sm:$0xff] }
 0x1d6   :  { %3813 = vmatpush2.bf16.msra.mxu1 %v6829_v63  ;;  %v6495_v56 = vcombine.low %v352_v7, %v356_v8 }
 0x1d7   :  { %3814 = vmatprep.subr.bf16.mxu1 %v6822_v1  ;;  %v6407_v1 = vcombine.low %v264_v39, %v268_v40  ;;  %v224_v40 = vld [vmem:[#allocation5 + $0x18] sm:$0xff] }
 0x1d8   :  { %3774 = vmatpush2.bf16.msra.mxu0 %v6693_v5  ;;  %v6528_v5 = vcombine.high %v384_v60, %v388_v61 }
 0x1d9   :  { %3775 = vmatprep.subr.bf16.mxu0 %v6686_v12  ;;  %v376_v12 = vld [vmem:[#allocation5 + $0x4d8] sm:$0xff] }
 0x1da   :  { %3815 = vmatpush2.bf16.msra.mxu1 %v6821_v11  ;;  %v248_v11 = vld [vmem:[#allocation5 + $0xd8] sm:$0xff] }
 0x1db   :  { %3816 = vmatprep.subr.bf16.mxu1 %v6814_v30  ;;  %v380_v30 = vld [vmem:[#allocation5 + $0x4f8] sm:$0xff] }
 0x1dc   :  { %3776 = vmatpush2.bf16.msra.mxu0 %v6685_v16  ;;  %v6520_v36 = vcombine.high %v376_v12, %v380_v30  ;;  %v244_v16 = vld [vmem:[#allocation5 + $0xb8] sm:$0xff]  ;;  %v6519_v25 = vcombine.low %v376_v12, %v380_v30 }
 0x1dd   :  { %3827 = vmatprep.subr.bf16.mxu0 %v6424_v19  ;;  %v372_v19 = vld [vmem:[#allocation5 + $0x4b8] sm:$0xff]  ;;  %v6384_v26 = vcombine.high %v240_v15, %v244_v16 }
 0x1de   :  { %3817 = vmatpush2.bf16.msra.mxu1 %v6813_v18  ;;  %v368_v18 = vld [vmem:[#allocation5 + $0x498] sm:$0xff] }
 0x1df   :  { %3868 = vmatprep.subr.bf16.mxu1 %v6552_v20  ;;  %v3533_v41 = vpop.f32.mrf.mxu0  ;;  %3778 = vmatmul.mubr.bf16.vlgmr.msra.gmra.mxu0 %v7992_v13  ;;  %v6512_v27 = vcombine.high %v368_v18, %v372_v19  ;;  %v460_v12 = vld [vmem:[#allocation5 + $0x778] sm:$0xff] }
 0x1e0   :  { %v3534_v42 = vadd.f32 %v3533_v41, %v746_v29  ;;  %3828 = vmatpush1.bf16.msra.mxu0 %v6423_v32  ;;  %3859 = vmatprep.mubr.bf16.mxu0 %v7950_v21  ;;  %v252_v21 = vld [vmem:[#allocation5 + $0xf8] sm:$0xff] }
 0x1e1   :  { %v3574_v58 = vpop.f32.mrf.mxu1  ;;  %3819 = vmatmul.mubr.bf16.vlgmr.msra.gmra.mxu1 %v7994_v14  ;;  %v3535_v46 = vpop.f32.mrf.mxu0  ;;  %3829 = vmatprep.subr.bf16.mxu0 %v6416_v34  ;;  %v6392_v35 = vcombine.high %v248_v11, %v252_v21  ;;  %v6391_v20 = vcombine.low %v248_v11, %v252_v21  ;;  %v236_v29 = vld [vmem:[#allocation5 + $0x78] sm:$0xff]  ;;  %v6383_v34 = vcombine.low %v240_v15, %v244_v16 }
 0x1e2   :  { %3869 = vmatpush1.bf16.msra.mxu1 %v6551_v33  ;;  %v8042_v10 = vadd.f32 %v3574_v58, %v3534_v42  ;;  %v3536_v51 = vadd.f32 %v3535_v46, %v750_v37  ;;  %3900 = vmatprep.mubr.bf16.mxu1 %v7952_v22  ;;  %v6527_v22 = vcombine.low %v384_v60, %v388_v61  ;;  %v360_v32 = vld [vmem:[#allocation5 + $0x458] sm:$0xff] }
 0x1e3   :  { %v3576_v53 = vpop.f32.mrf.mxu1  ;;  %3870 = vmatprep.subr.bf16.mxu1 %v6544_v38  ;;  %v3537_v59 = vpop.f32.mrf.mxu0  ;;  %v364_v33 = vld [vmem:[#allocation5 + $0x478] sm:$0xff]  ;;  %v6511_v37 = vcombine.low %v368_v18, %v372_v19  ;;  %v6376_v38 = vcombine.high %v232_v28, %v236_v29  ;;  %v6375_v42 = vcombine.low %v232_v28, %v236_v29  ;;  %v6496_v46 = vcombine.high %v352_v7, %v356_v8 }
 0x1e4   :  { %v8046_v63 = vadd.f32 %v3576_v53, %v3536_v51  ;;  %3830 = vmatpush1.bf16.msra.mxu0 %v6415_v45  ;;  %v6504_v39 = vcombine.high %v360_v32, %v364_v33  ;;  %v228_v41 = vld [vmem:[#allocation5 + $0x38] sm:$0xff]  ;;  %v6503_v58 = vcombine.low %v360_v32, %v364_v33 }
 0x1e5   :  { %v3578_v0 = vpop.f32.mrf.mxu1  ;;  %v3538_v2 = vpop.f32.mrf.mxu0  ;;  %3831 = vmatprep.subr.bf16.mxu0 %v6408_v50  ;;  %v6368_v45 = vcombine.high %v224_v40, %v228_v41  ;;  %v348_v50 = vld [vmem:[#allocation5 + $0x3f8] sm:$0xff] }
 0x1e6   :  { %3871 = vmatpush1.bf16.msra.mxu1 %v6543_v48  ;;  %v344_v48 = vld [vmem:[#allocation5 + $0x3d8] sm:$0xff] }
 0x1e7   :  { %v3579_v4 = vpop.f32.mrf.mxu1  ;;  %3872 = vmatprep.subr.bf16.mxu1 %v6536_v54  ;;  %v472_v51 = vld [vmem:[#allocation5 + $0x7d8] sm:$0xff]  ;;  %v6367_v54 = vcombine.low %v224_v40, %v228_v41  ;;  %v6488_v57 = vcombine.high %v344_v48, %v348_v50  ;;  %v6487_v2 = vcombine.low %v344_v48, %v348_v50 }
 0x1e8   :  { %3832 = vmatpush1.bf16.msra.mxu0 %v6407_v1  ;;  %v476_v53 = vld [vmem:[#allocation5 + $0x7f8] sm:$0xff] }
 0x1e9   :  { %3833 = vmatprep.subr.bf16.mxu0 %v6400_v31  ;;  %v6616_v59 = vcombine.high %v472_v51, %v476_v53  ;;  %v336_v60 = vld [vmem:[#allocation5 + $0x398] sm:$0xff] }
 0x1ea   :  { %3873 = vmatpush1.bf16.msra.mxu1 %v6535_v3  ;;  %v340_v61 = vld [vmem:[#allocation5 + $0x3b8] sm:$0xff]  ;;  %v6615_v3 = vcombine.low %v472_v51, %v476_v53 }
 0x1eb   :  { %3874 = vmatprep.subr.bf16.mxu1 %v6528_v5  ;;  %v464_v0 = vld [vmem:[#allocation5 + $0x798] sm:$0xff]  ;;  %v6480_v31 = vcombine.high %v336_v60, %v340_v61  ;;  %v6479_v30 = vcombine.low %v336_v60, %v340_v61 }
 0x1ec   :  { %3834 = vmatpush1.bf16.msra.mxu0 %v6399_v23  ;;  %v468_v1 = vld [vmem:[#allocation5 + $0x7b8] sm:$0xff] }
 0x1ed   :  { %3835 = vmatprep.subr.bf16.mxu0 %v6392_v35  ;;  %v6608_v4 = vcombine.high %v464_v0, %v468_v1  ;;  %v328_v5 = vld [vmem:[#allocation5 + $0x358] sm:$0xff]  ;;  %v6607_v23 = vcombine.low %v464_v0, %v468_v1 }
 0x1ee   :  { %3875 = vmatpush1.bf16.msra.mxu1 %v6527_v22  ;;  %v332_v11 = vld [vmem:[#allocation5 + $0x378] sm:$0xff] }
 0x1ef   :  { %3876 = vmatprep.subr.bf16.mxu1 %v6520_v36  ;;  %v456_v21 = vld [vmem:[#allocation5 + $0x758] sm:$0xff]  ;;  %v6472_v22 = vcombine.high %v328_v5, %v332_v11  ;;  %v6471_v19 = vcombine.low %v328_v5, %v332_v11 }
 0x1f0   :  { %3836 = vmatpush1.bf16.msra.mxu0 %v6391_v20  ;;  %v6600_v35 = vcombine.high %v456_v21, %v460_v12  ;;  %v320_v36 = vld [vmem:[#allocation5 + $0x318] sm:$0xff]  ;;  %v6599_v20 = vcombine.low %v456_v21, %v460_v12 }
 0x1f1   :  { %3837 = vmatprep.subr.bf16.mxu0 %v6384_v26  ;;  %v324_v15 = vld [vmem:[#allocation5 + $0x338] sm:$0xff] }
 0x1f2   :  { %3877 = vmatpush1.bf16.msra.mxu1 %v6519_v25  ;;  %v448_v16 = vld [vmem:[#allocation5 + $0x718] sm:$0xff]  ;;  %v6464_v25 = vcombine.high %v320_v36, %v324_v15  ;;  %v6463_v33 = vcombine.low %v320_v36, %v324_v15 }
 0x1f3   :  { %3878 = vmatprep.subr.bf16.mxu1 %v6512_v27  ;;  %v452_v18 = vld [vmem:[#allocation5 + $0x738] sm:$0xff] }
 0x1f4   :  { %3838 = vmatpush1.bf16.msra.mxu0 %v6383_v34  ;;  %v6592_v26 = vcombine.high %v448_v16, %v452_v18  ;;  %v312_v27 = vld [vmem:[#allocation5 + $0x2d8] sm:$0xff]  ;;  %v6591_v34 = vcombine.low %v448_v16, %v452_v18 }
 0x1f5   :  { %3839 = vmatprep.subr.bf16.mxu0 %v6376_v38  ;;  %v316_v28 = vld [vmem:[#allocation5 + $0x2f8] sm:$0xff] }
 0x1f6   :  { %3879 = vmatpush1.bf16.msra.mxu1 %v6511_v37  ;;  %v440_v29 = vld [vmem:[#allocation5 + $0x6d8] sm:$0xff]  ;;  %v6456_v37 = vcombine.high %v312_v27, %v316_v28  ;;  %v6455_v8 = vcombine.low %v312_v27, %v316_v28 }
 0x1f7   :  { %3880 = vmatprep.subr.bf16.mxu1 %v6504_v39  ;;  %v444_v32 = vld [vmem:[#allocation5 + $0x6f8] sm:$0xff] }
 0x1f8   :  { %3840 = vmatpush1.bf16.msra.mxu0 %v6375_v42  ;;  %v6584_v38 = vcombine.high %v440_v29, %v444_v32  ;;  %v304_v39 = vld [vmem:[#allocation5 + $0x298] sm:$0xff]  ;;  %v6583_v42 = vcombine.low %v440_v29, %v444_v32 }
 0x1f9   :  { %3841 = vmatprep.subr.bf16.mxu0 %v6368_v45  ;;  %v308_v40 = vld [vmem:[#allocation5 + $0x2b8] sm:$0xff] }
 0x1fa   :  { %3881 = vmatpush1.bf16.msra.mxu1 %v6503_v58  ;;  %v432_v41 = vld [vmem:[#allocation5 + $0x698] sm:$0xff]  ;;  %v6448_v58 = vcombine.high %v304_v39, %v308_v40  ;;  %v6447_v53 = vcombine.low %v304_v39, %v308_v40 }
 0x1fb   :  { %3882 = vmatprep.subr.bf16.mxu1 %v6496_v46  ;;  %v436_v7 = vld [vmem:[#allocation5 + $0x6b8] sm:$0xff] }
 0x1fc   :  { %3842 = vmatpush1.bf16.msra.mxu0 %v6367_v54  ;;  %v6576_v45 = vcombine.high %v432_v41, %v436_v7  ;;  %v296_v46 = vld [vmem:[#allocation5 + $0x258] sm:$0xff]  ;;  %v6575_v54 = vcombine.low %v432_v41, %v436_v7 }
 0x1fd   :  { %3843 = vmatprep.subr.bf16.mxu0 %v6488_v57  ;;  %v300_v48 = vld [vmem:[#allocation5 + $0x278] sm:$0xff] }
 0x1fe   :  { %3883 = vmatpush1.bf16.msra.mxu1 %v6495_v56  ;;  %v424_v50 = vld [vmem:[#allocation5 + $0x658] sm:$0xff]  ;;  %v6440_v56 = vcombine.high %v296_v46, %v300_v48  ;;  %v6439_v1 = vcombine.low %v296_v46, %v300_v48 }
 0x1ff   :  { %3884 = vmatprep.subr.bf16.mxu1 %v6616_v59  ;;  %v428_v51 = vld [vmem:[#allocation5 + $0x678] sm:$0xff] }
 0x200   :  { %3844 = vmatpush2.bf16.msra.mxu0 %v6487_v2  ;;  %v6568_v57 = vcombine.high %v424_v50, %v428_v51  ;;  %v288_v59 = vld [vmem:[#allocation5 + $0x218] sm:$0xff]  ;;  %v6567_v2 = vcombine.low %v424_v50, %v428_v51 }
 0x201   :  { %3845 = vmatprep.subr.bf16.mxu0 %v6480_v31  ;;  %v292_v60 = vld [vmem:[#allocation5 + $0x238] sm:$0xff] }
 0x202   :  { %3885 = vmatpush2.bf16.msra.mxu1 %v6615_v3  ;;  %v416_v61 = vld [vmem:[#allocation5 + $0x618] sm:$0xff]  ;;  %v6432_v3 = vcombine.high %v288_v59, %v292_v60  ;;  %v6431_v12 = vcombine.low %v288_v59, %v292_v60 }
 0x203   :  { %3886 = vmatprep.subr.bf16.mxu1 %v6608_v4  ;;  %v420_v0 = vld [vmem:[#allocation5 + $0x638] sm:$0xff] }
 0x204   :  { %3846 = vmatpush2.bf16.msra.mxu0 %v6479_v30  ;;  %v6560_v31 = vcombine.high %v416_v61, %v420_v0  ;;  %v536_v4 = vld [vmem:[#allocation5 + $0x9d8] sm:$0xff]  ;;  %v6559_v30 = vcombine.low %v416_v61, %v420_v0 }
 0x205   :  { %3847 = vmatprep.subr.bf16.mxu0 %v6472_v22  ;;  %v540_v5 = vld [vmem:[#allocation5 + $0x9f8] sm:$0xff] }
 0x206   :  { %3887 = vmatpush2.bf16.msra.mxu1 %v6607_v23  ;;  %v664_v11 = vld [vmem:[#allocation5 + $0xdd8] sm:$0xff]  ;;  %v6680_v23 = vcombine.high %v536_v4, %v540_v5  ;;  %v6679_v18 = vcombine.low %v536_v4, %v540_v5 }
 0x207   :  { %3888 = vmatprep.subr.bf16.mxu1 %v6600_v35  ;;  %v668_v21 = vld [vmem:[#allocation5 + $0xdf8] sm:$0xff] }
 0x208   :  { %3848 = vmatpush2.bf16.msra.mxu0 %v6471_v19  ;;  %v6808_v22 = vcombine.high %v664_v11, %v668_v21  ;;  %v528_v35 = vld [vmem:[#allocation5 + $0x998] sm:$0xff]  ;;  %v6807_v19 = vcombine.low %v664_v11, %v668_v21 }
 0x209   :  { %3849 = vmatprep.subr.bf16.mxu0 %v6464_v25  ;;  %v532_v36 = vld [vmem:[#allocation5 + $0x9b8] sm:$0xff] }
 0x20a   :  { %3889 = vmatpush2.bf16.msra.mxu1 %v6599_v20  ;;  %v656_v15 = vld [vmem:[#allocation5 + $0xd98] sm:$0xff]  ;;  %v6672_v20 = vcombine.high %v528_v35, %v532_v36 }
 0x20b   :  { %3890 = vmatprep.subr.bf16.mxu1 %v6592_v26  ;;  %v660_v16 = vld [vmem:[#allocation5 + $0xdb8] sm:$0xff] }
 0x20c   :  { %3850 = vmatpush2.bf16.msra.mxu0 %v6463_v33  ;;  %v6800_v25 = vcombine.high %v656_v15, %v660_v16  ;;  %v520_v26 = vld [vmem:[#allocation5 + $0x958] sm:$0xff]  ;;  %v6799_v39 = vcombine.low %v656_v15, %v660_v16 }
 0x20d   :  { %3851 = vmatprep.subr.bf16.mxu0 %v6456_v37  ;;  %v524_v27 = vld [vmem:[#allocation5 + $0x978] sm:$0xff]  ;;  %v6671_v37 = vcombine.low %v528_v35, %v532_v36 }
 0x20e   :  { %3891 = vmatpush2.bf16.msra.mxu1 %v6591_v34  ;;  %v648_v29 = vld [vmem:[#allocation5 + $0xd58] sm:$0xff]  ;;  %v6664_v40 = vcombine.high %v520_v26, %v524_v27  ;;  %v6663_v46 = vcombine.low %v520_v26, %v524_v27 }
 0x20f   :  { %3892 = vmatprep.subr.bf16.mxu1 %v6584_v38  ;;  %v652_v32 = vld [vmem:[#allocation5 + $0xd78] sm:$0xff] }
 0x210   :  { %3852 = vmatpush2.bf16.msra.mxu0 %v6455_v8  ;;  %v6792_v8 = vcombine.high %v648_v29, %v652_v32  ;;  %v6791_v50 = vcombine.low %v648_v29, %v652_v32  ;;  %v632_v59 = vld [vmem:[#allocation5 + $0xcd8] sm:$0xff] }
 0x211   :  { %3853 = vmatprep.subr.bf16.mxu0 %v6448_v58  ;;  %v640_v58 = vld [vmem:[#allocation5 + $0xd18] sm:$0xff] }
 0x212   :  { %3893 = vmatpush2.bf16.msra.mxu1 %v6583_v42  ;;  %v516_v42 = vld [vmem:[#allocation5 + $0x938] sm:$0xff] }
 0x213   :  { %3894 = vmatprep.subr.bf16.mxu1 %v6576_v45  ;;  %v644_v45 = vld [vmem:[#allocation5 + $0xd38] sm:$0xff] }
 0x214   :  { %3854 = vmatpush2.bf16.msra.mxu0 %v6447_v53  ;;  %v620_v35 = vld [vmem:[#allocation5 + $0xc78] sm:$0xff] }
 0x215   :  { %3855 = vmatprep.subr.bf16.mxu0 %v6440_v56  ;;  %v504_v56 = vld [vmem:[#allocation5 + $0x8d8] sm:$0xff] }
 0x216   :  { %3895 = vmatpush2.bf16.msra.mxu1 %v6575_v54  ;;  %v6784_v54 = vcombine.high %v640_v58, %v644_v45  ;;  %v608_v26 = vld [vmem:[#allocation5 + $0xc18] sm:$0xff] }
 0x217   :  { %3896 = vmatprep.subr.bf16.mxu1 %v6568_v57  ;;  %v508_v57 = vld [vmem:[#allocation5 + $0x8f8] sm:$0xff] }
 0x218   :  { %3856 = vmatpush2.bf16.msra.mxu0 %v6439_v1  ;;  %v6648_v61 = vcombine.high %v504_v56, %v508_v57  ;;  %v496_v1 = vld [vmem:[#allocation5 + $0x898] sm:$0xff]  ;;  %v6647_v5 = vcombine.low %v504_v56, %v508_v57 }
 0x219   :  { %3857 = vmatprep.subr.bf16.mxu0 %v6432_v3  ;;  %v624_v3 = vld [vmem:[#allocation5 + $0xc98] sm:$0xff] }
 0x21a   :  { %3897 = vmatpush2.bf16.msra.mxu1 %v6567_v2  ;;  %v500_v2 = vld [vmem:[#allocation5 + $0x8b8] sm:$0xff] }
 0x21b   :  { %3898 = vmatprep.subr.bf16.mxu1 %v6560_v31  ;;  %v628_v31 = vld [vmem:[#allocation5 + $0xcb8] sm:$0xff]  ;;  %v6640_v21 = vcombine.high %v496_v1, %v500_v2  ;;  %v6639_v15 = vcombine.low %v496_v1, %v500_v2 }
 0x21c   :  { %3858 = vmatpush2.bf16.msra.mxu0 %v6431_v12  ;;  %v6768_v12 = vcombine.high %v624_v3, %v628_v31  ;;  %v6767_v16 = vcombine.low %v624_v3, %v628_v31  ;;  %v612_v27 = vld [vmem:[#allocation5 + $0xc38] sm:$0xff] }
 0x21d   :  { %3909 = vmatprep.subr.bf16.mxu0 %v6680_v23  ;;  %v492_v23 = vld [vmem:[#allocation5 + $0x878] sm:$0xff] }
 0x21e   :  { %3899 = vmatpush2.bf16.msra.mxu1 %v6559_v30  ;;  %v488_v30 = vld [vmem:[#allocation5 + $0x858] sm:$0xff] }
 0x21f   :  { %3950 = vmatprep.subr.bf16.mxu1 %v6808_v22  ;;  %v3615_v28 = vpop.f32.mrf.mxu0  ;;  %3860 = vmatmul.mubr.bf16.vlgmr.msra.gmra.mxu0 %v7974_v43  ;;  %v512_v43 = vld [vmem:[#allocation5 + $0x918] sm:$0xff]  ;;  %v6631_v29 = vcombine.low %v488_v30, %v492_v23 }
 0x220   :  { %v3616_v33 = vadd.f32 %v3615_v28, %v8042_v10  ;;  %3910 = vmatpush1.bf16.msra.mxu0 %v6679_v18  ;;  %3941 = vmatprep.mubr.bf16.mxu0 %v7980_v52  ;;  %v6656_v51 = vcombine.high %v512_v43, %v516_v42  ;;  %v636_v52 = vld [vmem:[#allocation5 + $0xcf8] sm:$0xff]  ;;  %v6655_v60 = vcombine.low %v512_v43, %v516_v42 }
 0x221   :  { %v3656_v34 = vpop.f32.mrf.mxu1  ;;  %3901 = vmatmul.mubr.bf16.vlgmr.msra.gmra.mxu1 %v7978_v9  ;;  %v3617_v38 = vpop.f32.mrf.mxu0  ;;  %3911 = vmatprep.subr.bf16.mxu0 %v6672_v20  ;;  %v6776_v0 = vcombine.high %v632_v59, %v636_v52  ;;  %v6775_v11 = vcombine.low %v632_v59, %v636_v52  ;;  %v616_v22 = vld [vmem:[#allocation5 + $0xc58] sm:$0xff]  ;;  %v6751_v42 = vcombine.low %v608_v26, %v612_v27 }
 0x222   :  { %3951 = vmatpush1.bf16.msra.mxu1 %v6807_v19  ;;  %v8051_v41 = vadd.f32 %v3656_v34, %v3616_v33  ;;  %3982 = vmatprep.mubr.bf16.mxu1 %v7983_v55  ;;  %v6783_v55 = vcombine.low %v640_v58, %v644_v45  ;;  %v3618_v4 = vadd.f32 %v3617_v38, %v8046_v63  ;;  %v480_v19 = vld [vmem:[#allocation5 + $0x818] sm:$0xff] }
 0x223   :  { %v3658_v7 = vpop.f32.mrf.mxu1  ;;  %3952 = vmatprep.subr.bf16.mxu1 %v6800_v25  ;;  %v3619_v10 = vpop.f32.mrf.mxu0  ;;  %v6632_v63 = vcombine.high %v488_v30, %v492_v23  ;;  %v6760_v18 = vcombine.high %v616_v22, %v620_v35  ;;  %v484_v20 = vld [vmem:[#allocation5 + $0x838] sm:$0xff]  ;;  %v3992_v25 = vmul.f32 %v8030_v6, %v8030_v6  ;;  %v6759_v32 = vcombine.low %v616_v22, %v620_v35 }
 0x224   :  { %3912 = vmatpush1.bf16.msra.mxu0 %v6671_v37  ;;  %v8056_v36 = vadd.f32 %v3658_v7, %v3618_v4  ;;  %v6624_v33 = vcombine.high %v480_v19, %v484_v20  ;;  %v6752_v34 = vcombine.high %v608_v26, %v612_v27  ;;  %v600_v37 = vld [vmem:[#allocation5 + $0xbd8] sm:$0xff]  ;;  %v6623_v43 = vcombine.low %v480_v19, %v484_v20 }
 0x225   :  { %v3660_v9 = vpop.f32.mrf.mxu1  ;;  %v3620_v48 = vpop.f32.mrf.mxu0  ;;  %3913 = vmatprep.subr.bf16.mxu0 %v6664_v40  ;;  %v604_v38 = vld [vmem:[#allocation5 + $0xbf8] sm:$0xff] }
 0x226   :  { %3953 = vmatpush1.bf16.msra.mxu1 %v6799_v39  ;;  %v3994_v28 = vmul.f32 %v8056_v36, %v8056_v36  ;;  %v4000_v39 = vmul.f32 %v3992_v25, %v8030_v6  ;;  %v728_v40 = vld [vmem:[#allocation5 + $0xfd8] sm:$0xff]  ;;  %v6744_v10 = vcombine.high %v600_v37, %v604_v38 }
 0x227   :  { %v3661_v53 = vpop.f32.mrf.mxu1  ;;  %3954 = vmatprep.subr.bf16.mxu1 %v6792_v8  ;;  %v732_v7 = vld [vmem:[#allocation5 + $0xff8] sm:$0xff] }
 0x228   :  { %3914 = vmatpush1.bf16.msra.mxu0 %v6663_v46  ;;  %v4002_v8 = vmul.f32 %v3994_v28, %v8056_v36  ;;  %v6872_v58 = vcombine.high %v728_v40, %v732_v7  ;;  %v592_v45 = vld [vmem:[#allocation5 + $0xb98] sm:$0xff]  ;;  %v4008_v46 = vmul.f32 0.044715, %v4000_v39  ;;  %v6743_v53 = vcombine.low %v600_v37, %v604_v38 }
 0x229   :  { %3915 = vmatprep.subr.bf16.mxu0 %v6656_v51  ;;  %v596_v9 = vld [vmem:[#allocation5 + $0xbb8] sm:$0xff] }
 0x22a   :  { %3955 = vmatpush1.bf16.msra.mxu1 %v6791_v50  ;;  %v720_v48 = vld [vmem:[#allocation5 + $0xf98] sm:$0xff]  ;;  %v4010_v51 = vmul.f32 0.044715, %v4002_v8  ;;  %v6736_v56 = vcombine.high %v592_v45, %v596_v9  ;;  %v6735_v1 = vcombine.low %v592_v45, %v596_v9 }
 0x22b   :  { %3956 = vmatprep.subr.bf16.mxu1 %v6784_v54  ;;  %v724_v50 = vld [vmem:[#allocation5 + $0xfb8] sm:$0xff]  ;;  %v6871_v54 = vcombine.low %v728_v40, %v732_v7 }
 0x22c   :  { %3916 = vmatpush1.bf16.msra.mxu0 %v6655_v60  ;;  %v6864_v57 = vcombine.high %v720_v48, %v724_v50  ;;  %v584_v59 = vld [vmem:[#allocation5 + $0xb58] sm:$0xff]  ;;  %v4016_v60 = vadd.f32 %v4008_v46, %v8030_v6  ;;  %v6863_v2 = vcombine.low %v720_v48, %v724_v50 }
 0x22d   :  { %3917 = vmatprep.subr.bf16.mxu0 %v6648_v61  ;;  %v588_v52 = vld [vmem:[#allocation5 + $0xb78] sm:$0xff] }
 0x22e   :  { %3957 = vmatpush1.bf16.msra.mxu1 %v6783_v55  ;;  %v712_v55 = vld [vmem:[#allocation5 + $0xf58] sm:$0xff]  ;;  %v6728_v3 = vcombine.high %v584_v59, %v588_v52  ;;  %v6727_v23 = vcombine.low %v584_v59, %v588_v52 }
 0x22f   :  { %3958 = vmatprep.subr.bf16.mxu1 %v6776_v0  ;;  %v716_v61 = vld [vmem:[#allocation5 + $0xf78] sm:$0xff]  ;;  %v4018_v0 = vadd.f32 %v4010_v51, %v8056_v36 }
 0x230   :  { %3918 = vmatpush1.bf16.msra.mxu0 %v6647_v5  ;;  %v6856_v31 = vcombine.high %v712_v55, %v716_v61  ;;  %v576_v4 = vld [vmem:[#allocation5 + $0xb18] sm:$0xff]  ;;  %v6855_v22 = vcombine.low %v712_v55, %v716_v61  ;;  %v753_v55 = vsub.s32 4, %v7929_v47 }
 0x231   :  { %3919 = vmatprep.subr.bf16.mxu0 %v6640_v21  ;;  %v580_v5 = vld [vmem:[#allocation5 + $0xb38] sm:$0xff]  ;;  %v4026_v30 = vmul.f32 0.7978846, %v4018_v0 }
 0x232   :  { %3959 = vmatpush1.bf16.msra.mxu1 %v6775_v11  ;;  %v4024_v11 = vmul.f32 0.7978846, %v4016_v60  ;;  %v704_v21 = vld [vmem:[#allocation5 + $0xf18] sm:$0xff]  ;;  %v6720_v35 = vcombine.high %v576_v4, %v580_v5  ;;  %v6719_v20 = vcombine.low %v576_v4, %v580_v5  ;;  %v8069_v5 = vld [vmem:[#allocation7] sm:$0xff] }
 0x233   :  { %3960 = vmatprep.subr.bf16.mxu1 %v6768_v12  ;;  %v708_v12 = vld [vmem:[#allocation5 + $0xf38] sm:$0xff] }
 0x234   :  { %3920 = vmatpush1.bf16.msra.mxu0 %v6639_v15  ;;  %v6848_v15 = vcombine.high %v704_v21, %v708_v12  ;;  %7650 = vtanh.f32 %v4024_v11  ;;  %v700_v19 = vld [vmem:[#allocation5 + $0xef8] sm:$0xff]  ;;  %v6847_v25 = vcombine.low %v704_v21, %v708_v12  ;;  %v754_v11 = vrot.slane %v8069_v5, %v753_v55 }
 0x235   :  { %3921 = vmatprep.subr.bf16.mxu0 %v6632_v63  ;;  %v572_v63 = vld [vmem:[#allocation5 + $0xaf8] sm:$0xff]  ;;  %7652 = vtanh.f32 %v4026_v30 }
 0x236   :  { %3961 = vmatpush1.bf16.msra.mxu1 %v6767_v16  ;;  %v568_v16 = vld [vmem:[#allocation5 + $0xad8] sm:$0xff] }
 0x237   :  { %3962 = vmatprep.subr.bf16.mxu1 %v6760_v18  ;;  %v696_v18 = vld [vmem:[#allocation5 + $0xed8] sm:$0xff]  ;;  %v6712_v26 = vcombine.high %v568_v16, %v572_v63 }
 0x238   :  { %3922 = vmatpush1.bf16.msra.mxu0 %v6631_v29  ;;  %v6840_v27 = vcombine.high %v696_v18, %v700_v19  ;;  %v560_v28 = vld [vmem:[#allocation5 + $0xa98] sm:$0xff]  ;;  %v6839_v37 = vcombine.low %v696_v18, %v700_v19 }
 0x239   :  { %3923 = vmatprep.subr.bf16.mxu0 %v6624_v33  ;;  %v564_v29 = vld [vmem:[#allocation5 + $0xab8] sm:$0xff] }
 0x23a   :  { %3963 = vmatpush1.bf16.msra.mxu1 %v6759_v32  ;;  %v688_v32 = vld [vmem:[#allocation5 + $0xe98] sm:$0xff]  ;;  %v6704_v38 = vcombine.high %v560_v28, %v564_v29 }
 0x23b   :  { %3964 = vmatprep.subr.bf16.mxu1 %v6752_v34  ;;  %v692_v33 = vld [vmem:[#allocation5 + $0xeb8] sm:$0xff]  ;;  %v6711_v34 = vcombine.low %v568_v16, %v572_v63 }
 0x23c   :  { %3924 = vmatpush1.bf16.msra.mxu0 %v6623_v43  ;;  %v6832_v39 = vcombine.high %v688_v32, %v692_v33  ;;  %v552_v40 = vld [vmem:[#allocation5 + $0xa58] sm:$0xff] }
 0x23d   :  { %3925 = vmatprep.subr.bf16.mxu0 %v6744_v10  ;;  %v556_v7 = vld [vmem:[#allocation5 + $0xa78] sm:$0xff]  ;;  %v6831_v10 = vcombine.low %v688_v32, %v692_v33 }
 0x23e   :  { %3965 = vmatpush1.bf16.msra.mxu1 %v6751_v42  ;;  %v680_v8 = vld [vmem:[#allocation5 + $0xe58] sm:$0xff]  ;;  %v6703_v42 = vcombine.low %v560_v28, %v564_v29 }
 0x23f   :  { %3966 = vmatprep.subr.bf16.mxu1 %v6872_v58  ;;  %v684_v43 = vld [vmem:[#allocation5 + $0xe78] sm:$0xff]  ;;  %v6696_v58 = vcombine.high %v552_v40, %v556_v7 }
 0x240   :  { %3926 = vmatpush2.bf16.msra.mxu0 %v6743_v53  ;;  %v6824_v45 = vcombine.high %v680_v8, %v684_v43  ;;  %v544_v9 = vld [vmem:[#allocation5 + $0xa18] sm:$0xff]  ;;  %v6695_v53 = vcombine.low %v552_v40, %v556_v7 }
 0x241   :  { %3927 = vmatprep.subr.bf16.mxu0 %v6736_v56  ;;  %v548_v46 = vld [vmem:[#allocation5 + $0xa38] sm:$0xff]  ;;  %v7651_v51 = vpop.eup %7650  ;;  %v6823_v56 = vcombine.low %v680_v8, %v684_v43 }
 0x242   :  { %3967 = vmatpush2.bf16.msra.mxu1 %v6871_v54  ;;  %v672_v48 = vld [vmem:[#allocation5 + $0xe18] sm:$0xff]  ;;  %v7653_v54 = vpop.eup %7652  ;;  %v4048_v52 = vadd.f32 1.0, %v7651_v51  ;;  %v6687_v60 = vcombine.low %v544_v9, %v548_v46 }
 0x243   :  { %3968 = vmatprep.subr.bf16.mxu1 %v6864_v57  ;;  %v676_v50 = vld [vmem:[#allocation5 + $0xe38] sm:$0xff]  ;;  %v6688_v57 = vcombine.high %v544_v9, %v548_v46  ;;  %v4050_v61 = vadd.f32 1.0, %v7653_v54 }
 0x244   :  { %3928 = vmatpush2.bf16.msra.mxu0 %v6735_v1  ;;  %v6816_v59 = vcombine.high %v672_v48, %v676_v50  ;;  %v6815_v0 = vcombine.low %v672_v48, %v676_v50  ;;  %v7236_v1 = vld [vmem:[#allocation8 + $0xe4] ss:$16 sps:$4 sm:$0xff]   ;;  %v7234_v21 = vld [vmem:[#allocation8 + $0xe0] ss:$16 sps:$4 sm:$0xff]   ;;  %v3993_v48 = vmul.f32 %v8051_v41, %v8051_v41 }
 0x245   :  { %3929 = vmatprep.subr.bf16.mxu0 %v6728_v3  ;;  %v7239_v3 = vld [vmem:[#allocation8 + $0x2e4] ss:$16 sps:$4 sm:$0xff]   ;;  %v7237_v30 = vld [vmem:[#allocation8 + $0x2e0] ss:$16 sps:$4 sm:$0xff]  }
 0x246   :  { %3969 = vmatpush2.bf16.msra.mxu1 %v6863_v2  ;;  %v4032_v2 = vmul.f32 0.5, %v8030_v6  ;;  %v7240_v63 = vld [vmem:[#allocation8 + $0xc0] ss:$16 sps:$4 sm:$0xff]   ;;  %v7254_v33 = vld [vmem:[#allocation8 + $0x84] ss:$16 sps:$4 sm:$0xff]  }
 0x247   :  { %3970 = vmatprep.subr.bf16.mxu1 %v6856_v31  ;;  %v4034_v31 = vmul.f32 0.5, %v8056_v36  ;;  %v7243_v19 = vld [vmem:[#allocation8 + $0x2c0] ss:$16 sps:$4 sm:$0xff]   ;;  %v7260_v40 = vld [vmem:[#allocation8 + $0x64] ss:$16 sps:$4 sm:$0xff]  }
 0x248   :  { %3930 = vmatpush2.bf16.msra.mxu0 %v6727_v23  ;;  %v4056_v4 = vmul.f32 %v4048_v52, %v4032_v2  ;;  %v7242_v23 = vld [vmem:[#allocation8 + $0xc4] ss:$16 sps:$4 sm:$0xff]   ;;  %v7246_v28 = vld [vmem:[#allocation8 + $0xa0] ss:$16 sps:$4 sm:$0xff]  }
 0x249   :  { %3931 = vmatprep.subr.bf16.mxu0 %v6720_v35  ;;  %v4058_v12 = vmul.f32 %v4050_v61, %v4034_v31  ;;  %v7245_v35 = vld [vmem:[#allocation8 + $0x2c4] ss:$16 sps:$4 sm:$0xff]   ;;  %v7249_v32 = vld [vmem:[#allocation8 + $0x2a0] ss:$16 sps:$4 sm:$0xff]  }
 0x24a   :  { %3971 = vmatpush2.bf16.msra.mxu1 %v6855_v22  ;;  %v8073_v6 = vpack.c.bf16 %v4056_v4, %v4056_v4  ;;  %v7263_v7 = vld [vmem:[#allocation8 + $0x264] ss:$16 sps:$4 sm:$0xff]   ;;  %v7258_v8 = vld [vmem:[#allocation8 + $0x60] ss:$16 sps:$4 sm:$0xff]  }
 0x24b   :  { %3972 = vmatprep.subr.bf16.mxu1 %v6848_v15  ;;  %v8076_v16 = vpack.c.bf16 %v4058_v12, %v4058_v12  ;;  %v7261_v43 = vld [vmem:[#allocation8 + $0x260] ss:$16 sps:$4 sm:$0xff]   ;;  %v7272_v46 = vld [vmem:[#allocation8 + $0x24] ss:$16 sps:$4 sm:$0xff]  }
 0x24c   :  { %3932 = vmatpush2.bf16.msra.mxu0 %v6719_v20  ;;  %v7248_v20 = vld [vmem:[#allocation8 + $0xa4] ss:$16 sps:$4 sm:$0xff]   ;;  %v7267_v9 = vld [vmem:[#allocation8 + $0x240] ss:$16 sps:$4 sm:$0xff]  }
 0x24d   :  { %3933 = vmatprep.subr.bf16.mxu0 %v6712_v26  ;;  %v7251_v26 = vld [vmem:[#allocation8 + $0x2a4] ss:$16 sps:$4 sm:$0xff]   ;;  %v7270_v51 = vld [vmem:[#allocation8 + $0x20] ss:$16 sps:$4 sm:$0xff]  }
 0x24e   :  { %3973 = vmatpush2.bf16.msra.mxu1 %v6847_v25  ;;  %v7275_v50 = vld [vmem:[#allocation8 + $0x224] ss:$16 sps:$4 sm:$0xff]   ;;  %v7273_v54 = vld [vmem:[#allocation8 + $0x220] ss:$16 sps:$4 sm:$0xff]  }
 0x24f   :  { %3974 = vmatprep.subr.bf16.mxu1 %v6840_v27  ;;  %v7276_v52 = vld [vmem:[#allocation8] ss:$16 sps:$4 sm:$0xff]   ;;  %v7284_v61 = vld [vmem:[#allocation8 + $0x1e4] ss:$16 sps:$4 sm:$0xff]  }
 0x250   :  { %3934 = vmatpush2.bf16.msra.mxu0 %v6711_v34  ;;  %v7279_v55 = vld [vmem:[#allocation8 + $0x200] ss:$16 sps:$4 sm:$0xff]   ;;  %v7290_v4 = vld [vmem:[#allocation8 + $0x1c4] ss:$16 sps:$4 sm:$0xff]  }
 0x251   :  { %3935 = vmatprep.subr.bf16.mxu0 %v6704_v38  ;;  %v7252_v38 = vld [vmem:[#allocation8 + $0x80] ss:$16 sps:$4 sm:$0xff]  }
 0x252   :  { %3975 = vmatpush2.bf16.msra.mxu1 %v6839_v37  ;;  %v7257_v37 = vld [vmem:[#allocation8 + $0x284] ss:$16 sps:$4 sm:$0xff]   ;;  %v7282_v2 = vld [vmem:[#allocation8 + $0x1e0] ss:$16 sps:$4 sm:$0xff]  }
 0x253   :  { %3976 = vmatprep.subr.bf16.mxu1 %v6832_v39  ;;  %v7255_v39 = vld [vmem:[#allocation8 + $0x280] ss:$16 sps:$4 sm:$0xff]  }
 0x254   :  { %3936 = vmatpush2.bf16.msra.mxu0 %v6703_v42  ;;  %v7266_v42 = vld [vmem:[#allocation8 + $0x44] ss:$16 sps:$4 sm:$0xff]   ;;  %v7285_v31 = vld [vmem:[#allocation8 + $0x3e0] ss:$16 sps:$4 sm:$0xff]  }
 0x255   :  { %3937 = vmatprep.subr.bf16.mxu0 %v6696_v58  ;;  %v7264_v58 = vld [vmem:[#allocation8 + $0x40] ss:$16 sps:$4 sm:$0xff]  }
 0x256   :  { %3977 = vmatpush2.bf16.msra.mxu1 %v6831_v10  ;;  %v7269_v10 = vld [vmem:[#allocation8 + $0x244] ss:$16 sps:$4 sm:$0xff]   ;;  %v7288_v12 = vld [vmem:[#allocation8 + $0x1c0] ss:$16 sps:$4 sm:$0xff]  }
 0x257   :  { %3978 = vmatprep.subr.bf16.mxu1 %v6824_v45  ;;  %v3991_v45 = vmul.f32 %v8025_v62, %v8025_v62 }
 0x258   :  { %3938 = vmatpush2.bf16.msra.mxu0 %v6695_v53 }
 0x259   :  { %3939 = vmatprep.subr.bf16.mxu0 %v6688_v57  ;;  %v3999_v53 = vmul.f32 %v3991_v45, %v8025_v62  ;;  %v4001_v57 = vmul.f32 %v3993_v48, %v8051_v41  ;;  %v4031_v48 = vmul.f32 0.5, %v8025_v62 }
 0x25a   :  { %3979 = vmatpush2.bf16.msra.mxu1 %v6823_v56  ;;  %v7278_v56 = vld [vmem:[#allocation8 + $0x4] ss:$16 sps:$4 sm:$0xff]  }
 0x25b   :  { %3980 = vmatprep.subr.bf16.mxu1 %v6816_v59  ;;  %v7281_v59 = vld [vmem:[#allocation8 + $0x204] ss:$16 sps:$4 sm:$0xff]  }
 0x25c   :  { %3940 = vmatpush2.bf16.msra.mxu0 %v6687_v60  ;;  %v4007_v60 = vmul.f32 0.044715, %v3999_v53  ;;  %v7324_v53 = vld [vmem:[#allocation8 + $0x100] ss:$16 sps:$4 sm:$0xff]  }
 0x25d   :  { %5629 = vmatprep.subr.bf16.mxu0 %v7236_v1  ;;  %v7287_v1 = vld [vmem:[#allocation8 + $0x3e4] ss:$16 sps:$4 sm:$0xff]  }
 0x25e   :  { %3981 = vmatpush2.bf16.msra.mxu1 %v6815_v0  ;;  %v4009_v0 = vmul.f32 0.044715, %v4001_v57  ;;  %v7332_v57 = vld [vmem:[#allocation8 + $0x4e4] ss:$16 sps:$4 sm:$0xff]  }
 0x25f   :  { %5670 = vmatprep.subr.bf16.mxu1 %v7239_v3  ;;  %v3697_v22 = vpop.f32.mrf.mxu0  ;;  %3942 = vmatmul.mubr.bf16.vlgmr.msra.gmra.mxu0 %v7992_v13  ;;  %v4015_v3 = vadd.f32 %v4007_v60, %v8025_v62 }
 0x260   :  { %v3698_v36 = vadd.f32 %v3697_v22, %v754_v11  ;;  %5630 = vmatpush1.bf16.msra.mxu0 %v7234_v21  ;;  %5661 = vmatprep.mubr.bf16.mxu0 %v8073_v6  ;;  %v4017_v11 = vadd.f32 %v4009_v0, %v8051_v41  ;;  %v7293_v21 = vld [vmem:[#allocation8 + $0x3c4] ss:$16 sps:$4 sm:$0xff]  }
 0x261   :  { %v3738_v15 = vpop.f32.mrf.mxu1  ;;  %3983 = vmatmul.mubr.bf16.vlgmr.msra.gmra.mxu1 %v7994_v14  ;;  %v8079_v18 = vpop.f32.mrf.mxu0  ;;  %5631 = vmatprep.subr.bf16.mxu0 %v7242_v23  ;;  %v7291_v23 = vld [vmem:[#allocation8 + $0x3c0] ss:$16 sps:$4 sm:$0xff]   ;;  %v7296_v22 = vld [vmem:[#allocation8 + $0x1a4] ss:$16 sps:$4 sm:$0xff]  }
 0x262   :  { %5671 = vmatpush1.bf16.msra.mxu1 %v7237_v30  ;;  %v8081_v25 = vadd.f32 %v3738_v15, %v3698_v36  ;;  %5702 = vmatprep.mubr.bf16.mxu1 %v8076_v16  ;;  %v4023_v30 = vmul.f32 0.7978846, %v4015_v3  ;;  %v7299_v36 = vld [vmem:[#allocation8 + $0x3a4] ss:$16 sps:$4 sm:$0xff]   ;;  %v7294_v15 = vld [vmem:[#allocation8 + $0x1a0] ss:$16 sps:$4 sm:$0xff]  }
 0x263   :  { %v8084_v13 = vpop.f32.mrf.mxu1  ;;  %v3701_v14 = vpop.f32.mrf.mxu0  ;;  %5672 = vmatprep.subr.bf16.mxu1 %v7245_v35  ;;  %v4025_v35 = vmul.f32 0.7978846, %v4017_v11  ;;  %v7338_v11 = vld [vmem:[#allocation8 + $0x4a4] ss:$16 sps:$4 sm:$0xff]  }
 0x264   :  { %5632 = vmatpush1.bf16.msra.mxu0 %v7240_v63  ;;  %7654 = vtanh.f32 %v4023_v30  ;;  %v7297_v63 = vld [vmem:[#allocation8 + $0x3a0] ss:$16 sps:$4 sm:$0xff]  }
 0x265   :  { %v3742_v27 = vpop.f32.mrf.mxu1  ;;  %v3702_v29 = vpop.f32.mrf.mxu0  ;;  %5633 = vmatprep.subr.bf16.mxu0 %v7248_v20  ;;  %7656 = vtanh.f32 %v4025_v35  ;;  %v7305_v20 = vld [vmem:[#allocation8 + $0x384] ss:$16 sps:$4 sm:$0xff]   ;;  %v7303_v14 = vld [vmem:[#allocation8 + $0x380] ss:$16 sps:$4 sm:$0xff]  }
 0x266   :  { %5673 = vmatpush1.bf16.msra.mxu1 %v7243_v19  ;;  %v7302_v19 = vld [vmem:[#allocation8 + $0x184] ss:$16 sps:$4 sm:$0xff]   ;;  %v7306_v29 = vld [vmem:[#allocation8 + $0x160] ss:$16 sps:$4 sm:$0xff]  }
 0x267   :  { %v3743_v34 = vpop.f32.mrf.mxu1  ;;  %5674 = vmatprep.subr.bf16.mxu1 %v7251_v26  ;;  %v7300_v26 = vld [vmem:[#allocation8 + $0x180] ss:$16 sps:$4 sm:$0xff]   ;;  %v7308_v27 = vld [vmem:[#allocation8 + $0x164] ss:$16 sps:$4 sm:$0xff]  }
 0x268   :  { %5634 = vmatpush1.bf16.msra.mxu0 %v7246_v28  ;;  %v7311_v28 = vld [vmem:[#allocation8 + $0x364] ss:$16 sps:$4 sm:$0xff]  }
 0x269   :  { %5635 = vmatprep.subr.bf16.mxu0 %v7254_v33  ;;  %v7314_v33 = vld [vmem:[#allocation8 + $0x144] ss:$16 sps:$4 sm:$0xff]  }
 0x26a   :  { %5675 = vmatpush1.bf16.msra.mxu1 %v7249_v32  ;;  %v7309_v32 = vld [vmem:[#allocation8 + $0x360] ss:$16 sps:$4 sm:$0xff]   ;;  %v7317_v34 = vld [vmem:[#allocation8 + $0x344] ss:$16 sps:$4 sm:$0xff]  }
 0x26b   :  { %5676 = vmatprep.subr.bf16.mxu1 %v7257_v37  ;;  %v7312_v37 = vld [vmem:[#allocation8 + $0x140] ss:$16 sps:$4 sm:$0xff]  }
 0x26c   :  { %5636 = vmatpush1.bf16.msra.mxu0 %v7252_v38  ;;  %v7315_v38 = vld [vmem:[#allocation8 + $0x340] ss:$16 sps:$4 sm:$0xff]  }
 0x26d   :  { %5637 = vmatprep.subr.bf16.mxu0 %v7260_v40 }
 0x26e   :  { %5677 = vmatpush1.bf16.msra.mxu1 %v7255_v39  ;;  %v7320_v39 = vld [vmem:[#allocation8 + $0x124] ss:$16 sps:$4 sm:$0xff]  }
 0x26f   :  { %5678 = vmatprep.subr.bf16.mxu1 %v7263_v7  ;;  %v7323_v7 = vld [vmem:[#allocation8 + $0x324] ss:$16 sps:$4 sm:$0xff]  }
 0x270   :  { %5638 = vmatpush1.bf16.msra.mxu0 %v7258_v8 }
 0x271   :  { %5639 = vmatprep.subr.bf16.mxu0 %v7266_v42  ;;  %v7655_v40 = vpop.eup %7654  ;;  %v7318_v42 = vld [vmem:[#allocation8 + $0x120] ss:$16 sps:$4 sm:$0xff]  }
 0x272   :  { %5679 = vmatpush1.bf16.msra.mxu1 %v7261_v43  ;;  %v7657_v8 = vpop.eup %7656  ;;  %v757_v43 = vsub.s32 5, %v7929_v47  ;;  %v4047_v45 = vadd.f32 1.0, %v7655_v40 }
 0x273   :  { %5680 = vmatprep.subr.bf16.mxu1 %v7269_v10  ;;  %v7321_v10 = vld [vmem:[#allocation8 + $0x320] ss:$16 sps:$4 sm:$0xff]  }
 0x274   :  { %5640 = vmatpush1.bf16.msra.mxu0 %v7264_v58  ;;  %v7326_v58 = vld [vmem:[#allocation8 + $0x104] ss:$16 sps:$4 sm:$0xff]  }
 0x275   :  { %5641 = vmatprep.subr.bf16.mxu0 %v7272_v46  ;;  %v4049_v46 = vadd.f32 1.0, %v7657_v8  ;;  %v7432_v8 = vld [vmem:[#allocation8 + $0x660] ss:$16 sps:$4 sm:$0xff]  }
 0x276   :  { %5681 = vmatpush1.bf16.msra.mxu1 %v7267_v9  ;;  %v7329_v9 = vld [vmem:[#allocation8 + $0x304] ss:$16 sps:$4 sm:$0xff]  }
 0x277   :  { %5682 = vmatprep.subr.bf16.mxu1 %v7275_v50  ;;  %v4033_v50 = vmul.f32 0.5, %v8051_v41  ;;  %v7335_v41 = vld [vmem:[#allocation8 + $0x4c4] ss:$16 sps:$4 sm:$0xff]  }
 0x278   :  { %5642 = vmatpush1.bf16.msra.mxu0 %v7270_v51  ;;  %v758_v51 = vrot.slane %v8069_v5, %v757_v43 }
 0x279   :  { %5643 = vmatprep.subr.bf16.mxu0 %v7278_v56  ;;  %v4055_v56 = vmul.f32 %v4047_v45, %v4031_v48  ;;  %v7438_v45 = vld [vmem:[#allocation8 + $0x640] ss:$16 sps:$4 sm:$0xff]  }
 0x27a   :  { %5683 = vmatpush1.bf16.msra.mxu1 %v7273_v54  ;;  %v7327_v54 = vld [vmem:[#allocation8 + $0x300] ss:$16 sps:$4 sm:$0xff]   ;;  %v3700_v60 = vadd.f32 %v8079_v18, %v758_v51 }
 0x27b   :  { %5684 = vmatprep.subr.bf16.mxu1 %v7281_v59  ;;  %v4057_v59 = vmul.f32 %v4049_v46, %v4033_v50  ;;  %v8099_v62 = vpack.c.bf16 %v4055_v56, %v4055_v56  ;;  %v7333_v18 = vld [vmem:[#allocation8 + $0x4c0] ss:$16 sps:$4 sm:$0xff]   ;;  %v7353_v50 = vld [vmem:[#allocation8 + $0x404] ss:$16 sps:$4 sm:$0xff]  }
 0x27c   :  { %5644 = vmatpush1.bf16.msra.mxu0 %v7276_v52  ;;  %v7410_v52 = vld [vmem:[#allocation8 + $0x6e4] ss:$16 sps:$4 sm:$0xff]   ;;  %v3741_v3 = vadd.f32 %v8084_v13, %v3700_v60  ;;  %v7336_v13 = vld [vmem:[#allocation8 + $0x4a0] ss:$16 sps:$4 sm:$0xff]  }
 0x27d   :  { %5645 = vmatprep.subr.bf16.mxu0 %v7284_v61  ;;  %v7408_v61 = vld [vmem:[#allocation8 + $0x6e0] ss:$16 sps:$4 sm:$0xff]   ;;  %v8101_v0 = vpack.c.bf16 %v4057_v59, %v4057_v59 }
 0x27e   :  { %5685 = vmatpush1.bf16.msra.mxu1 %v7279_v55  ;;  %v7330_v55 = vld [vmem:[#allocation8 + $0x4e0] ss:$16 sps:$4 sm:$0xff]  }
 0x27f   :  { %5686 = vmatprep.subr.bf16.mxu1 %v7287_v1  ;;  %v7416_v1 = vld [vmem:[#allocation8 + $0x6c4] ss:$16 sps:$4 sm:$0xff]   ;;  %v7348_v46 = vld [vmem:[#allocation8 + $0x420] ss:$16 sps:$4 sm:$0xff]  }
 0x280   :  { %5646 = vmatpush2.bf16.msra.mxu0 %v7282_v2  ;;  %v7444_v51 = vld [vmem:[#allocation8 + $0x620] ss:$16 sps:$4 sm:$0xff]  }
 0x281   :  { %5647 = vmatprep.subr.bf16.mxu0 %v7290_v4  ;;  %v7450_v59 = vld [vmem:[#allocation8 + $0x600] ss:$16 sps:$4 sm:$0xff]  }
 0x282   :  { %5687 = vmatpush2.bf16.msra.mxu1 %v7285_v31  ;;  %v7354_v60 = vld [vmem:[#allocation8 + $0x5e0] ss:$16 sps:$4 sm:$0xff]  }
 0x283   :  { %5688 = vmatprep.subr.bf16.mxu1 %v7293_v21  ;;  %v7414_v21 = vld [vmem:[#allocation8 + $0x6c0] ss:$16 sps:$4 sm:$0xff]  }
 0x284   :  { %5648 = vmatpush2.bf16.msra.mxu0 %v7288_v12 }
 0x285   :  { %5649 = vmatprep.subr.bf16.mxu0 %v7296_v22 }
 0x286   :  { %5689 = vmatpush2.bf16.msra.mxu1 %v7291_v23  ;;  %v7422_v23 = vld [vmem:[#allocation8 + $0x6a4] ss:$16 sps:$4 sm:$0xff]  }
 0x287   :  { %5690 = vmatprep.subr.bf16.mxu1 %v7299_v36 }
 0x288   :  { %5650 = vmatpush2.bf16.msra.mxu0 %v7294_v15 }
 0x289   :  { %5651 = vmatprep.subr.bf16.mxu0 %v7302_v19  ;;  %v7420_v19 = vld [vmem:[#allocation8 + $0x6a0] ss:$16 sps:$4 sm:$0xff]  }
 0x28a   :  { %5691 = vmatpush2.bf16.msra.mxu1 %v7297_v63  ;;  %v7341_v63 = vld [vmem:[#allocation8 + $0x484] ss:$16 sps:$4 sm:$0xff]  }
 0x28b   :  { %5692 = vmatprep.subr.bf16.mxu1 %v7305_v20 }
 0x28c   :  { %5652 = vmatpush2.bf16.msra.mxu0 %v7300_v26 }
 0x28d   :  { %5653 = vmatprep.subr.bf16.mxu0 %v7308_v27 }
 0x28e   :  { %5693 = vmatpush2.bf16.msra.mxu1 %v7303_v14  ;;  %v7428_v14 = vld [vmem:[#allocation8 + $0x684] ss:$16 sps:$4 sm:$0xff]  }
 0x28f   :  { %5694 = vmatprep.subr.bf16.mxu1 %v7311_v28  ;;  %v7339_v28 = vld [vmem:[#allocation8 + $0x480] ss:$16 sps:$4 sm:$0xff]  }
 0x290   :  { %5654 = vmatpush2.bf16.msra.mxu0 %v7306_v29 }
 0x291   :  { %5655 = vmatprep.subr.bf16.mxu0 %v7314_v33  ;;  %v7426_v33 = vld [vmem:[#allocation8 + $0x680] ss:$16 sps:$4 sm:$0xff]  }
 0x292   :  { %5695 = vmatpush2.bf16.msra.mxu1 %v7309_v32  ;;  %v7344_v32 = vld [vmem:[#allocation8 + $0x464] ss:$16 sps:$4 sm:$0xff]  }
 0x293   :  { %5696 = vmatprep.subr.bf16.mxu1 %v7317_v34 }
 0x294   :  { %5656 = vmatpush2.bf16.msra.mxu0 %v7312_v37  ;;  %v7434_v37 = vld [vmem:[#allocation8 + $0x664] ss:$16 sps:$4 sm:$0xff]  }
 0x295   :  { %5657 = vmatprep.subr.bf16.mxu0 %v7320_v39  ;;  %v7342_v39 = vld [vmem:[#allocation8 + $0x460] ss:$16 sps:$4 sm:$0xff]  }
 0x296   :  { %5697 = vmatpush2.bf16.msra.mxu1 %v7315_v38 }
 0x297   :  { %5698 = vmatprep.subr.bf16.mxu1 %v7323_v7  ;;  %v7347_v7 = vld [vmem:[#allocation8 + $0x444] ss:$16 sps:$4 sm:$0xff]  }
 0x298   :  { %5658 = vmatpush2.bf16.msra.mxu0 %v7318_v42  ;;  %v7345_v42 = vld [vmem:[#allocation8 + $0x440] ss:$16 sps:$4 sm:$0xff]  }
 0x299   :  { %5659 = vmatprep.subr.bf16.mxu0 %v7326_v58  ;;  %v7350_v58 = vld [vmem:[#allocation8 + $0x424] ss:$16 sps:$4 sm:$0xff]  }
 0x29a   :  { %5699 = vmatpush2.bf16.msra.mxu1 %v7321_v10 }
 0x29b   :  { %5700 = vmatprep.subr.bf16.mxu1 %v7329_v9  ;;  %v7446_v9 = vld [vmem:[#allocation8 + $0x624] ss:$16 sps:$4 sm:$0xff]  }
 0x29c   :  { %5660 = vmatpush2.bf16.msra.mxu0 %v7324_v53  ;;  %v7452_v53 = vld [vmem:[#allocation8 + $0x604] ss:$16 sps:$4 sm:$0xff]  }
 0x29d   :  { %5711 = vmatprep.subr.bf16.mxu0 %v7332_v57  ;;  %v7356_v57 = vld [vmem:[#allocation8 + $0x5e4] ss:$16 sps:$4 sm:$0xff]  }
 0x29e   :  { %5701 = vmatpush2.bf16.msra.mxu1 %v7327_v54  ;;  %v7351_v54 = vld [vmem:[#allocation8 + $0x400] ss:$16 sps:$4 sm:$0xff]  }
 0x29f   :  { %5752 = vmatprep.subr.bf16.mxu1 %v7410_v52  ;;  %v3779_v2 = vpop.f32.mrf.mxu0  ;;  %5662 = vmatmul.mubr.bf16.vlgmr.msra.gmra.mxu0 %v8099_v62  ;;  %v7458_v52 = vld [vmem:[#allocation8 + $0x7e4] ss:$16 sps:$4 sm:$0xff]  }
 0x2a0   :  { %5712 = vmatpush1.bf16.msra.mxu0 %v7330_v55  ;;  %v3780_v29 = vadd.f32 %v3779_v2, %v8081_v25  ;;  %v7440_v25 = vld [vmem:[#allocation8 + $0x644] ss:$16 sps:$4 sm:$0xff]  }
 0x2a1   :  { %v3820_v31 = vpop.f32.mrf.mxu1  ;;  %5703 = vmatmul.mubr.bf16.vlgmr.msra.gmra.mxu1 %v8101_v0  ;;  %v3781_v4 = vpop.f32.mrf.mxu0  ;;  %5713 = vmatprep.subr.bf16.mxu0 %v7335_v41 }
 0x2a2   :  { %5753 = vmatpush1.bf16.msra.mxu1 %v7408_v61  ;;  %v3782_v12 = vadd.f32 %v3781_v4, %v3741_v3  ;;  %v8113_v40 = vadd.f32 %v3820_v31, %v3780_v29  ;;  %v7359_v61 = vld [vmem:[#allocation8 + $0x5c4] ss:$16 sps:$4 sm:$0xff]   ;;  %v7369_v29 = vld [vmem:[#allocation8 + $0x540] ss:$16 sps:$4 sm:$0xff]  }
 0x2a3   :  { %v3822_v30 = vpop.f32.mrf.mxu1  ;;  %5754 = vmatprep.subr.bf16.mxu1 %v7416_v1  ;;  %v3783_v22 = vpop.f32.mrf.mxu0  ;;  %v7456_v1 = vld [vmem:[#allocation8 + $0x7e0] ss:$16 sps:$4 sm:$0xff]   ;;  %v7464_v31 = vld [vmem:[#allocation8 + $0x7c4] ss:$16 sps:$4 sm:$0xff]  }
 0x2a4   :  { %v8106_v35 = vadd.f32 %v3822_v30, %v3782_v12  ;;  %5714 = vmatpush1.bf16.msra.mxu0 %v7333_v18  ;;  %v3995_v10 = vmul.f32 %v8113_v40, %v8113_v40  ;;  %v7357_v18 = vld [vmem:[#allocation8 + $0x5c0] ss:$16 sps:$4 sm:$0xff]  }
 0x2a5   :  { %v3824_v36 = vpop.f32.mrf.mxu1  ;;  %v3784_v15 = vpop.f32.mrf.mxu0  ;;  %5715 = vmatprep.subr.bf16.mxu0 %v7338_v11  ;;  %v7462_v12 = vld [vmem:[#allocation8 + $0x7c0] ss:$16 sps:$4 sm:$0xff]  }
 0x2a6   :  { %5755 = vmatpush1.bf16.msra.mxu1 %v7414_v21  ;;  %v3996_v20 = vmul.f32 %v8106_v35, %v8106_v35  ;;  %v4003_v48 = vmul.f32 %v3995_v10, %v8113_v40  ;;  %v4036_v2 = vmul.f32 0.5, %v8106_v35  ;;  %v7362_v21 = vld [vmem:[#allocation8 + $0x5a4] ss:$16 sps:$4 sm:$0xff]   ;;  %v7360_v22 = vld [vmem:[#allocation8 + $0x5a0] ss:$16 sps:$4 sm:$0xff]  }
 0x2a7   :  { %v3825_v26 = vpop.f32.mrf.mxu1  ;;  %5756 = vmatprep.subr.bf16.mxu1 %v7422_v23  ;;  %v7470_v23 = vld [vmem:[#allocation8 + $0x7a4] ss:$16 sps:$4 sm:$0xff]   ;;  %v7468_v36 = vld [vmem:[#allocation8 + $0x7a0] ss:$16 sps:$4 sm:$0xff]  }
 0x2a8   :  { %v4004_v27 = vmul.f32 %v3996_v20, %v8106_v35  ;;  %5716 = vmatpush1.bf16.msra.mxu0 %v7336_v13  ;;  %v4011_v56 = vmul.f32 0.044715, %v4003_v48  ;;  %v7476_v13 = vld [vmem:[#allocation8 + $0x784] ss:$16 sps:$4 sm:$0xff]   ;;  %v7363_v15 = vld [vmem:[#allocation8 + $0x580] ss:$16 sps:$4 sm:$0xff]  }
 0x2a9   :  { %5717 = vmatprep.subr.bf16.mxu0 %v7341_v63  ;;  %v7368_v63 = vld [vmem:[#allocation8 + $0x564] ss:$16 sps:$4 sm:$0xff]   ;;  %v7366_v26 = vld [vmem:[#allocation8 + $0x560] ss:$16 sps:$4 sm:$0xff]  }
 0x2aa   :  { %5757 = vmatpush1.bf16.msra.mxu1 %v7420_v19  ;;  %v4012_v34 = vmul.f32 0.044715, %v4004_v27  ;;  %v4019_v41 = vadd.f32 %v4011_v56, %v8113_v40  ;;  %v7474_v19 = vld [vmem:[#allocation8 + $0x780] ss:$16 sps:$4 sm:$0xff]   ;;  %v7482_v20 = vld [vmem:[#allocation8 + $0x764] ss:$16 sps:$4 sm:$0xff]  }
 0x2ab   :  { %5758 = vmatprep.subr.bf16.mxu1 %v7428_v14  ;;  %v7371_v14 = vld [vmem:[#allocation8 + $0x544] ss:$16 sps:$4 sm:$0xff]   ;;  %v7480_v27 = vld [vmem:[#allocation8 + $0x760] ss:$16 sps:$4 sm:$0xff]   ;;  %v7386_v56 = vld [vmem:[#allocation8 + $0xac] ss:$16 sps:$4 sm:$0xff]  }
 0x2ac   :  { %v4020_v38 = vadd.f32 %v4012_v34, %v8106_v35  ;;  %5718 = vmatpush1.bf16.msra.mxu0 %v7339_v28  ;;  %v4027_v11 = vmul.f32 0.7978846, %v4019_v41  ;;  %v7365_v35 = vld [vmem:[#allocation8 + $0x584] ss:$16 sps:$4 sm:$0xff]   ;;  %v7389_v41 = vld [vmem:[#allocation8 + $0x8c] ss:$16 sps:$4 sm:$0xff]  }
 0x2ad   :  { %5719 = vmatprep.subr.bf16.mxu0 %v7344_v32  ;;  %v7488_v28 = vld [vmem:[#allocation8 + $0x744] ss:$16 sps:$4 sm:$0xff]  }
 0x2ae   :  { %5759 = vmatpush1.bf16.msra.mxu1 %v7426_v33  ;;  %v4028_v43 = vmul.f32 0.7978846, %v4020_v38  ;;  %v7374_v32 = vld [vmem:[#allocation8 + $0x524] ss:$16 sps:$4 sm:$0xff]   ;;  %v7486_v33 = vld [vmem:[#allocation8 + $0x740] ss:$16 sps:$4 sm:$0xff]  }
 0x2af   :  { %5760 = vmatprep.subr.bf16.mxu1 %v7434_v37  ;;  %v7494_v37 = vld [vmem:[#allocation8 + $0x724] ss:$16 sps:$4 sm:$0xff]   ;;  %v7372_v38 = vld [vmem:[#allocation8 + $0x520] ss:$16 sps:$4 sm:$0xff]  }
 0x2b0   :  { %7658 = vtanh.f32 %v4028_v43  ;;  %5720 = vmatpush1.bf16.msra.mxu0 %v7342_v39  ;;  %v7377_v39 = vld [vmem:[#allocation8 + $0x504] ss:$16 sps:$4 sm:$0xff]  }
 0x2b1   :  { %5721 = vmatprep.subr.bf16.mxu0 %v7347_v7  ;;  %7660 = vtanh.f32 %v4027_v11  ;;  %v7500_v43 = vld [vmem:[#allocation8 + $0x704] ss:$16 sps:$4 sm:$0xff]   ;;  %v7401_v11 = vld [vmem:[#allocation8 + $0xc] ss:$16 sps:$4 sm:$0xff]  }
 0x2b2   :  { %5761 = vmatpush1.bf16.msra.mxu1 %v7432_v8  ;;  %v7492_v8 = vld [vmem:[#allocation8 + $0x720] ss:$16 sps:$4 sm:$0xff]  }
 0x2b3   :  { %5762 = vmatprep.subr.bf16.mxu1 %v7440_v25  ;;  %v4035_v25 = vmul.f32 0.5, %v8113_v40 }
 0x2b4   :  { %5722 = vmatpush1.bf16.msra.mxu0 %v7345_v42  ;;  %v7375_v42 = vld [vmem:[#allocation8 + $0x500] ss:$16 sps:$4 sm:$0xff]  }
 0x2b5   :  { %5723 = vmatprep.subr.bf16.mxu0 %v7350_v58  ;;  %v7380_v58 = vld [vmem:[#allocation8 + $0xec] ss:$16 sps:$4 sm:$0xff]  }
 0x2b6   :  { %5763 = vmatpush1.bf16.msra.mxu1 %v7438_v45  ;;  %v7498_v45 = vld [vmem:[#allocation8 + $0x700] ss:$16 sps:$4 sm:$0xff]  }
 0x2b7   :  { %5764 = vmatprep.subr.bf16.mxu1 %v7446_v9  ;;  %v7506_v9 = vld [vmem:[#allocation8 + $0x2ec] ss:$16 sps:$4 sm:$0xff]  }
 0x2b8   :  { %5724 = vmatpush1.bf16.msra.mxu0 %v7348_v46  ;;  %v7378_v46 = vld [vmem:[#allocation8 + $0xe8] ss:$16 sps:$4 sm:$0xff]  }
 0x2b9   :  { %5725 = vmatprep.subr.bf16.mxu0 %v7353_v50  ;;  %v7383_v50 = vld [vmem:[#allocation8 + $0xcc] ss:$16 sps:$4 sm:$0xff]  }
 0x2ba   :  { %5765 = vmatpush1.bf16.msra.mxu1 %v7444_v51 }
 0x2bb   :  { %5766 = vmatprep.subr.bf16.mxu1 %v7452_v53  ;;  %v7381_v53 = vld [vmem:[#allocation8 + $0xc8] ss:$16 sps:$4 sm:$0xff]  }
 0x2bc   :  { %5726 = vmatpush1.bf16.msra.mxu0 %v7351_v54 }
 0x2bd   :  { %v7659_v55 = vpop.eup %7658  ;;  %5727 = vmatprep.subr.bf16.mxu0 %v7356_v57 }
 0x2be   :  { %5767 = vmatpush1.bf16.msra.mxu1 %v7450_v59  ;;  %v4052_v3 = vadd.f32 1.0, %v7659_v55  ;;  %v7661_v34 = vpop.eup %7660 }
 0x2bf   :  { %5768 = vmatprep.subr.bf16.mxu1 %v7458_v52  ;;  %v4051_v7 = vadd.f32 1.0, %v7661_v34 }
 0x2c0   :  { %5728 = vmatpush2.bf16.msra.mxu0 %v7354_v60  ;;  %v4060_v4 = vmul.f32 %v4052_v3, %v4036_v2  ;;  %v7384_v60 = vld [vmem:[#allocation8 + $0xa8] ss:$16 sps:$4 sm:$0xff]   ;;  %v7392_v2 = vld [vmem:[#allocation8 + $0x6c] ss:$16 sps:$4 sm:$0xff]  }
 0x2c1   :  { %5729 = vmatprep.subr.bf16.mxu0 %v7359_v61  ;;  %v4059_v10 = vmul.f32 %v4051_v7, %v4035_v25  ;;  %v7395_v3 = vld [vmem:[#allocation8 + $0x4c] ss:$16 sps:$4 sm:$0xff]  }
 0x2c2   :  { %5769 = vmatpush2.bf16.msra.mxu1 %v7456_v1  ;;  %v8120_v30 = vpack.c.bf16 %v4060_v4, %v4060_v4  ;;  %v7387_v1 = vld [vmem:[#allocation8 + $0x88] ss:$16 sps:$4 sm:$0xff]   ;;  %v7455_v25 = vld [vmem:[#allocation8 + $0x4cc] ss:$16 sps:$4 sm:$0xff]  }
 0x2c3   :  { %5770 = vmatprep.subr.bf16.mxu1 %v7464_v31  ;;  %v8124_v48 = vpack.c.bf16 %v4059_v10, %v4059_v10  ;;  %v7393_v31 = vld [vmem:[#allocation8 + $0x48] ss:$16 sps:$4 sm:$0xff]  }
 0x2c4   :  { %5730 = vmatpush2.bf16.msra.mxu0 %v7357_v18  ;;  %5743 = vmatprep.mubr.bf16.mxu0 %v8120_v30  ;;  %v7398_v18 = vld [vmem:[#allocation8 + $0x2c] ss:$16 sps:$4 sm:$0xff]   ;;  %v7396_v4 = vld [vmem:[#allocation8 + $0x28] ss:$16 sps:$4 sm:$0xff]  }
 0x2c5   :  { %5731 = vmatprep.subr.bf16.mxu0 %v7362_v21  ;;  %v7399_v21 = vld [vmem:[#allocation8 + $0x8] ss:$16 sps:$4 sm:$0xff]  }
 0x2c6   :  { %5771 = vmatpush2.bf16.msra.mxu1 %v7462_v12  ;;  %v7404_v12 = vld [vmem:[#allocation8 + $0x1ec] ss:$16 sps:$4 sm:$0xff]  }
 0x2c7   :  { %5772 = vmatprep.subr.bf16.mxu1 %v7470_v23  ;;  %v7402_v23 = vld [vmem:[#allocation8 + $0x1e8] ss:$16 sps:$4 sm:$0xff]  }
 0x2c8   :  { %5732 = vmatpush2.bf16.msra.mxu0 %v7360_v22  ;;  %v7407_v22 = vld [vmem:[#allocation8 + $0x1cc] ss:$16 sps:$4 sm:$0xff]  }
 0x2c9   :  { %5733 = vmatprep.subr.bf16.mxu0 %v7365_v35  ;;  %v7405_v35 = vld [vmem:[#allocation8 + $0x1c8] ss:$16 sps:$4 sm:$0xff]  }
 0x2ca   :  { %5773 = vmatpush2.bf16.msra.mxu1 %v7468_v36  ;;  %v7413_v36 = vld [vmem:[#allocation8 + $0x1ac] ss:$16 sps:$4 sm:$0xff]  }
 0x2cb   :  { %5774 = vmatprep.subr.bf16.mxu1 %v7476_v13  ;;  %v7411_v13 = vld [vmem:[#allocation8 + $0x1a8] ss:$16 sps:$4 sm:$0xff]  }
 0x2cc   :  { %5734 = vmatpush2.bf16.msra.mxu0 %v7363_v15  ;;  %v7419_v15 = vld [vmem:[#allocation8 + $0x18c] ss:$16 sps:$4 sm:$0xff]  }
 0x2cd   :  { %5735 = vmatprep.subr.bf16.mxu0 %v7368_v63  ;;  %v7417_v63 = vld [vmem:[#allocation8 + $0x188] ss:$16 sps:$4 sm:$0xff]  }
 0x2ce   :  { %5775 = vmatpush2.bf16.msra.mxu1 %v7474_v19  ;;  %v7425_v19 = vld [vmem:[#allocation8 + $0x16c] ss:$16 sps:$4 sm:$0xff]  }
 0x2cf   :  { %5776 = vmatprep.subr.bf16.mxu1 %v7482_v20  ;;  %v7423_v20 = vld [vmem:[#allocation8 + $0x168] ss:$16 sps:$4 sm:$0xff]  }
 0x2d0   :  { %5736 = vmatpush2.bf16.msra.mxu0 %v7366_v26  ;;  %v7431_v26 = vld [vmem:[#allocation8 + $0x14c] ss:$16 sps:$4 sm:$0xff]  }
 0x2d1   :  { %5737 = vmatprep.subr.bf16.mxu0 %v7371_v14  ;;  %v7429_v14 = vld [vmem:[#allocation8 + $0x148] ss:$16 sps:$4 sm:$0xff]  }
 0x2d2   :  { %5777 = vmatpush2.bf16.msra.mxu1 %v7480_v27  ;;  %v7437_v27 = vld [vmem:[#allocation8 + $0x12c] ss:$16 sps:$4 sm:$0xff]  }
 0x2d3   :  { %5778 = vmatprep.subr.bf16.mxu1 %v7488_v28  ;;  %v761_v28 = vsub.s32 6, %v7929_v47 }
 0x2d4   :  { %5738 = vmatpush2.bf16.msra.mxu0 %v7369_v29  ;;  %v765_v29 = vsub.s32 7, %v7929_v47 }
 0x2d5   :  { %5739 = vmatprep.subr.bf16.mxu0 %v7374_v32  ;;  %v7435_v32 = vld [vmem:[#allocation8 + $0x128] ss:$16 sps:$4 sm:$0xff]   ;;  %v762_v34 = vrot.slane %v8069_v5, %v761_v28 }
 0x2d6   :  { %5779 = vmatpush2.bf16.msra.mxu1 %v7486_v33  ;;  %v7443_v33 = vld [vmem:[#allocation8 + $0x10c] ss:$16 sps:$4 sm:$0xff]  }
 0x2d7   :  { %5780 = vmatprep.subr.bf16.mxu1 %v7494_v37  ;;  %v766_v37 = vrot.slane %v8069_v5, %v765_v29 }
 0x2d8   :  { %5740 = vmatpush2.bf16.msra.mxu0 %v7372_v38  ;;  %v7441_v38 = vld [vmem:[#allocation8 + $0x108] ss:$16 sps:$4 sm:$0xff]  }
 0x2d9   :  { %5741 = vmatprep.subr.bf16.mxu0 %v7377_v39  ;;  %v7449_v39 = vld [vmem:[#allocation8 + $0x4ec] ss:$16 sps:$4 sm:$0xff]  }
 0x2da   :  { %5781 = vmatpush2.bf16.msra.mxu1 %v7492_v8 }
 0x2db   :  { %5782 = vmatprep.subr.bf16.mxu1 %v7500_v43  ;;  %v7447_v43 = vld [vmem:[#allocation8 + $0x4e8] ss:$16 sps:$4 sm:$0xff]  }
 0x2dc   :  { %5742 = vmatpush2.bf16.msra.mxu0 %v7375_v42 }
 0x2dd   :  { %5793 = vmatprep.subr.bf16.mxu0 %v7380_v58 }
 0x2de   :  { %5783 = vmatpush2.bf16.msra.mxu1 %v7498_v45 }
 0x2df   :  { %5834 = vmatprep.subr.bf16.mxu1 %v7506_v9  ;;  %v8126_v51 = vpop.f32.mrf.mxu0  ;;  %5744 = vmatmul.mubr.bf16.vlgmr.msra.gmra.mxu0 %v8124_v48  ;;  %v7453_v9 = vld [vmem:[#allocation8 + $0x4c8] ss:$16 sps:$4 sm:$0xff]  }
 0x2e0   :  { %5794 = vmatpush1.bf16.msra.mxu0 %v7378_v46  ;;  %5825 = vmatprep.mubr.bf16.mxu0 %v8073_v6  ;;  %v7390_v6 = vld [vmem:[#allocation8 + $0x68] ss:$16 sps:$4 sm:$0xff]   ;;  %v3862_v7 = vadd.f32 %v8126_v51, %v762_v34 }
 0x2e1   :  { %v8129_v40 = vpop.f32.mrf.mxu1  ;;  %v8132_v54 = vpop.f32.mrf.mxu0  ;;  %5795 = vmatprep.subr.bf16.mxu0 %v7383_v50  ;;  %v7461_v50 = vld [vmem:[#allocation8 + $0x4ac] ss:$16 sps:$4 sm:$0xff]  }
 0x2e2   :  { %v3864_v8 = vadd.f32 %v8132_v54, %v766_v37  ;;  %v3903_v42 = vadd.f32 %v8129_v40, %v3862_v7  ;;  %v7509_v37 = vld [vmem:[#allocation8 + $0x5ac] ss:$16 sps:$4 sm:$0xff]  }
 0x2e3   :  { %v8134_v57 = vpop.f32.mrf.mxu1  ;;  %v3865_v59 = vpop.f32.mrf.mxu0 }
 0x2e4   :  { %5796 = vmatpush1.bf16.msra.mxu0 %v7381_v53  ;;  %v3905_v58 = vadd.f32 %v8134_v57, %v3864_v8  ;;  %v7467_v57 = vld [vmem:[#allocation8 + $0x48c] ss:$16 sps:$4 sm:$0xff]  }
 0x2e5   :  { %v3906_v52 = vpop.f32.mrf.mxu1  ;;  %v3866_v55 = vpop.f32.mrf.mxu0  ;;  %5797 = vmatprep.subr.bf16.mxu0 %v7386_v56  ;;  %v7512_v8 = vld [vmem:[#allocation8 + $0x2cc] ss:$16 sps:$4 sm:$0xff]  }
 0x2e7   :  { %v3907_v61 = vpop.f32.mrf.mxu1 }
 0x2e8   :  { %5798 = vmatpush1.bf16.msra.mxu0 %v7384_v60 }
 0x2e9   :  { %5799 = vmatprep.subr.bf16.mxu0 %v7389_v41 }
 0x2ec   :  { %5800 = vmatpush1.bf16.msra.mxu0 %v7387_v1 }
 0x2ed   :  { %5801 = vmatprep.subr.bf16.mxu0 %v7392_v2  ;;  %v7465_v2 = vld [vmem:[#allocation8 + $0x488] ss:$16 sps:$4 sm:$0xff]  }
 0x2f0   :  { %5802 = vmatpush1.bf16.msra.mxu0 %v7390_v6  ;;  %v7473_v6 = vld [vmem:[#allocation8 + $0x46c] ss:$16 sps:$4 sm:$0xff]  }
 0x2f1   :  { %5803 = vmatprep.subr.bf16.mxu0 %v7395_v3 }
 0x2f4   :  { %5804 = vmatpush1.bf16.msra.mxu0 %v7393_v31 }
 0x2f5   :  { %5805 = vmatprep.subr.bf16.mxu0 %v7398_v18 }
 0x2f8   :  { %5806 = vmatpush1.bf16.msra.mxu0 %v7396_v4 }
 0x2f9   :  { %5807 = vmatprep.subr.bf16.mxu0 %v7401_v11  ;;  %v7471_v11 = vld [vmem:[#allocation8 + $0x468] ss:$16 sps:$4 sm:$0xff]  }
 0x2fc   :  { %5808 = vmatpush1.bf16.msra.mxu0 %v7399_v21  ;;  %v7479_v21 = vld [vmem:[#allocation8 + $0x44c] ss:$16 sps:$4 sm:$0xff]  }
 0x2fd   :  { %5809 = vmatprep.subr.bf16.mxu0 %v7404_v12 }
 0x300   :  { %5810 = vmatpush2.bf16.msra.mxu0 %v7402_v23  ;;  %v7477_v23 = vld [vmem:[#allocation8 + $0x448] ss:$16 sps:$4 sm:$0xff]  }
 0x301   :  { %5811 = vmatprep.subr.bf16.mxu0 %v7407_v22  ;;  %v7485_v22 = vld [vmem:[#allocation8 + $0x42c] ss:$16 sps:$4 sm:$0xff]  }
 0x304   :  { %5812 = vmatpush2.bf16.msra.mxu0 %v7405_v35  ;;  %v7483_v35 = vld [vmem:[#allocation8 + $0x428] ss:$16 sps:$4 sm:$0xff]  }
 0x305   :  { %5813 = vmatprep.subr.bf16.mxu0 %v7413_v36  ;;  %v7491_v36 = vld [vmem:[#allocation8 + $0x40c] ss:$16 sps:$4 sm:$0xff]  }
 0x308   :  { %5814 = vmatpush2.bf16.msra.mxu0 %v7411_v13  ;;  %v7489_v13 = vld [vmem:[#allocation8 + $0x408] ss:$16 sps:$4 sm:$0xff]  }
 0x309   :  { %5815 = vmatprep.subr.bf16.mxu0 %v7419_v15  ;;  %v7497_v15 = vld [vmem:[#allocation8 + $0x5ec] ss:$16 sps:$4 sm:$0xff]  }
 0x30c   :  { %5816 = vmatpush2.bf16.msra.mxu0 %v7417_v63 }
 0x30d   :  { %5817 = vmatprep.subr.bf16.mxu0 %v7425_v19  ;;  %v7495_v19 = vld [vmem:[#allocation8 + $0x5e8] ss:$16 sps:$4 sm:$0xff]  }
 0x310   :  { %5818 = vmatpush2.bf16.msra.mxu0 %v7423_v20 }
 0x311   :  { %5819 = vmatprep.subr.bf16.mxu0 %v7431_v26 }
 0x314   :  { %5820 = vmatpush2.bf16.msra.mxu0 %v7429_v14 }
 0x315   :  { %5821 = vmatprep.subr.bf16.mxu0 %v7437_v27  ;;  %v7503_v27 = vld [vmem:[#allocation8 + $0x5cc] ss:$16 sps:$4 sm:$0xff]  }
 0x318   :  { %5822 = vmatpush2.bf16.msra.mxu0 %v7435_v32 }
 0x319   :  { %5823 = vmatprep.subr.bf16.mxu0 %v7443_v33  ;;  %v7501_v33 = vld [vmem:[#allocation8 + $0x5c8] ss:$16 sps:$4 sm:$0xff]  }
 0x31c   :  { %5824 = vmatpush2.bf16.msra.mxu0 %v7441_v38 }
 0x31d   :  { %5875 = vmatprep.subr.bf16.mxu0 %v7449_v39  ;;  %v7504_v39 = vld [vmem:[#allocation8 + $0x2e8] ss:$16 sps:$4 sm:$0xff]  }
 0x31f   :  { %v3943_v10 = vpop.f32.mrf.mxu0  ;;  %5826 = vmatmul.mubr.bf16.vlgmr.msra.gmra.mxu0 %v8099_v62  ;;  %v7459_v62 = vld [vmem:[#allocation8 + $0x4a8] ss:$16 sps:$4 sm:$0xff]  }
 0x320   :  { %v3944_v5 = vadd.f32 %v3943_v10, %v3903_v42  ;;  %5876 = vmatpush1.bf16.msra.mxu0 %v7447_v43  ;;  %5907 = vmatprep.mubr.bf16.mxu0 %v8120_v30  ;;  %v7507_v43 = vld [vmem:[#allocation8 + $0x5a8] ss:$16 sps:$4 sm:$0xff]   ;;  %v7518_v10 = vld [vmem:[#allocation8 + $0x2ac] ss:$16 sps:$4 sm:$0xff]  }
 0x321   :  { %v3984_v45 = vpop.f32.mrf.mxu1  ;;  %v3945_v46 = vpop.f32.mrf.mxu0  ;;  %5877 = vmatprep.subr.bf16.mxu0 %v7455_v25  ;;  %v7515_v25 = vld [vmem:[#allocation8 + $0x58c] ss:$16 sps:$4 sm:$0xff]   ;;  %v7510_v42 = vld [vmem:[#allocation8 + $0x2c8] ss:$16 sps:$4 sm:$0xff]  }
 0x322   :  { %v3985_v51 = vadd.f32 %v3984_v45, %v3944_v5  ;;  %v3946_v53 = vadd.f32 %v3945_v46, %v3905_v58  ;;  %v7513_v58 = vld [vmem:[#allocation8 + $0x588] ss:$16 sps:$4 sm:$0xff]   ;;  %v7521_v5 = vld [vmem:[#allocation8 + $0x56c] ss:$16 sps:$4 sm:$0xff]  }
 0x323   :  { %v3986_v54 = vpop.f32.mrf.mxu1  ;;  %v3947_v56 = vpop.f32.mrf.mxu0  ;;  %v7516_v45 = vld [vmem:[#allocation8 + $0x2a8] ss:$16 sps:$4 sm:$0xff]  }
 0x324   :  { %v3997_v59 = vmul.f32 %v3985_v51, %v3985_v51  ;;  %v3987_v40 = vadd.f32 %v3986_v54, %v3946_v53  ;;  %5878 = vmatpush1.bf16.msra.mxu0 %v7453_v9  ;;  %v4037_v14 = vmul.f32 0.5, %v3985_v51  ;;  %v7524_v9 = vld [vmem:[#allocation8 + $0x28c] ss:$16 sps:$4 sm:$0xff]   ;;  %v7519_v46 = vld [vmem:[#allocation8 + $0x568] ss:$16 sps:$4 sm:$0xff]  }
 0x325   :  { %v3988_v52 = vpop.f32.mrf.mxu1  ;;  %v3948_v60 = vpop.f32.mrf.mxu0  ;;  %5879 = vmatprep.subr.bf16.mxu0 %v7461_v50  ;;  %v7527_v50 = vld [vmem:[#allocation8 + $0x54c] ss:$16 sps:$4 sm:$0xff]   ;;  %v7528_v56 = vld [vmem:[#allocation8 + $0x268] ss:$16 sps:$4 sm:$0xff]  }
 0x326   :  { %v4005_v55 = vmul.f32 %v3997_v59, %v3985_v51  ;;  %v3998_v41 = vmul.f32 %v3987_v40, %v3987_v40  ;;  %v4038_v28 = vmul.f32 0.5, %v3987_v40  ;;  %v7530_v53 = vld [vmem:[#allocation8 + $0x26c] ss:$16 sps:$4 sm:$0xff]  }
 0x327   :  { %v3989_v61 = vpop.f32.mrf.mxu1  ;;  %v7533_v54 = vld [vmem:[#allocation8 + $0x52c] ss:$16 sps:$4 sm:$0xff]  }
 0x328   :  { %v4013_v30 = vmul.f32 0.044715, %v4005_v55  ;;  %v4006_v1 = vmul.f32 %v3998_v41, %v3987_v40  ;;  %5880 = vmatpush1.bf16.msra.mxu0 %v7459_v62  ;;  %v7536_v59 = vld [vmem:[#allocation8 + $0x24c] ss:$16 sps:$4 sm:$0xff]   ;;  %v7534_v62 = vld [vmem:[#allocation8 + $0x248] ss:$16 sps:$4 sm:$0xff]  }
 0x329   :  { %5881 = vmatprep.subr.bf16.mxu0 %v7467_v57  ;;  %v7539_v52 = vld [vmem:[#allocation8 + $0x50c] ss:$16 sps:$4 sm:$0xff]   ;;  %v7537_v57 = vld [vmem:[#allocation8 + $0x508] ss:$16 sps:$4 sm:$0xff]   ;;  %v8153_v55 = vld [vmem:[#allocation10] sm:$0xf] }
 0x32a   :  { %v4021_v3 = vadd.f32 %v4013_v30, %v3985_v51  ;;  %v4014_v31 = vmul.f32 0.044715, %v4006_v1  ;;  %v7522_v51 = vld [vmem:[#allocation8 + $0x288] ss:$16 sps:$4 sm:$0xff]   ;;  %v7542_v60 = vld [vmem:[#allocation8 + $0x22c] ss:$16 sps:$4 sm:$0xff]   ;;  %v4332_v30 = vrot.slane %v8153_v55, %v737_v44 }
 0x32b   :  { %v7540_v41 = vld [vmem:[#allocation8 + $0x228] ss:$16 sps:$4 sm:$0xff]   ;;  %v7545_v61 = vld [vmem:[#allocation8 + $0x20c] ss:$16 sps:$4 sm:$0xff]  }
 0x32c   :  { %v4029_v18 = vmul.f32 0.7978846, %v4021_v3  ;;  %v4022_v4 = vadd.f32 %v4014_v31, %v3987_v40  ;;  %5882 = vmatpush1.bf16.msra.mxu0 %v7465_v2  ;;  %v7531_v40 = vld [vmem:[#allocation8 + $0x528] ss:$16 sps:$4 sm:$0xff]   ;;  %v4336_v2 = vrot.slane %v8153_v55, %v741_v49  ;;  %v7548_v3 = vld [vmem:[#allocation8 + $0x3ec] ss:$16 sps:$4 sm:$0xff]  }
 0x32d   :  { %5883 = vmatprep.subr.bf16.mxu0 %v7473_v6  ;;  %v7543_v1 = vld [vmem:[#allocation8 + $0x208] ss:$16 sps:$4 sm:$0xff]  }
 0x32e   :  { %7662 = vtanh.f32 %v4029_v18  ;;  %v4030_v12 = vmul.f32 0.7978846, %v4022_v4  ;;  %v7546_v44 = vld [vmem:[#allocation8 + $0x3e8] ss:$16 sps:$4 sm:$0xff]  }
 0x330   :  { %7664 = vtanh.f32 %v4030_v12  ;;  %5884 = vmatpush1.bf16.msra.mxu0 %v7471_v11 }
 0x331   :  { %5885 = vmatprep.subr.bf16.mxu0 %v7479_v21 }
 0x334   :  { %5886 = vmatpush1.bf16.msra.mxu0 %v7477_v23 }
 0x335   :  { %5887 = vmatprep.subr.bf16.mxu0 %v7485_v22  ;;  %v7551_v22 = vld [vmem:[#allocation8 + $0x3cc] ss:$16 sps:$4 sm:$0xff]  }
 0x338   :  { %5888 = vmatpush1.bf16.msra.mxu0 %v7483_v35 }
 0x339   :  { %5889 = vmatprep.subr.bf16.mxu0 %v7491_v36 }
 0x33b   :  { %v7663_v63 = vpop.eup %7662 }
 0x33c   :  { %5890 = vmatpush1.bf16.msra.mxu0 %v7489_v13  ;;  %v4053_v20 = vadd.f32 1.0, %v7663_v63  ;;  %v7552_v63 = vld [vmem:[#allocation8 + $0x3a8] ss:$16 sps:$4 sm:$0xff]  }
 0x33d   :  { %v7665_v26 = vpop.eup %7664  ;;  %5891 = vmatprep.subr.bf16.mxu0 %v7497_v15  ;;  %v7554_v15 = vld [vmem:[#allocation8 + $0x3ac] ss:$16 sps:$4 sm:$0xff]  }
 0x33e   :  { %v4054_v29 = vadd.f32 1.0, %v7665_v26  ;;  %v4061_v32 = vmul.f32 %v4053_v20, %v4037_v14  ;;  %v7555_v20 = vld [vmem:[#allocation8 + $0x388] ss:$16 sps:$4 sm:$0xff]   ;;  %v7560_v26 = vld [vmem:[#allocation8 + $0x36c] ss:$16 sps:$4 sm:$0xff]  }
 0x33f   :  { %v7558_v14 = vld [vmem:[#allocation8 + $0x368] ss:$16 sps:$4 sm:$0xff]  }
 0x340   :  { %5892 = vmatpush2.bf16.msra.mxu0 %v7495_v19  ;;  %v4062_v34 = vmul.f32 %v4054_v29, %v4038_v28  ;;  %v8148_v7 = vpack.c.bf16 %v4061_v32, %v4061_v32  ;;  %v7557_v19 = vld [vmem:[#allocation8 + $0x38c] ss:$16 sps:$4 sm:$0xff]   ;;  %v7561_v28 = vld [vmem:[#allocation8 + $0x348] ss:$16 sps:$4 sm:$0xff]  }
 0x341   :  { %5893 = vmatprep.subr.bf16.mxu0 %v7503_v27  ;;  %v7563_v27 = vld [vmem:[#allocation8 + $0x34c] ss:$16 sps:$4 sm:$0xff]   ;;  %v7564_v32 = vld [vmem:[#allocation8 + $0x328] ss:$16 sps:$4 sm:$0xff]  }
 0x342   :  { %v8146_v38 = vpack.c.bf16 %v4062_v34, %v4062_v34  ;;  %v7566_v29 = vld [vmem:[#allocation8 + $0x32c] ss:$16 sps:$4 sm:$0xff]   ;;  %v7567_v34 = vld [vmem:[#allocation8 + $0x308] ss:$16 sps:$4 sm:$0xff]  }
 0x344   :  { %5784 = vmatprep.mubr.bf16.mxu1 %v8146_v38  ;;  %5894 = vmatpush2.bf16.msra.mxu0 %v7501_v33  ;;  %v7569_v33 = vld [vmem:[#allocation8 + $0x30c] ss:$16 sps:$4 sm:$0xff]  }
 0x345   :  { %5785 = vmatmul.mubr.bf16.vlgmr.msra.gmra.mxu1 %v8148_v7  ;;  %5895 = vmatprep.subr.bf16.mxu0 %v7509_v37  ;;  %v7572_v37 = vld [vmem:[#allocation8 + $0x6ec] ss:$16 sps:$4 sm:$0xff]  }
 0x346   :  { %5835 = vmatpush1.bf16.msra.mxu1 %v7504_v39  ;;  %5866 = vmatprep.mubr.bf16.mxu1 %v8076_v16  ;;  %v7525_v16 = vld [vmem:[#allocation8 + $0x548] ss:$16 sps:$4 sm:$0xff]  }
 0x347   :  { %5836 = vmatprep.subr.bf16.mxu1 %v7512_v8  ;;  %v7570_v39 = vld [vmem:[#allocation8 + $0x6e8] ss:$16 sps:$4 sm:$0xff]   ;;  %v7575_v8 = vld [vmem:[#allocation8 + $0x6cc] ss:$16 sps:$4 sm:$0xff]  }
 0x348   :  { %5896 = vmatpush2.bf16.msra.mxu0 %v7507_v43  ;;  %v7573_v43 = vld [vmem:[#allocation8 + $0x6c8] ss:$16 sps:$4 sm:$0xff]  }
 0x349   :  { %5897 = vmatprep.subr.bf16.mxu0 %v7515_v25  ;;  %v7578_v25 = vld [vmem:[#allocation8 + $0x6ac] ss:$16 sps:$4 sm:$0xff]  }
 0x34a   :  { %5837 = vmatpush1.bf16.msra.mxu1 %v7510_v42  ;;  %v7618_v42 = vld [vmem:[#allocation11 + $0x78] sm:$0xff]  }
 0x34b   :  { %5838 = vmatprep.subr.bf16.mxu1 %v7518_v10  ;;  %v7576_v10 = vld [vmem:[#allocation8 + $0x6a8] ss:$16 sps:$4 sm:$0xff]  }
 0x34c   :  { %5898 = vmatpush2.bf16.msra.mxu0 %v7513_v58  ;;  %v7619_v58 = vld [vmem:[#allocation11 + $0x38] sm:$0xff]  }
 0x34d   :  { %5899 = vmatprep.subr.bf16.mxu0 %v7521_v5  ;;  %v7581_v5 = vld [vmem:[#allocation8 + $0x68c] ss:$16 sps:$4 sm:$0xff]  }
 0x34e   :  { %5839 = vmatpush1.bf16.msra.mxu1 %v7516_v45  ;;  %v7620_v45 = vld [vmem:[#allocation11 + $0x70] sm:$0xff]  }
 0x34f   :  { %5840 = vmatprep.subr.bf16.mxu1 %v7524_v9  ;;  %v7579_v9 = vld [vmem:[#allocation8 + $0x688] ss:$16 sps:$4 sm:$0xff]  }
 0x350   :  { %5900 = vmatpush2.bf16.msra.mxu0 %v7519_v46  ;;  %v7621_v46 = vld [vmem:[#allocation11 + $0x30] sm:$0xff]  }
 0x351   :  { %5901 = vmatprep.subr.bf16.mxu0 %v7527_v50  ;;  %v7582_v50 = vld [vmem:[#allocation8 + $0x668] ss:$16 sps:$4 sm:$0xff]  }
 0x352   :  { %5841 = vmatpush1.bf16.msra.mxu1 %v7522_v51  ;;  %v7623_v51 = vld [vmem:[#allocation11 + $0x28] sm:$0xff]  }
 0x353   :  { %5842 = vmatprep.subr.bf16.mxu1 %v7530_v53  ;;  %v7587_v53 = vld [vmem:[#allocation8 + $0x64c] ss:$16 sps:$4 sm:$0xff]  }
 0x354   :  { %5902 = vmatpush2.bf16.msra.mxu0 %v7525_v16  ;;  %v7624_v16 = vld [vmem:[#allocation11 + $0x60] sm:$0xff]  }
 0x355   :  { %5903 = vmatprep.subr.bf16.mxu0 %v7533_v54  ;;  %v7625_v54 = vld [vmem:[#allocation11 + $0x20] sm:$0xff]  }
 0x356   :  { %5843 = vmatpush1.bf16.msra.mxu1 %v7528_v56  ;;  %v7626_v56 = vld [vmem:[#allocation11 + $0x58] sm:$0xff]  }
 0x357   :  { %5844 = vmatprep.subr.bf16.mxu1 %v7536_v59  ;;  %v7585_v59 = vld [vmem:[#allocation8 + $0x648] ss:$16 sps:$4 sm:$0xff]  }
 0x358   :  { %5904 = vmatpush2.bf16.msra.mxu0 %v7531_v40  ;;  %v7590_v40 = vld [vmem:[#allocation8 + $0x62c] ss:$16 sps:$4 sm:$0xff]  }
 0x359   :  { %5905 = vmatprep.subr.bf16.mxu0 %v7539_v52  ;;  %v7627_v52 = vld [vmem:[#allocation11 + $0x18] sm:$0xff]  }
 0x35a   :  { %5845 = vmatpush1.bf16.msra.mxu1 %v7534_v62  ;;  %v7628_v62 = vld [vmem:[#allocation11 + $0x50] sm:$0xff]  }
 0x35b   :  { %5846 = vmatprep.subr.bf16.mxu1 %v7542_v60  ;;  %v7588_v60 = vld [vmem:[#allocation8 + $0x628] ss:$16 sps:$4 sm:$0xff]  }
 0x35c   :  { %5906 = vmatpush2.bf16.msra.mxu0 %v7537_v57  ;;  %v7593_v57 = vld [vmem:[#allocation8 + $0x60c] ss:$16 sps:$4 sm:$0xff]  }
 0x35d   :  { %7162 = vmatprep.subr.bf16.mxu0 %v7618_v42 }
 0x35e   :  { %5847 = vmatpush1.bf16.msra.mxu1 %v7540_v41  ;;  %v7629_v41 = vld [vmem:[#allocation11 + $0x10] sm:$0xff]  }
 0x35f   :  { %v5663_v6 = vpop.f32.mrf.mxu0  ;;  %5908 = vmatmul.mubr.bf16.vlgmr.msra.gmra.mxu0 %v8124_v48  ;;  %5848 = vmatprep.subr.bf16.mxu1 %v7545_v61  ;;  %v7549_v48 = vld [vmem:[#allocation8 + $0x3c8] ss:$16 sps:$4 sm:$0xff]  }
 0x360   :  { %v5664_v31 = vadd.f32 %v5663_v6, %v4332_v30  ;;  %7163 = vmatpush3.bf16.msra.mxu0 %v7619_v58  ;;  %v7591_v61 = vld [vmem:[#allocation8 + $0x608] ss:$16 sps:$4 sm:$0xff]  }
 0x361   :  { %v5704_v18 = vpop.f32.mrf.mxu1  ;;  %v5665_v4 = vpop.f32.mrf.mxu0  ;;  %7164 = vmatprep.subr.bf16.mxu0 %v7620_v45 }
 0x362   :  { %v8162_v11 = vadd.f32 %v5704_v18, %v5664_v31  ;;  %v5666_v21 = vadd.f32 %v5665_v4, %v4336_v2  ;;  %5849 = vmatpush1.bf16.msra.mxu1 %v7543_v1  ;;  %v7596_v1 = vld [vmem:[#allocation8 + $0x7ec] ss:$16 sps:$4 sm:$0xff]   ;;  %v7594_v4 = vld [vmem:[#allocation8 + $0x7e8] ss:$16 sps:$4 sm:$0xff]  }
 0x363   :  { %v5706_v12 = vpop.f32.mrf.mxu1  ;;  %v5667_v23 = vpop.f32.mrf.mxu0  ;;  %5850 = vmatprep.subr.bf16.mxu1 %v7548_v3  ;;  %v7630_v3 = vld [vmem:[#allocation11 + $0x48] sm:$0xff]  }
 0x364   :  { %v8164_v35 = vadd.f32 %v5706_v12, %v5666_v21  ;;  %7165 = vmatpush3.bf16.msra.mxu0 %v7621_v46  ;;  %v7631_v31 = vld [vmem:[#allocation11 + $0x8] sm:$0xff]   ;;  %v7632_v23 = vld [vmem:[#allocation11 + $0x40] sm:$0xff]   ;;  %v7636_v46 = vld [vmem:[#allocation11 + $0xf0] sm:$0xff]  }
 0x365   :  { %v5708_v49 = vpop.f32.mrf.mxu1  ;;  %v5668_v36 = vpop.f32.mrf.mxu0  ;;  %v7599_v12 = vld [vmem:[#allocation8 + $0x7cc] ss:$16 sps:$4 sm:$0xff]  }
 0x366   :  { %5851 = vmatpush2.bf16.msra.mxu1 %v7546_v44  ;;  %v7597_v49 = vld [vmem:[#allocation8 + $0x7c8] ss:$16 sps:$4 sm:$0xff]  }
 0x367   :  { %v5709_v13 = vpop.f32.mrf.mxu1  ;;  %5852 = vmatprep.subr.bf16.mxu1 %v7551_v22  ;;  %v7633_v22 = vld [vmem:[#allocation11] sm:$0xff]  }
 0x368   :  { %v7600_v36 = vld [vmem:[#allocation8 + $0x7a8] ss:$16 sps:$4 sm:$0xff]  }
 0x369   :  { %v7603_v13 = vld [vmem:[#allocation8 + $0x788] ss:$16 sps:$4 sm:$0xff]  }
 0x36a   :  { %5853 = vmatpush2.bf16.msra.mxu1 %v7549_v48  ;;  %v7608_v48 = vld [vmem:[#allocation8 + $0x76c] ss:$16 sps:$4 sm:$0xff]  }
 0x36b   :  { %5854 = vmatprep.subr.bf16.mxu1 %v7554_v15  ;;  %v7606_v15 = vld [vmem:[#allocation8 + $0x768] ss:$16 sps:$4 sm:$0xff]  }
 0x36e   :  { %5855 = vmatpush2.bf16.msra.mxu1 %v7552_v63  ;;  %v7611_v63 = vld [vmem:[#allocation8 + $0x74c] ss:$16 sps:$4 sm:$0xff]  }
 0x36f   :  { %5856 = vmatprep.subr.bf16.mxu1 %v7557_v19  ;;  %v7609_v19 = vld [vmem:[#allocation8 + $0x748] ss:$16 sps:$4 sm:$0xff]  }
 0x372   :  { %5857 = vmatpush2.bf16.msra.mxu1 %v7555_v20  ;;  %v7614_v20 = vld [vmem:[#allocation8 + $0x72c] ss:$16 sps:$4 sm:$0xff]  }
 0x373   :  { %5858 = vmatprep.subr.bf16.mxu1 %v7560_v26  ;;  %v7612_v26 = vld [vmem:[#allocation8 + $0x728] ss:$16 sps:$4 sm:$0xff]  }
 0x376   :  { %5859 = vmatpush2.bf16.msra.mxu1 %v7558_v14  ;;  %v7617_v14 = vld [vmem:[#allocation8 + $0x70c] ss:$16 sps:$4 sm:$0xff]  }
 0x377   :  { %5860 = vmatprep.subr.bf16.mxu1 %v7563_v27  ;;  %v7615_v27 = vld [vmem:[#allocation8 + $0x708] ss:$16 sps:$4 sm:$0xff]  }
 0x37a   :  { %5861 = vmatpush2.bf16.msra.mxu1 %v7561_v28 }
 0x37b   :  { %5862 = vmatprep.subr.bf16.mxu1 %v7566_v29 }
 0x37e   :  { %5863 = vmatpush2.bf16.msra.mxu1 %v7564_v32 }
 0x37f   :  { %5864 = vmatprep.subr.bf16.mxu1 %v7569_v33 }
 0x382   :  { %5865 = vmatpush2.bf16.msra.mxu1 %v7567_v34 }
 0x383   :  { %5916 = vmatprep.subr.bf16.mxu1 %v7572_v37 }
 0x385   :  { %5867 = vmatmul.mubr.bf16.vlgmr.msra.gmra.mxu1 %v8101_v0  ;;  %v7584_v0 = vld [vmem:[#allocation8 + $0x66c] ss:$16 sps:$4 sm:$0xff]  }
 0x386   :  { %5917 = vmatpush1.bf16.msra.mxu1 %v7570_v39  ;;  %5948 = vmatprep.mubr.bf16.mxu1 %v8146_v38  ;;  %v7622_v38 = vld [vmem:[#allocation11 + $0x68] sm:$0xff]  }
 0x387   :  { %5918 = vmatprep.subr.bf16.mxu1 %v7575_v8  ;;  %7166 = vmatprep.subr.bf16.mxu0 %v7622_v38 }
 0x388   :  { %7167 = vmatpush3.bf16.msra.mxu0 %v7623_v51 }
 0x389   :  { %7168 = vmatprep.subr.bf16.mxu0 %v7624_v16  ;;  %v7638_v16 = vld [vmem:[#allocation11 + $0xe8] sm:$0xff]  }
 0x38a   :  { %5919 = vmatpush1.bf16.msra.mxu1 %v7573_v43 }
 0x38b   :  { %5920 = vmatprep.subr.bf16.mxu1 %v7578_v25  ;;  %v7634_v25 = vld [vmem:[#allocation11 + $0xf8] sm:$0xff]  }
 0x38c   :  { %7169 = vmatpush3.bf16.msra.mxu0 %v7625_v54  ;;  %v7639_v54 = vld [vmem:[#allocation11 + $0xa8] sm:$0xff]  }
 0x38d   :  { %7170 = vmatprep.subr.bf16.mxu0 %v7626_v56 }
 0x38e   :  { %5921 = vmatpush1.bf16.msra.mxu1 %v7576_v10  ;;  %v7635_v10 = vld [vmem:[#allocation11 + $0xb8] sm:$0xff]  }
 0x38f   :  { %5922 = vmatprep.subr.bf16.mxu1 %v7581_v5 }
 0x390   :  { %7171 = vmatpush3.bf16.msra.mxu0 %v7627_v52  ;;  %v7642_v52 = vld [vmem:[#allocation11 + $0xd8] sm:$0xff]  }
 0x391   :  { %7172 = vmatprep.subr.bf16.mxu0 %v7628_v62  ;;  %v7643_v62 = vld [vmem:[#allocation11 + $0x98] sm:$0xff]  }
 0x392   :  { %5923 = vmatpush1.bf16.msra.mxu1 %v7579_v9 }
 0x393   :  { %5924 = vmatprep.subr.bf16.mxu1 %v7584_v0  ;;  %v7637_v0 = vld [vmem:[#allocation11 + $0xb0] sm:$0xff]  }
 0x394   :  { %7173 = vmatpush3.bf16.msra.mxu0 %v7629_v41  ;;  %v7646_v41 = vld [vmem:[#allocation11 + $0xc8] sm:$0xff]  }
 0x395   :  { %7174 = vmatprep.subr.bf16.mxu0 %v7630_v3 }
 0x396   :  { %5925 = vmatpush1.bf16.msra.mxu1 %v7582_v50 }
 0x397   :  { %5926 = vmatprep.subr.bf16.mxu1 %v7587_v53 }
 0x398   :  { %7175 = vmatpush3.bf16.msra.mxu0 %v7631_v31 }
 0x399   :  { %7176 = vmatprep.subr.bf16.mxu0 %v7632_v23  ;;  %v7649_v23 = vld [vmem:[#allocation11 + $0x80] sm:$0xff]  }
 0x39a   :  { %5927 = vmatpush1.bf16.msra.mxu1 %v7585_v59  ;;  %v7640_v59 = vld [vmem:[#allocation11 + $0xe0] sm:$0xff]  }
 0x39b   :  { %5928 = vmatprep.subr.bf16.mxu1 %v7590_v40  ;;  %v7641_v40 = vld [vmem:[#allocation11 + $0xa0] sm:$0xff]  }
 0x39c   :  { %7177 = vmatpush3.bf16.msra.mxu0 %v7633_v22 }
 0x39e   :  { %5929 = vmatpush1.bf16.msra.mxu1 %v7588_v60  ;;  %v7644_v60 = vld [vmem:[#allocation11 + $0xd0] sm:$0xff]  }
 0x39f   :  { %v5745_v30 = vpop.f32.mrf.mxu0  ;;  %5930 = vmatprep.subr.bf16.mxu1 %v7593_v57  ;;  %v7645_v57 = vld [vmem:[#allocation11 + $0x90] sm:$0xff]  }
 0x3a0   :  { %v5746_v2 = vadd.f32 %v5745_v30, %v8162_v11  ;;  %v7602_v11 = vld [vmem:[#allocation8 + $0x7ac] ss:$16 sps:$4 sm:$0xff]  }
 0x3a1   :  { %v5747_v6 = vpop.f32.mrf.mxu0 }
 0x3a2   :  { %v5748_v18 = vadd.f32 %v5747_v6, %v8164_v35  ;;  %5931 = vmatpush1.bf16.msra.mxu1 %v7591_v61  ;;  %v7605_v35 = vld [vmem:[#allocation8 + $0x78c] ss:$16 sps:$4 sm:$0xff]   ;;  %v7648_v6 = vld [vmem:[#allocation11 + $0xc0] sm:$0xff]  }
 0x3a3   :  { %v5749_v21 = vpop.f32.mrf.mxu0  ;;  %5932 = vmatprep.subr.bf16.mxu1 %v7596_v1  ;;  %v7647_v1 = vld [vmem:[#allocation11 + $0x88] sm:$0xff]  }
 0x3a5   :  { %v5750_v44 = vpop.f32.mrf.mxu0 }
 0x3a6   :  { %5933 = vmatpush2.bf16.msra.mxu1 %v7594_v4 }
 0x3a7   :  { %5934 = vmatprep.subr.bf16.mxu1 %v7599_v12 }
 0x3aa   :  { %5935 = vmatpush2.bf16.msra.mxu1 %v7597_v49 }
 0x3ab   :  { %5936 = vmatprep.subr.bf16.mxu1 %v7602_v11 }
 0x3ae   :  { %5937 = vmatpush2.bf16.msra.mxu1 %v7600_v36 }
 0x3af   :  { %5938 = vmatprep.subr.bf16.mxu1 %v7605_v35  ;;  %v4340_v35 = vrot.slane %v8153_v55, %v745_v17 }
 0x3b2   :  { %5939 = vmatpush2.bf16.msra.mxu1 %v7603_v13  ;;  %v4344_v13 = vrot.slane %v8153_v55, %v749_v24 }
 0x3b3   :  { %5940 = vmatprep.subr.bf16.mxu1 %v7608_v48 }
 0x3b6   :  { %5941 = vmatpush2.bf16.msra.mxu1 %v7606_v15 }
 0x3b7   :  { %5942 = vmatprep.subr.bf16.mxu1 %v7611_v63 }
 0x3ba   :  { %5943 = vmatpush2.bf16.msra.mxu1 %v7609_v19 }
 0x3bb   :  { %5944 = vmatprep.subr.bf16.mxu1 %v7614_v20 }
 0x3be   :  { %5945 = vmatpush2.bf16.msra.mxu1 %v7612_v26 }
 0x3bf   :  { %5946 = vmatprep.subr.bf16.mxu1 %v7617_v14 }
 0x3c2   :  { %5947 = vmatpush2.bf16.msra.mxu1 %v7615_v27 }
 0x3c3   :  { %7184 = vmatprep.subr.bf16.mxu1 %v7634_v25 }
 0x3c5   :  { %5949 = vmatmul.mubr.bf16.vlgmr.msra.gmra.mxu1 %v8148_v7 }
 0x3c6   :  { %7185 = vmatpush3.bf16.msra.mxu1 %v7635_v10 }
 0x3c7   :  { %7186 = vmatprep.subr.bf16.mxu1 %v7636_v46 }
 0x3ca   :  { %7187 = vmatpush3.bf16.msra.mxu1 %v7637_v0 }
 0x3cb   :  { %7188 = vmatprep.subr.bf16.mxu1 %v7638_v16 }
 0x3ce   :  { %7189 = vmatpush3.bf16.msra.mxu1 %v7639_v54 }
 0x3cf   :  { %7190 = vmatprep.subr.bf16.mxu1 %v7640_v59 }
 0x3d2   :  { %7191 = vmatpush3.bf16.msra.mxu1 %v7641_v40 }
 0x3d3   :  { %7192 = vmatprep.subr.bf16.mxu1 %v7642_v52 }
 0x3d6   :  { %7193 = vmatpush3.bf16.msra.mxu1 %v7643_v62  ;;  %v7129_v62 = vld [vmem:[#allocation13] ss:$0 sm:$0xff] }
 0x3d7   :  { %7194 = vmatprep.subr.bf16.mxu1 %v7644_v60 }
 0x3da   :  { %7195 = vmatpush3.bf16.msra.mxu1 %v7645_v57 }
 0x3db   :  { %7196 = vmatprep.subr.bf16.mxu1 %v7646_v41 }
 0x3de   :  { %7197 = vmatpush3.bf16.msra.mxu1 %v7647_v1 }
 0x3df   :  { %v8171_v28 = vpop.f32.mrf.mxu0  ;;  %7198 = vmatprep.subr.bf16.mxu1 %v7648_v6 }
 0x3e0   :  { %v5828_v48 = vadd.f32 %v8171_v28, %v4340_v35 }
 0x3e1   :  { %v8173_v29 = vpop.f32.mrf.mxu0 }
 0x3e2   :  { %7199 = vmatpush3.bf16.msra.mxu1 %v7649_v23  ;;  %v5830_v63 = vadd.f32 %v8173_v29, %v4344_v13 }
 0x3e3   :  { %v5831_v32 = vpop.f32.mrf.mxu0 }
 0x3e5   :  { %v5832_v33 = vpop.f32.mrf.mxu0 }
 0x405   :  { %v5786_v34 = vpop.f32.mrf.mxu1 }
 0x406   :  { %v5787_v37 = vadd.f32 %v5786_v34, %v5746_v2 }
 0x407   :  { %v5788_v39 = vpop.f32.mrf.mxu1 }
 0x408   :  { %v5957_v8 = vmul.f32 %v5787_v37, %v5787_v37  ;;  %v5789_v43 = vadd.f32 %v5788_v39, %v5748_v18  ;;  %v5977_v31 = vmul.f32 0.5, %v5787_v37 }
 0x409   :  { %v5790_v42 = vpop.f32.mrf.mxu1 }
 0x40a   :  { %v5961_v58 = vmul.f32 %v5957_v8, %v5787_v37  ;;  %v5958_v5 = vmul.f32 %v5789_v43, %v5789_v43  ;;  %v5978_v4 = vmul.f32 0.5, %v5789_v43 }
 0x40b   :  { %v5791_v45 = vpop.f32.mrf.mxu1 }
 0x40c   :  { %v5965_v7 = vmul.f32 0.044715, %v5961_v58  ;;  %v5962_v9 = vmul.f32 %v5958_v5, %v5789_v43 }
 0x40e   :  { %v5969_v38 = vadd.f32 %v5965_v7, %v5787_v37  ;;  %v5966_v50 = vmul.f32 0.044715, %v5962_v9 }
 0x410   :  { %v5973_v51 = vmul.f32 0.7978846, %v5969_v38  ;;  %v5970_v53 = vadd.f32 %v5966_v50, %v5789_v43 }
 0x412   :  { %7666 = vtanh.f32 %v5973_v51  ;;  %v5974_v56 = vmul.f32 0.7978846, %v5970_v53 }
 0x414   :  { %7668 = vtanh.f32 %v5974_v56 }
 0x41f   :  { %v7667_v61 = vpop.eup %7666  ;;  %v5909_v30 = vpop.f32.mrf.mxu0 }
 0x420   :  { %v5985_v2 = vadd.f32 1.0, %v7667_v61 }
 0x421   :  { %v7669_v3 = vpop.eup %7668  ;;  %v5911_v18 = vpop.f32.mrf.mxu0 }
 0x422   :  { %v5986_v21 = vadd.f32 1.0, %v7669_v3  ;;  %v5989_v44 = vmul.f32 %v5985_v2, %v5977_v31 }
 0x423   :  { %v5913_v12 = vpop.f32.mrf.mxu0 }
 0x424   :  { %v5990_v22 = vmul.f32 %v5986_v21, %v5978_v4  ;;  %v5993_v36 = vpack.c.bf16 %v5989_v44, %v5989_v44 }
 0x425   :  { %v5914_v49 = vpop.f32.mrf.mxu0 }
 0x426   :  { %v5994_v11 = vpack.c.bf16 %v5990_v22, %v5990_v22 }
 0x428   :  { %6292 = vmatprep.mubr.bf16.mxu0 %v5994_v11 }
 0x429   :  { %6293 = vmatmul.mubr.bf16.vlgmr.msra.gmra.mxu0 %v5993_v36 }
 0x445   :  { %v5868_v15 = vpop.f32.mrf.mxu1 }
 0x446   :  { %v5869_v19 = vadd.f32 %v5868_v15, %v5828_v48 }
 0x447   :  { %v5870_v20 = vpop.f32.mrf.mxu1 }
 0x448   :  { %v5871_v26 = vadd.f32 %v5870_v20, %v5830_v63  ;;  %v5910_v14 = vadd.f32 %v5909_v30, %v5869_v19 }
 0x449   :  { %v5872_v27 = vpop.f32.mrf.mxu1 }
 0x44a   :  { %v5912_v32 = vadd.f32 %v5911_v18, %v5871_v26 }
 0x44b   :  { %v5873_v33 = vpop.f32.mrf.mxu1 }
 0x485   :  { %v5950_v34 = vpop.f32.mrf.mxu1 }
 0x486   :  { %v5951_v37 = vadd.f32 %v5950_v34, %v5910_v14 }
 0x487   :  { %v5952_v39 = vpop.f32.mrf.mxu1 }
 0x488   :  { %v5959_v17 = vmul.f32 %v5951_v37, %v5951_v37  ;;  %v5953_v8 = vadd.f32 %v5952_v39, %v5912_v32  ;;  %v5979_v46 = vmul.f32 0.5, %v5951_v37 }
 0x489   :  { %v5954_v47 = vpop.f32.mrf.mxu1 }
 0x48a   :  { %v5963_v43 = vmul.f32 %v5959_v17, %v5951_v37  ;;  %v5960_v24 = vmul.f32 %v5953_v8, %v5953_v8  ;;  %v5980_v0 = vmul.f32 0.5, %v5953_v8 }
 0x48b   :  { %v5955_v55 = vpop.f32.mrf.mxu1 }
 0x48c   :  { %v5967_v28 = vmul.f32 0.044715, %v5963_v43  ;;  %v5964_v25 = vmul.f32 %v5960_v24, %v5953_v8 }
 0x48e   :  { %v5971_v42 = vadd.f32 %v5967_v28, %v5951_v37  ;;  %v5968_v29 = vmul.f32 0.044715, %v5964_v25 }
 0x490   :  { %v5975_v10 = vmul.f32 0.7978846, %v5971_v42  ;;  %v5972_v58 = vadd.f32 %v5968_v29, %v5953_v8 }
 0x492   :  { %7670 = vtanh.f32 %v5975_v10  ;;  %v5976_v5 = vmul.f32 0.7978846, %v5972_v58 }
 0x494   :  { %7672 = vtanh.f32 %v5976_v5 }
 0x49f   :  { %v7671_v45 = vpop.eup %7670 }
 0x4a0   :  { %v5987_v7 = vadd.f32 1.0, %v7671_v45 }
 0x4a1   :  { %v7673_v9 = vpop.eup %7672 }
 0x4a2   :  { %v5988_v38 = vadd.f32 1.0, %v7673_v9  ;;  %v5991_v50 = vmul.f32 %v5987_v7, %v5979_v46 }
 0x4a4   :  { %v5992_v51 = vmul.f32 %v5988_v38, %v5980_v0  ;;  %v5995_v16 = vpack.c.bf16 %v5991_v50, %v5991_v50 }
 0x4a6   :  { %v5996_v53 = vpack.c.bf16 %v5992_v51, %v5992_v51 }
 0x4a8   :  { %6332 = vmatprep.mubr.bf16.mxu1 %v5996_v53 }
 0x4a9   :  { %6333 = vmatmul.mubr.bf16.vlgmr.msra.gmra.mxu1 %v5995_v16 }
 0x4e9   :  { %v7178_v54 = vpop.f32.mrf.mxu0 }
 0x4eb   :  { %v7179_v56 = vpop.f32.mrf.mxu0 }
 0x4ec   :  { %v7180_v59 = vadd.f32 %v7179_v56, %v7178_v54 }
 0x4ed   :  { %v7181_v40 = vpop.f32.mrf.mxu0 }
 0x4ee   :  { %v6295_v41 = vadd.f32 %v7180_v59, %v7129_v62 }
 0x4ef   :  { %v7182_v52 = vpop.f32.mrf.mxu0 }
 0x569   :  { %v7200_v60 = vpop.f32.mrf.mxu1 }
 0x56b   :  { %v7201_v57 = vpop.f32.mrf.mxu1 }
 0x56c   :  { %v7202_v61 = vadd.f32 %v7201_v57, %v7200_v60 }
 0x56d   :  { %v7203_v30 = vpop.f32.mrf.mxu1 }
 0x56e   :  { %v6335_v1 = vadd.f32 %v7202_v61, %v6295_v41 }
 0x56f   :  { %v7204_v2 = vpop.f32.mrf.mxu1 }
 0x570   :  { %6340 = vst [vmem:[#allocation14] sm:$0xff] %v6335_v1 }
 0x571   :  { %6345 = vsyncadd [#allocation4], 96  ;;  %s7859_s4 = smov [#allocation14]  }
 0x572   :  { %s6346_s6 = sshll.u32 %s7859_s4, 4  ;;  %s6347_s6 = int_to_ptr.vmem [resolvable:$true] %s6346_s6 }
 0x573   :  { %s7815_s1 = scalar_lea.vmem %s6347_s6, 32  ;;  %s7819_s17 = scalar_lea.vmem %s6347_s6, 128 }
 0x574   :  { %p7816_p7 = scmp.ne.s32.totalorder %s6347_s6, %s7815_s1  ;;  %p7820_p8 = scmp.lt.s32.totalorder %s6347_s6, %s6347_s6 }
 0x575   :  { %p7821_p9 = scmp.lt.s32.totalorder %s7819_s17, %s7815_s1 }
 0x577   :  { %p7822_p10 = por %p7821_p9, %p7820_p8 }
 0x579   :  { %p7823_p11 = pnand %p7822_p10, %p7816_p7 }
 0x57b   :  { %7826 = shalt.err (!%p7823_p11)
}
 0x57c   :  { %s7860_s18 = smov 2  }
 0x57d   :  { %6352 = dma.vmem_to_hbm [thread:$0]  %s6347_s6, 32, %s8195_s7, [#allocation4], %s7847_s28, %s7847_s28, %s7860_s18  }
 0x57e   :  { %7843 = dma.done.wait [#allocation4], 128  }
 0x57f   :  { %7844 = vsyncadd [#allocation4], 4294967168 }
 0x580   :  { %6356 = vsyncpa [#allocation3], 1 }
 0x581   :  { %6357 = vsyncpa [#allocation6], 1 }
 0x582   :  { %6358 = vsyncpa [#allocation9], 1 }
 0x583   :  { %6359 = vsyncpa [#allocation12], 1 }
 0x584   :  { %6360 = vsyncpa [#allocation4], 1 }

</bundles_post_ra>
